<compile_context>
chip_gen: v5e
topology: v5e:2x2
jax: 0.10.0
libtpu: 0.0.40
codegen_flags: <defaults>
</compile_context>

<pallas_src>
import math
import jax
import jax.numpy as jnp
from jax.experimental import pallas as pl
from jax.experimental.pallas import tpu as pltpu


def _round_up(x, m):
    return ((x + m - 1) // m) * m


# --------------------------- Fused GRU + classifier kernel ---------------------------

def make_fused_kernel(num_layers, T, Bp, Hp):
    """Kernel body for fixed (static) num_layers, T, padded batch Bp, padded hidden Hp."""
    H2, H3, H4 = 2 * Hp, 3 * Hp, 4 * Hp
    L = num_layers

    def kernel(*refs):
        x_ref = refs[0]                                   # (T*Bp, Ip)  bf16
        wih0_ref, whh0_ref, bih0_ref, bhn0_ref = refs[1:5]
        pos = 5
        deep_refs = []
        for _ in range(L - 1):
            deep_refs.append(refs[pos:pos + 2])           # (w_fused, b_fused)
            pos += 2
        gamma_ref, beta_ref, mean_ref, var_ref, wc_ref, bc_ref = refs[pos:pos + 6]
        pos += 6
        out_ref = refs[pos]                               # (Bp, Op)     f32
        gx_ref = refs[pos + 1]                            # (T*Bp, 3Hp)  f32 scratch

        # ---- hoisted layer-0 input projection: all T timesteps in ONE MXU call ----
        # (bias already contains b_ir+b_hr, b_iz+b_hz, b_in; b_hn is added per step)
        gx_ref[...] = (jnp.dot(x_ref[...], wih0_ref[...],
                               preferred_element_type=jnp.float32)
                       + bih0_ref[...])

        w_hh0 = whh0_ref[...]                             # (Hp, 3Hp) bf16, hoisted
        b_hn0 = bhn0_ref[...]                             # (1, Hp)   f32,  hoisted
        deep_w = [(w[...], b[...]) for (w, b) in deep_refs]

        def cell0(h0, gx_t):
            gh = jnp.dot(h0.astype(jnp.bfloat16), w_hh0,
                         preferred_element_type=jnp.float32)
            r = jax.nn.sigmoid(gx_t[:, :Hp] + gh[:, :Hp])
            z = jax.nn.sigmoid(gx_t[:, Hp:H2] + gh[:, Hp:H2])
            n = jnp.tanh(gx_t[:, H2:H3] + r * (gh[:, H2:H3] + b_hn0))
            return (1.0 - z) * n + z * h0

        def cell_deep(li, x_t, h_li):
            # K-concat: input (= previous layer hidden) and own hidden share one matmul.
            w_f, b_f = deep_w[li - 1]
            lhs = jnp.concatenate([x_t, h_li], axis=1).astype(jnp.bfloat16)  # (Bp, 2Hp)
            g = jnp.dot(lhs, w_f, preferred_element_type=jnp.float32) + b_f  # (Bp, 4Hp)
            r = jax.nn.sigmoid(g[:, :Hp])
            z = jax.nn.sigmoid(g[:, Hp:H2])
            n = jnp.tanh(g[:, H2:H3] + r * g[:, H3:H4])
            return (1.0 - z) * n + z * h_li

        def superstep(s, hs, active):
            # hs[li] is layer li's hidden at its most recent timestep (prev superstep).
            new_hs = list(hs)
            if active[0]:
                start = s * Bp
                if not isinstance(start, int):
                    start = pl.multiple_of(start, Bp)
                gx_t = gx_ref[pl.ds(start, Bp), :]
                new_hs[0] = cell0(hs[0], gx_t)
            for li in range(1, L):
                if active[li]:
                    # reads hs[li-1] (previous superstep's value) => timestep s-li input
                    new_hs[li] = cell_deep(li, hs[li - 1], hs[li])
            return tuple(new_hs)

        hs = tuple(jnp.zeros((Bp, Hp), jnp.float32) for _ in range(L))

        # -- pipeline fill (Python-unrolled): supersteps 0 .. L-2 --
        for s in range(min(L - 1, T + L - 1)):
            active = tuple(0 <= s - li < T for li in range(L))
            hs = superstep(s, hs, active)

        # -- steady state (all layers active): supersteps L-1 .. T-1 --
        if T >= L:
            hs = jax.lax.fori_loop(
                L - 1, T,
                lambda s, carry: superstep(s, carry, (True,) * L),
                hs, unroll=True)

        # -- pipeline drain (Python-unrolled): supersteps max(T, L-1) .. T+L-2 --
        for s in range(max(T, L - 1), T + L - 1):
            active = tuple(0 <= s - li < T for li in range(L))
            hs = superstep(s, hs, active)

        h_last = hs[L - 1]                                # last layer, last timestep

        # ---- classifier: BatchNorm1d(eval) -> ReLU -> Dropout(identity) -> Linear ----
        xn = (h_last - mean_ref[...]) * jax.lax.rsqrt(var_ref[...] + 1e-5)
        xn = xn * gamma_ref[...] + beta_ref[...]
        xr = jnp.maximum(xn, 0.0)
        out_ref[...] = (jnp.dot(xr.astype(jnp.bfloat16), wc_ref[...],
                                preferred_element_type=jnp.float32)
                        + bc_ref[...])

    return kernel


# ------------------------------- Full forward --------------------------------

def rnn_forward(x_bti, params):
    """Equivalent of RNN.forward: x (B, T, I) -> logits (B, output_size)."""
    dims = params["dims"]
    Hp, Ip, Op = dims["Hp"], dims["Ip"], dims["Op"]
    O, num_layers = dims["O"], dims["num_layers"]

    B, T, I = x_bti.shape
    Bp = _round_up(B, 8)   # throughput note: pad toward 128/256 rows to fill MXU height

    # (B, T, I) -> time-major, zero-pad batch->Bp and feature->Ip, flatten to 2D
    # lane/sublane-dense slab; matmul operand so store directly as bf16.
    x_tbi = jnp.transpose(x_bti, (1, 0, 2)).astype(jnp.float32)
    x_pad = jnp.pad(x_tbi, ((0, 0), (0, Bp - B), (0, Ip - I)))
    x_flat = x_pad.reshape(T * Bp, Ip).astype(jnp.bfloat16)

    l0 = params["gru"][0]
    args = [x_flat, l0["w_ih"], l0["w_hh"], l0["b_ih"], l0["b_hn"]]
    for lp in params["gru"][1:]:
        args.extend([lp["w_fused"], lp["b_fused"]])
    cls = params["cls"]
    args.extend([cls["gamma"], cls["beta"], cls["mean"], cls["var"],
                 cls["w"], cls["b"]])

    out_pad = pl.pallas_call(
        make_fused_kernel(num_layers, T, Bp, Hp),
        out_shape=jax.ShapeDtypeStruct((Bp, Op), jnp.float32),
        scratch_shapes=[
            pltpu.VMEM((T * Bp, 3 * Hp), jnp.float32),   # hoisted layer-0 projections
        ],
        compiler_params=pltpu.CompilerParams(
            vmem_limit_bytes=32 * 1024 * 1024),
    )(*args)
    return out_pad[:B, :O]


# ----------------------------- Pure-JAX reference -----------------------------

def rnn_reference(x_bti, params):
    """Reference GRU + classifier with the same bf16-operand / f32-accum matmuls."""
    raw = params["raw"]
    H = params["dims"]["H"]
    x = jnp.transpose(x_bti, (1, 0, 2)).astype(jnp.float32)      # (T, B, I)
    T, B, _ = x.shape
    seq = x
    for (w_ih, w_hh, b_ih, b_hh) in raw["gru"]:
        h = jnp.zeros((B, H), jnp.float32)
        outs = []
        for t in range(T):
            gx = jnp.dot(seq[t].astype(jnp.bfloat16), w_ih.T.astype(jnp.bfloat16),
                         preferred_element_type=jnp.float32) + b_ih
            gh = jnp.dot(h.astype(jnp.bfloat16), w_hh.T.astype(jnp.bfloat16),
                         preferred_element_type=jnp.float32) + b_hh
            r = jax.nn.sigmoid(gx[:, :H] + gh[:, :H])
            z = jax.nn.sigmoid(gx[:, H:2 * H] + gh[:, H:2 * H])
            n = jnp.tanh(gx[:, 2 * H:] + r * gh[:, 2 * H:])
            h = (1.0 - z) * n + z * h
            outs.append(h)
        seq = jnp.stack(outs)
    h = seq[-1]
    xn = h * jax.lax.rsqrt(jnp.float32(1.0) + 1e-5)               # BN eval, fresh stats
    xr = jnp.maximum(xn, 0.0)
    w_lin, b_lin = raw["cls"]
    return jnp.dot(xr.astype(jnp.bfloat16), w_lin.T.astype(jnp.bfloat16),
                   preferred_element_type=jnp.float32) + b_lin


# ----------------------------- Parameter setup --------------------------------

def init_params(key, input_size, hidden_size, num_layers, output_size):
    H = hidden_size
    Hp = _round_up(H, 128)
    Ip = _round_up(input_size, 128)
    Op = _round_up(output_size, 128)

    params = {"gru": [], "cls": {}, "raw": {"gru": [], "cls": None},
              "dims": {"H": H, "Hp": Hp, "O": output_size, "Op": Op,
                       "Ip": Ip, "num_layers": num_layers}}
    k_gru = 1.0 / math.sqrt(H)

    def gate_blocks_w(w, in_dim, in_dim_p):
        # (3H, in_dim) -> 3 transposed zero-padded (in_dim_p, Hp) f32 blocks
        return [jnp.pad(w[g * H:(g + 1) * H].T,
                        ((0, in_dim_p - in_dim), (0, Hp - H))) for g in range(3)]

    def gate_blocks_b(b):
        return [jnp.pad(b[g * H:(g + 1) * H], (0, Hp - H)) for g in range(3)]

    for layer in range(num_layers):
        in_dim = input_size if layer == 0 else hidden_size
        in_dim_p = Ip if layer == 0 else Hp
        key, k1, k2, k3, k4 = jax.random.split(key, 5)
        # PyTorch layout: weight_ih (3H, in_dim), weight_hh (3H, H), gate order [r, z, n]
        w_ih = jax.random.uniform(k1, (3 * H, in_dim), jnp.float32, -k_gru, k_gru)
        w_hh = jax.random.uniform(k2, (3 * H, H), jnp.float32, -k_gru, k_gru)
        b_ih = jax.random.uniform(k3, (3 * H,), jnp.float32, -k_gru, k_gru)
        b_hh = jax.random.uniform(k4, (3 * H,), jnp.float32, -k_gru, k_gru)
        params["raw"]["gru"].append((w_ih, w_hh, b_ih, b_hh))

        wi = gate_blocks_w(w_ih, in_dim, in_dim_p)
        wh = gate_blocks_w(w_hh, H, Hp)
        bi = gate_blocks_b(b_ih)
        bh = gate_blocks_b(b_hh)

        if layer == 0:
            params["gru"].append({
                "w_ih": jnp.concatenate(wi, axis=1).astype(jnp.bfloat16),  # (Ip, 3Hp)
                "w_hh": jnp.concatenate(wh, axis=1).astype(jnp.bfloat16),  # (Hp, 3Hp)
                # b_hr, b_hz folded into the hoisted gx bias; b_hn kept per-step.
                "b_ih": jnp.concatenate([bi[0] + bh[0], bi[1] + bh[1],
                                         bi[2]]).reshape(1, 3 * Hp),
                "b_hn": bh[2].reshape(1, Hp),
            })
        else:
            zeros = jnp.zeros((Hp, Hp), jnp.float32)
            # Column blocks: [r | z | gx_n | gh_n]; rows: [input part ; hidden part].
            w_fused = jnp.concatenate([
                jnp.concatenate([wi[0], wi[1], wi[2], zeros], axis=1),   # input rows
                jnp.concatenate([wh[0], wh[1], zeros, wh[2]], axis=1),   # hidden rows
            ], axis=0).astype(jnp.bfloat16)                               # (2Hp, 4Hp)
            b_fused = jnp.concatenate([bi[0] + bh[0], bi[1] + bh[1],
                                       bi[2], bh[2]]).reshape(1, 4 * Hp)
            params["gru"].append({"w_fused": w_fused, "b_fused": b_fused})

    # Classifier: BatchNorm1d(hidden) fresh init (eval stats), Linear(hidden, output)
    key, k5, k6 = jax.random.split(key, 3)
    k_lin = 1.0 / math.sqrt(H)
    w_lin = jax.random.uniform(k5, (output_size, H), jnp.float32, -k_lin, k_lin)
    b_lin = jax.random.uniform(k6, (output_size,), jnp.float32, -k_lin, k_lin)
    params["raw"]["cls"] = (w_lin, b_lin)
    params["cls"] = {
        "gamma": jnp.ones((1, Hp), jnp.float32),
        "beta": jnp.zeros((1, Hp), jnp.float32),
        "mean": jnp.zeros((1, Hp), jnp.float32),
        "var": jnp.ones((1, Hp), jnp.float32),
        "w": jnp.pad(w_lin.T, ((0, Hp - H), (0, Op - output_size))).astype(jnp.bfloat16),
        "b": jnp.pad(b_lin, (0, Op - output_size)).reshape(1, Op),
    }
    return params


if __name__ == "__main__":
    INPUT_SIZE = 16
    HIDDEN_SIZE = 32
    NUM_LAYERS = 2
    OUTPUT_SIZE = 8
    BATCH = 2
    SEQ = 8

    key = jax.random.PRNGKey(0)
    key, kx, kp = jax.random.split(key, 3)
    x = jax.random.normal(kx, (BATCH, SEQ, INPUT_SIZE), jnp.float32)
    params = init_params(kp, INPUT_SIZE, HIDDEN_SIZE, NUM_LAYERS, OUTPUT_SIZE)

    pred = rnn_forward(x, params)
    jax.block_until_ready(pred)
    assert pred.shape == (BATCH, OUTPUT_SIZE), pred.shape

    # Correctness check against a pure-JAX GRU reference (same bf16 matmul policy).
    ref = rnn_reference(x, params)
    jax.block_until_ready(ref)
    max_err = float(jnp.max(jnp.abs(pred - ref)))
    assert max_err < 5e-3, f"max abs error {max_err}"

    print("KERNEL_OK")
</pallas_src>

<mosaic_0001>
module attributes {stable_mosaic.version = 11 : i64} {
  func.func @kernel(%arg0: memref<64x128xbf16, #tpu.memory_space<vmem>>, %arg1: memref<128x384xbf16, #tpu.memory_space<vmem>>, %arg2: memref<128x384xbf16, #tpu.memory_space<vmem>>, %arg3: memref<1x384xf32, #tpu.memory_space<vmem>>, %arg4: memref<1x128xf32, #tpu.memory_space<vmem>>, %arg5: memref<256x512xbf16, #tpu.memory_space<vmem>>, %arg6: memref<1x512xf32, #tpu.memory_space<vmem>>, %arg7: memref<1x128xf32, #tpu.memory_space<vmem>>, %arg8: memref<1x128xf32, #tpu.memory_space<vmem>>, %arg9: memref<1x128xf32, #tpu.memory_space<vmem>>, %arg10: memref<1x128xf32, #tpu.memory_space<vmem>>, %arg11: memref<128x128xbf16, #tpu.memory_space<vmem>>, %arg12: memref<1x128xf32, #tpu.memory_space<vmem>>, %arg13: memref<8x128xf32, #tpu.memory_space<vmem>>, %arg14: memref<64x384xf32, #tpu.memory_space<vmem>>) attributes {dimension_semantics = [], scalar_prefetch = 0 : i64, scratch_operands = 1 : i64, tpu.core_type = #tpu.core_type<tc>} {
    %c0 = arith.constant 0 : index
    %c0_0 = arith.constant 0 : index
    %0 = vector.load %arg0[%c0, %c0_0] : memref<64x128xbf16, #tpu.memory_space<vmem>>, vector<64x128xbf16>
    %c0_1 = arith.constant 0 : index
    %c0_2 = arith.constant 0 : index
    %1 = vector.load %arg1[%c0_1, %c0_2] : memref<128x384xbf16, #tpu.memory_space<vmem>>, vector<128x384xbf16>
    %cst = arith.constant dense<0.000000e+00> : vector<64x384xf32>
    %2 = tpu.matmul %0, %1, %cst {dimension_numbers = #tpu.dot_dimension_numbers<[1], [0], [0], [1], [0, 0, 1, 1], [], []>} : vector<64x128xbf16>, vector<128x384xbf16>, vector<64x384xf32> -> vector<64x384xf32>
    %c0_3 = arith.constant 0 : index
    %c0_4 = arith.constant 0 : index
    %3 = vector.load %arg3[%c0_3, %c0_4] : memref<1x384xf32, #tpu.memory_space<vmem>>, vector<1x384xf32>
    %4 = vector.broadcast %3 : vector<1x384xf32> to vector<64x384xf32>
    %5 = arith.addf %2, %4 : vector<64x384xf32>
    %c0_5 = arith.constant 0 : index
    %c0_6 = arith.constant 0 : index
    %6 = vector.load %arg14[%c0_5, %c0_6] : memref<64x384xf32, #tpu.memory_space<vmem>>, vector<64x384xf32>
    tpu.vector_store %arg14[%c0_5, %c0_6], %5 {strides = array<i32>} : memref<64x384xf32, #tpu.memory_space<vmem>>, vector<64x384xf32>,
    %c0_7 = arith.constant 0 : index
    %c0_8 = arith.constant 0 : index
    %7 = vector.load %arg2[%c0_7, %c0_8] : memref<128x384xbf16, #tpu.memory_space<vmem>>, vector<128x384xbf16>
    %c0_9 = arith.constant 0 : index
    %c0_10 = arith.constant 0 : index
    %8 = vector.load %arg4[%c0_9, %c0_10] : memref<1x128xf32, #tpu.memory_space<vmem>>, vector<1x128xf32>
    %c0_11 = arith.constant 0 : index
    %c0_12 = arith.constant 0 : index
    %9 = vector.load %arg5[%c0_11, %c0_12] : memref<256x512xbf16, #tpu.memory_space<vmem>>, vector<256x512xbf16>
    %c0_13 = arith.constant 0 : index
    %c0_14 = arith.constant 0 : index
    %10 = vector.load %arg6[%c0_13, %c0_14] : memref<1x512xf32, #tpu.memory_space<vmem>>, vector<1x512xf32>
    %cst_15 = arith.constant 0.000000e+00 : f32
    %11 = vector.broadcast %cst_15 : f32 to vector<8x128xf32>
    %cst_16 = arith.constant 0.000000e+00 : f32
    %12 = vector.broadcast %cst_16 : f32 to vector<8x128xf32>
    %c0_17 = arith.constant 0 : index
    %c0_18 = arith.constant 0 : index
    %13 = vector.load %arg14[%c0_17, %c0_18] : memref<64x384xf32, #tpu.memory_space<vmem>>, vector<8x384xf32>
    %14 = arith.truncf %11 : vector<8x128xf32> to vector<8x128xbf16>
    %cst_19 = arith.constant dense<0.000000e+00> : vector<8x384xf32>
    %15 = tpu.matmul %14, %7, %cst_19 {dimension_numbers = #tpu.dot_dimension_numbers<[1], [0], [0], [1], [0, 0, 1, 1], [], []>} : vector<8x128xbf16>, vector<128x384xbf16>, vector<8x384xf32> -> vector<8x384xf32>
    %16 = vector.extract_strided_slice %13 {offsets = [0, 0], sizes = [8, 128], strides = [1, 1]} : vector<8x384xf32> to vector<8x128xf32>
    %17 = vector.extract_strided_slice %15 {offsets = [0, 0], sizes = [8, 128], strides = [1, 1]} : vector<8x384xf32> to vector<8x128xf32>
    %18 = arith.addf %16, %17 : vector<8x128xf32>
    %19 = arith.negf %18 : vector<8x128xf32>
    %20 = math.exp %19 : vector<8x128xf32>
    %cst_20 = arith.constant 1.000000e+00 : f32
    %21 = vector.broadcast %cst_20 : f32 to vector<8x128xf32>
    %22 = arith.addf %21, %20 : vector<8x128xf32>
    %23 = arith.divf %21, %22 : vector<8x128xf32>
    %24 = vector.extract_strided_slice %13 {offsets = [0, 128], sizes = [8, 128], strides = [1, 1]} : vector<8x384xf32> to vector<8x128xf32>
    %25 = vector.extract_strided_slice %15 {offsets = [0, 128], sizes = [8, 128], strides = [1, 1]} : vector<8x384xf32> to vector<8x128xf32>
    %26 = arith.addf %24, %25 : vector<8x128xf32>
    %27 = arith.negf %26 : vector<8x128xf32>
    %28 = math.exp %27 : vector<8x128xf32>
    %cst_21 = arith.constant 1.000000e+00 : f32
    %29 = vector.broadcast %cst_21 : f32 to vector<8x128xf32>
    %30 = arith.addf %29, %28 : vector<8x128xf32>
    %31 = arith.divf %29, %30 : vector<8x128xf32>
    %32 = vector.extract_strided_slice %13 {offsets = [0, 256], sizes = [8, 128], strides = [1, 1]} : vector<8x384xf32> to vector<8x128xf32>
    %33 = vector.extract_strided_slice %15 {offsets = [0, 256], sizes = [8, 128], strides = [1, 1]} : vector<8x384xf32> to vector<8x128xf32>
    %34 = vector.broadcast %8 : vector<1x128xf32> to vector<8x128xf32>
    %35 = arith.addf %33, %34 : vector<8x128xf32>
    %36 = arith.mulf %23, %35 : vector<8x128xf32>
    %37 = arith.addf %32, %36 : vector<8x128xf32>
    %38 = math.tanh %37 : vector<8x128xf32>
    %cst_22 = arith.constant 1.000000e+00 : f32
    %39 = vector.broadcast %cst_22 : f32 to vector<8x128xf32>
    %40 = arith.subf %39, %31 : vector<8x128xf32>
    %41 = arith.mulf %40, %38 : vector<8x128xf32>
    %42 = arith.mulf %31, %11 : vector<8x128xf32>
    %43 = arith.addf %41, %42 : vector<8x128xf32>
    %c1_i32 = arith.constant 1 : i32
    %c8_i32 = arith.constant 8 : i32
    %44 = arith.muli %c1_i32, %c8_i32 : i32
    %45 = tpu.assume_multiple %44, 8 : i32
    %46 = arith.index_cast %45 : i32 to index
    %c0_23 = arith.constant 0 : index
    %47 = vector.load %arg14[%46, %c0_23] : memref<64x384xf32, #tpu.memory_space<vmem>>, vector<8x384xf32>
    %48 = arith.truncf %43 : vector<8x128xf32> to vector<8x128xbf16>
    %cst_24 = arith.constant dense<0.000000e+00> : vector<8x384xf32>
    %49 = tpu.matmul %48, %7, %cst_24 {dimension_numbers = #tpu.dot_dimension_numbers<[1], [0], [0], [1], [0, 0, 1, 1], [], []>} : vector<8x128xbf16>, vector<128x384xbf16>, vector<8x384xf32> -> vector<8x384xf32>
    %50 = vector.extract_strided_slice %47 {offsets = [0, 0], sizes = [8, 128], strides = [1, 1]} : vector<8x384xf32> to vector<8x128xf32>
    %51 = vector.extract_strided_slice %49 {offsets = [0, 0], sizes = [8, 128], strides = [1, 1]} : vector<8x384xf32> to vector<8x128xf32>
    %52 = arith.addf %50, %51 : vector<8x128xf32>
    %53 = arith.negf %52 : vector<8x128xf32>
    %54 = math.exp %53 : vector<8x128xf32>
    %cst_25 = arith.constant 1.000000e+00 : f32
    %55 = vector.broadcast %cst_25 : f32 to vector<8x128xf32>
    %56 = arith.addf %55, %54 : vector<8x128xf32>
    %57 = arith.divf %55, %56 : vector<8x128xf32>
    %58 = vector.extract_strided_slice %47 {offsets = [0, 128], sizes = [8, 128], strides = [1, 1]} : vector<8x384xf32> to vector<8x128xf32>
    %59 = vector.extract_strided_slice %49 {offsets = [0, 128], sizes = [8, 128], strides = [1, 1]} : vector<8x384xf32> to vector<8x128xf32>
    %60 = arith.addf %58, %59 : vector<8x128xf32>
    %61 = arith.negf %60 : vector<8x128xf32>
    %62 = math.exp %61 : vector<8x128xf32>
    %cst_26 = arith.constant 1.000000e+00 : f32
    %63 = vector.broadcast %cst_26 : f32 to vector<8x128xf32>
    %64 = arith.addf %63, %62 : vector<8x128xf32>
    %65 = arith.divf %63, %64 : vector<8x128xf32>
    %66 = vector.extract_strided_slice %47 {offsets = [0, 256], sizes = [8, 128], strides = [1, 1]} : vector<8x384xf32> to vector<8x128xf32>
    %67 = vector.extract_strided_slice %49 {offsets = [0, 256], sizes = [8, 128], strides = [1, 1]} : vector<8x384xf32> to vector<8x128xf32>
    %68 = vector.broadcast %8 : vector<1x128xf32> to vector<8x128xf32>
    %69 = arith.addf %67, %68 : vector<8x128xf32>
    %70 = arith.mulf %57, %69 : vector<8x128xf32>
    %71 = arith.addf %66, %70 : vector<8x128xf32>
    %72 = math.tanh %71 : vector<8x128xf32>
    %cst_27 = arith.constant 1.000000e+00 : f32
    %73 = vector.broadcast %cst_27 : f32 to vector<8x128xf32>
    %74 = arith.subf %73, %65 : vector<8x128xf32>
    %75 = arith.mulf %74, %72 : vector<8x128xf32>
    %76 = arith.mulf %65, %43 : vector<8x128xf32>
    %77 = arith.addf %75, %76 : vector<8x128xf32>
    %78 = tpu.concatenate %43, %12 in 1 : vector<8x128xf32>, vector<8x128xf32> -> vector<8x256xf32>
    %79 = arith.truncf %78 : vector<8x256xf32> to vector<8x256xbf16>
    %cst_28 = arith.constant dense<0.000000e+00> : vector<8x512xf32>
    %80 = tpu.matmul %79, %9, %cst_28 {dimension_numbers = #tpu.dot_dimension_numbers<[1], [0], [0], [1], [0, 0, 1, 1], [], []>} : vector<8x256xbf16>, vector<256x512xbf16>, vector<8x512xf32> -> vector<8x512xf32>
    %81 = vector.broadcast %10 : vector<1x512xf32> to vector<8x512xf32>
    %82 = arith.addf %80, %81 : vector<8x512xf32>
    %83 = vector.extract_strided_slice %82 {offsets = [0, 0], sizes = [8, 128], strides = [1, 1]} : vector<8x512xf32> to vector<8x128xf32>
    %84 = arith.negf %83 : vector<8x128xf32>
    %85 = math.exp %84 : vector<8x128xf32>
    %cst_29 = arith.constant 1.000000e+00 : f32
    %86 = vector.broadcast %cst_29 : f32 to vector<8x128xf32>
    %87 = arith.addf %86, %85 : vector<8x128xf32>
    %88 = arith.divf %86, %87 : vector<8x128xf32>
    %89 = vector.extract_strided_slice %82 {offsets = [0, 128], sizes = [8, 128], strides = [1, 1]} : vector<8x512xf32> to vector<8x128xf32>
    %90 = arith.negf %89 : vector<8x128xf32>
    %91 = math.exp %90 : vector<8x128xf32>
    %cst_30 = arith.constant 1.000000e+00 : f32
    %92 = vector.broadcast %cst_30 : f32 to vector<8x128xf32>
    %93 = arith.addf %92, %91 : vector<8x128xf32>
    %94 = arith.divf %92, %93 : vector<8x128xf32>
    %95 = vector.extract_strided_slice %82 {offsets = [0, 256], sizes = [8, 128], strides = [1, 1]} : vector<8x512xf32> to vector<8x128xf32>
    %96 = vector.extract_strided_slice %82 {offsets = [0, 384], sizes = [8, 128], strides = [1, 1]} : vector<8x512xf32> to vector<8x128xf32>
    %97 = arith.mulf %88, %96 : vector<8x128xf32>
    %98 = arith.addf %95, %97 : vector<8x128xf32>
    %99 = math.tanh %98 : vector<8x128xf32>
    %cst_31 = arith.constant 1.000000e+00 : f32
    %100 = vector.broadcast %cst_31 : f32 to vector<8x128xf32>
    %101 = arith.subf %100, %94 : vector<8x128xf32>
    %102 = arith.mulf %101, %99 : vector<8x128xf32>
    %103 = arith.mulf %94, %12 : vector<8x128xf32>
    %104 = arith.addf %102, %103 : vector<8x128xf32>
    %c2_i32 = arith.constant 2 : i32
    %c8_i32_32 = arith.constant 8 : i32
    %105 = arith.muli %c2_i32, %c8_i32_32 : i32
    %106 = tpu.assume_multiple %105, 8 : i32
    %107 = arith.index_cast %106 : i32 to index
    %c0_33 = arith.constant 0 : index
    %108 = vector.load %arg14[%107, %c0_33] : memref<64x384xf32, #tpu.memory_space<vmem>>, vector<8x384xf32>
    %109 = arith.truncf %77 : vector<8x128xf32> to vector<8x128xbf16>
    %cst_34 = arith.constant dense<0.000000e+00> : vector<8x384xf32>
    %110 = tpu.matmul %109, %7, %cst_34 {dimension_numbers = #tpu.dot_dimension_numbers<[1], [0], [0], [1], [0, 0, 1, 1], [], []>} : vector<8x128xbf16>, vector<128x384xbf16>, vector<8x384xf32> -> vector<8x384xf32>
    %111 = vector.extract_strided_slice %108 {offsets = [0, 0], sizes = [8, 128], strides = [1, 1]} : vector<8x384xf32> to vector<8x128xf32>
    %112 = vector.extract_strided_slice %110 {offsets = [0, 0], sizes = [8, 128], strides = [1, 1]} : vector<8x384xf32> to vector<8x128xf32>
    %113 = arith.addf %111, %112 : vector<8x128xf32>
    %114 = arith.negf %113 : vector<8x128xf32>
    %115 = math.exp %114 : vector<8x128xf32>
    %cst_35 = arith.constant 1.000000e+00 : f32
    %116 = vector.broadcast %cst_35 : f32 to vector<8x128xf32>
    %117 = arith.addf %116, %115 : vector<8x128xf32>
    %118 = arith.divf %116, %117 : vector<8x128xf32>
    %119 = vector.extract_strided_slice %108 {offsets = [0, 128], sizes = [8, 128], strides = [1, 1]} : vector<8x384xf32> to vector<8x128xf32>
    %120 = vector.extract_strided_slice %110 {offsets = [0, 128], sizes = [8, 128], strides = [1, 1]} : vector<8x384xf32> to vector<8x128xf32>
    %121 = arith.addf %119, %120 : vector<8x128xf32>
    %122 = arith.negf %121 : vector<8x128xf32>
    %123 = math.exp %122 : vector<8x128xf32>
    %cst_36 = arith.constant 1.000000e+00 : f32
    %124 = vector.broadcast %cst_36 : f32 to vector<8x128xf32>
    %125 = arith.addf %124, %123 : vector<8x128xf32>
    %126 = arith.divf %124, %125 : vector<8x128xf32>
    %127 = vector.extract_strided_slice %108 {offsets = [0, 256], sizes = [8, 128], strides = [1, 1]} : vector<8x384xf32> to vector<8x128xf32>
    %128 = vector.extract_strided_slice %110 {offsets = [0, 256], sizes = [8, 128], strides = [1, 1]} : vector<8x384xf32> to vector<8x128xf32>
    %129 = vector.broadcast %8 : vector<1x128xf32> to vector<8x128xf32>
    %130 = arith.addf %128, %129 : vector<8x128xf32>
    %131 = arith.mulf %118, %130 : vector<8x128xf32>
    %132 = arith.addf %127, %131 : vector<8x128xf32>
    %133 = math.tanh %132 : vector<8x128xf32>
    %cst_37 = arith.constant 1.000000e+00 : f32
    %134 = vector.broadcast %cst_37 : f32 to vector<8x128xf32>
    %135 = arith.subf %134, %126 : vector<8x128xf32>
    %136 = arith.mulf %135, %133 : vector<8x128xf32>
    %137 = arith.mulf %126, %77 : vector<8x128xf32>
    %138 = arith.addf %136, %137 : vector<8x128xf32>
    %139 = tpu.concatenate %77, %104 in 1 : vector<8x128xf32>, vector<8x128xf32> -> vector<8x256xf32>
    %140 = arith.truncf %139 : vector<8x256xf32> to vector<8x256xbf16>
    %cst_38 = arith.constant dense<0.000000e+00> : vector<8x512xf32>
    %141 = tpu.matmul %140, %9, %cst_38 {dimension_numbers = #tpu.dot_dimension_numbers<[1], [0], [0], [1], [0, 0, 1, 1], [], []>} : vector<8x256xbf16>, vector<256x512xbf16>, vector<8x512xf32> -> vector<8x512xf32>
    %142 = vector.broadcast %10 : vector<1x512xf32> to vector<8x512xf32>
    %143 = arith.addf %141, %142 : vector<8x512xf32>
    %144 = vector.extract_strided_slice %143 {offsets = [0, 0], sizes = [8, 128], strides = [1, 1]} : vector<8x512xf32> to vector<8x128xf32>
    %145 = arith.negf %144 : vector<8x128xf32>
    %146 = math.exp %145 : vector<8x128xf32>
    %cst_39 = arith.constant 1.000000e+00 : f32
    %147 = vector.broadcast %cst_39 : f32 to vector<8x128xf32>
    %148 = arith.addf %147, %146 : vector<8x128xf32>
    %149 = arith.divf %147, %148 : vector<8x128xf32>
    %150 = vector.extract_strided_slice %143 {offsets = [0, 128], sizes = [8, 128], strides = [1, 1]} : vector<8x512xf32> to vector<8x128xf32>
    %151 = arith.negf %150 : vector<8x128xf32>
    %152 = math.exp %151 : vector<8x128xf32>
    %cst_40 = arith.constant 1.000000e+00 : f32
    %153 = vector.broadcast %cst_40 : f32 to vector<8x128xf32>
    %154 = arith.addf %153, %152 : vector<8x128xf32>
    %155 = arith.divf %153, %154 : vector<8x128xf32>
    %156 = vector.extract_strided_slice %143 {offsets = [0, 256], sizes = [8, 128], strides = [1, 1]} : vector<8x512xf32> to vector<8x128xf32>
    %157 = vector.extract_strided_slice %143 {offsets = [0, 384], sizes = [8, 128], strides = [1, 1]} : vector<8x512xf32> to vector<8x128xf32>
    %158 = arith.mulf %149, %157 : vector<8x128xf32>
    %159 = arith.addf %156, %158 : vector<8x128xf32>
    %160 = math.tanh %159 : vector<8x128xf32>
    %cst_41 = arith.constant 1.000000e+00 : f32
    %161 = vector.broadcast %cst_41 : f32 to vector<8x128xf32>
    %162 = arith.subf %161, %155 : vector<8x128xf32>
    %163 = arith.mulf %162, %160 : vector<8x128xf32>
    %164 = arith.mulf %155, %104 : vector<8x128xf32>
    %165 = arith.addf %163, %164 : vector<8x128xf32>
    %c3_i32 = arith.constant 3 : i32
    %c8_i32_42 = arith.constant 8 : i32
    %166 = arith.muli %c3_i32, %c8_i32_42 : i32
    %167 = tpu.assume_multiple %166, 8 : i32
    %168 = arith.index_cast %167 : i32 to index
    %c0_43 = arith.constant 0 : index
    %169 = vector.load %arg14[%168, %c0_43] : memref<64x384xf32, #tpu.memory_space<vmem>>, vector<8x384xf32>
    %170 = arith.truncf %138 : vector<8x128xf32> to vector<8x128xbf16>
    %cst_44 = arith.constant dense<0.000000e+00> : vector<8x384xf32>
    %171 = tpu.matmul %170, %7, %cst_44 {dimension_numbers = #tpu.dot_dimension_numbers<[1], [0], [0], [1], [0, 0, 1, 1], [], []>} : vector<8x128xbf16>, vector<128x384xbf16>, vector<8x384xf32> -> vector<8x384xf32>
    %172 = vector.extract_strided_slice %169 {offsets = [0, 0], sizes = [8, 128], strides = [1, 1]} : vector<8x384xf32> to vector<8x128xf32>
    %173 = vector.extract_strided_slice %171 {offsets = [0, 0], sizes = [8, 128], strides = [1, 1]} : vector<8x384xf32> to vector<8x128xf32>
    %174 = arith.addf %172, %173 : vector<8x128xf32>
    %175 = arith.negf %174 : vector<8x128xf32>
    %176 = math.exp %175 : vector<8x128xf32>
    %cst_45 = arith.constant 1.000000e+00 : f32
    %177 = vector.broadcast %cst_45 : f32 to vector<8x128xf32>
    %178 = arith.addf %177, %176 : vector<8x128xf32>
    %179 = arith.divf %177, %178 : vector<8x128xf32>
    %180 = vector.extract_strided_slice %169 {offsets = [0, 128], sizes = [8, 128], strides = [1, 1]} : vector<8x384xf32> to vector<8x128xf32>
    %181 = vector.extract_strided_slice %171 {offsets = [0, 128], sizes = [8, 128], strides = [1, 1]} : vector<8x384xf32> to vector<8x128xf32>
    %182 = arith.addf %180, %181 : vector<8x128xf32>
    %183 = arith.negf %182 : vector<8x128xf32>
    %184 = math.exp %183 : vector<8x128xf32>
    %cst_46 = arith.constant 1.000000e+00 : f32
    %185 = vector.broadcast %cst_46 : f32 to vector<8x128xf32>
    %186 = arith.addf %185, %184 : vector<8x128xf32>
    %187 = arith.divf %185, %186 : vector<8x128xf32>
    %188 = vector.extract_strided_slice %169 {offsets = [0, 256], sizes = [8, 128], strides = [1, 1]} : vector<8x384xf32> to vector<8x128xf32>
    %189 = vector.extract_strided_slice %171 {offsets = [0, 256], sizes = [8, 128], strides = [1, 1]} : vector<8x384xf32> to vector<8x128xf32>
    %190 = vector.broadcast %8 : vector<1x128xf32> to vector<8x128xf32>
    %191 = arith.addf %189, %190 : vector<8x128xf32>
    %192 = arith.mulf %179, %191 : vector<8x128xf32>
    %193 = arith.addf %188, %192 : vector<8x128xf32>
    %194 = math.tanh %193 : vector<8x128xf32>
    %cst_47 = arith.constant 1.000000e+00 : f32
    %195 = vector.broadcast %cst_47 : f32 to vector<8x128xf32>
    %196 = arith.subf %195, %187 : vector<8x128xf32>
    %197 = arith.mulf %196, %194 : vector<8x128xf32>
    %198 = arith.mulf %187, %138 : vector<8x128xf32>
    %199 = arith.addf %197, %198 : vector<8x128xf32>
    %200 = tpu.concatenate %138, %165 in 1 : vector<8x128xf32>, vector<8x128xf32> -> vector<8x256xf32>
    %201 = arith.truncf %200 : vector<8x256xf32> to vector<8x256xbf16>
    %cst_48 = arith.constant dense<0.000000e+00> : vector<8x512xf32>
    %202 = tpu.matmul %201, %9, %cst_48 {dimension_numbers = #tpu.dot_dimension_numbers<[1], [0], [0], [1], [0, 0, 1, 1], [], []>} : vector<8x256xbf16>, vector<256x512xbf16>, vector<8x512xf32> -> vector<8x512xf32>
    %203 = vector.broadcast %10 : vector<1x512xf32> to vector<8x512xf32>
    %204 = arith.addf %202, %203 : vector<8x512xf32>
    %205 = vector.extract_strided_slice %204 {offsets = [0, 0], sizes = [8, 128], strides = [1, 1]} : vector<8x512xf32> to vector<8x128xf32>
    %206 = arith.negf %205 : vector<8x128xf32>
    %207 = math.exp %206 : vector<8x128xf32>
    %cst_49 = arith.constant 1.000000e+00 : f32
    %208 = vector.broadcast %cst_49 : f32 to vector<8x128xf32>
    %209 = arith.addf %208, %207 : vector<8x128xf32>
    %210 = arith.divf %208, %209 : vector<8x128xf32>
    %211 = vector.extract_strided_slice %204 {offsets = [0, 128], sizes = [8, 128], strides = [1, 1]} : vector<8x512xf32> to vector<8x128xf32>
    %212 = arith.negf %211 : vector<8x128xf32>
    %213 = math.exp %212 : vector<8x128xf32>
    %cst_50 = arith.constant 1.000000e+00 : f32
    %214 = vector.broadcast %cst_50 : f32 to vector<8x128xf32>
    %215 = arith.addf %214, %213 : vector<8x128xf32>
    %216 = arith.divf %214, %215 : vector<8x128xf32>
    %217 = vector.extract_strided_slice %204 {offsets = [0, 256], sizes = [8, 128], strides = [1, 1]} : vector<8x512xf32> to vector<8x128xf32>
    %218 = vector.extract_strided_slice %204 {offsets = [0, 384], sizes = [8, 128], strides = [1, 1]} : vector<8x512xf32> to vector<8x128xf32>
    %219 = arith.mulf %210, %218 : vector<8x128xf32>
    %220 = arith.addf %217, %219 : vector<8x128xf32>
    %221 = math.tanh %220 : vector<8x128xf32>
    %cst_51 = arith.constant 1.000000e+00 : f32
    %222 = vector.broadcast %cst_51 : f32 to vector<8x128xf32>
    %223 = arith.subf %222, %216 : vector<8x128xf32>
    %224 = arith.mulf %223, %221 : vector<8x128xf32>
    %225 = arith.mulf %216, %165 : vector<8x128xf32>
    %226 = arith.addf %224, %225 : vector<8x128xf32>
    %c4_i32 = arith.constant 4 : i32
    %c8_i32_52 = arith.constant 8 : i32
    %227 = arith.muli %c4_i32, %c8_i32_52 : i32
    %228 = tpu.assume_multiple %227, 8 : i32
    %229 = arith.index_cast %228 : i32 to index
    %c0_53 = arith.constant 0 : index
    %230 = vector.load %arg14[%229, %c0_53] : memref<64x384xf32, #tpu.memory_space<vmem>>, vector<8x384xf32>
    %231 = arith.truncf %199 : vector<8x128xf32> to vector<8x128xbf16>
    %cst_54 = arith.constant dense<0.000000e+00> : vector<8x384xf32>
    %232 = tpu.matmul %231, %7, %cst_54 {dimension_numbers = #tpu.dot_dimension_numbers<[1], [0], [0], [1], [0, 0, 1, 1], [], []>} : vector<8x128xbf16>, vector<128x384xbf16>, vector<8x384xf32> -> vector<8x384xf32>
    %233 = vector.extract_strided_slice %230 {offsets = [0, 0], sizes = [8, 128], strides = [1, 1]} : vector<8x384xf32> to vector<8x128xf32>
    %234 = vector.extract_strided_slice %232 {offsets = [0, 0], sizes = [8, 128], strides = [1, 1]} : vector<8x384xf32> to vector<8x128xf32>
    %235 = arith.addf %233, %234 : vector<8x128xf32>
    %236 = arith.negf %235 : vector<8x128xf32>
    %237 = math.exp %236 : vector<8x128xf32>
    %cst_55 = arith.constant 1.000000e+00 : f32
    %238 = vector.broadcast %cst_55 : f32 to vector<8x128xf32>
    %239 = arith.addf %238, %237 : vector<8x128xf32>
    %240 = arith.divf %238, %239 : vector<8x128xf32>
    %241 = vector.extract_strided_slice %230 {offsets = [0, 128], sizes = [8, 128], strides = [1, 1]} : vector<8x384xf32> to vector<8x128xf32>
    %242 = vector.extract_strided_slice %232 {offsets = [0, 128], sizes = [8, 128], strides = [1, 1]} : vector<8x384xf32> to vector<8x128xf32>
    %243 = arith.addf %241, %242 : vector<8x128xf32>
    %244 = arith.negf %243 : vector<8x128xf32>
    %245 = math.exp %244 : vector<8x128xf32>
    %cst_56 = arith.constant 1.000000e+00 : f32
    %246 = vector.broadcast %cst_56 : f32 to vector<8x128xf32>
    %247 = arith.addf %246, %245 : vector<8x128xf32>
    %248 = arith.divf %246, %247 : vector<8x128xf32>
    %249 = vector.extract_strided_slice %230 {offsets = [0, 256], sizes = [8, 128], strides = [1, 1]} : vector<8x384xf32> to vector<8x128xf32>
    %250 = vector.extract_strided_slice %232 {offsets = [0, 256], sizes = [8, 128], strides = [1, 1]} : vector<8x384xf32> to vector<8x128xf32>
    %251 = vector.broadcast %8 : vector<1x128xf32> to vector<8x128xf32>
    %252 = arith.addf %250, %251 : vector<8x128xf32>
    %253 = arith.mulf %240, %252 : vector<8x128xf32>
    %254 = arith.addf %249, %253 : vector<8x128xf32>
    %255 = math.tanh %254 : vector<8x128xf32>
    %cst_57 = arith.constant 1.000000e+00 : f32
    %256 = vector.broadcast %cst_57 : f32 to vector<8x128xf32>
    %257 = arith.subf %256, %248 : vector<8x128xf32>
    %258 = arith.mulf %257, %255 : vector<8x128xf32>
    %259 = arith.mulf %248, %199 : vector<8x128xf32>
    %260 = arith.addf %258, %259 : vector<8x128xf32>
    %261 = tpu.concatenate %199, %226 in 1 : vector<8x128xf32>, vector<8x128xf32> -> vector<8x256xf32>
    %262 = arith.truncf %261 : vector<8x256xf32> to vector<8x256xbf16>
    %cst_58 = arith.constant dense<0.000000e+00> : vector<8x512xf32>
    %263 = tpu.matmul %262, %9, %cst_58 {dimension_numbers = #tpu.dot_dimension_numbers<[1], [0], [0], [1], [0, 0, 1, 1], [], []>} : vector<8x256xbf16>, vector<256x512xbf16>, vector<8x512xf32> -> vector<8x512xf32>
    %264 = vector.broadcast %10 : vector<1x512xf32> to vector<8x512xf32>
    %265 = arith.addf %263, %264 : vector<8x512xf32>
    %266 = vector.extract_strided_slice %265 {offsets = [0, 0], sizes = [8, 128], strides = [1, 1]} : vector<8x512xf32> to vector<8x128xf32>
    %267 = arith.negf %266 : vector<8x128xf32>
    %268 = math.exp %267 : vector<8x128xf32>
    %cst_59 = arith.constant 1.000000e+00 : f32
    %269 = vector.broadcast %cst_59 : f32 to vector<8x128xf32>
    %270 = arith.addf %269, %268 : vector<8x128xf32>
    %271 = arith.divf %269, %270 : vector<8x128xf32>
    %272 = vector.extract_strided_slice %265 {offsets = [0, 128], sizes = [8, 128], strides = [1, 1]} : vector<8x512xf32> to vector<8x128xf32>
    %273 = arith.negf %272 : vector<8x128xf32>
    %274 = math.exp %273 : vector<8x128xf32>
    %cst_60 = arith.constant 1.000000e+00 : f32
    %275 = vector.broadcast %cst_60 : f32 to vector<8x128xf32>
    %276 = arith.addf %275, %274 : vector<8x128xf32>
    %277 = arith.divf %275, %276 : vector<8x128xf32>
    %278 = vector.extract_strided_slice %265 {offsets = [0, 256], sizes = [8, 128], strides = [1, 1]} : vector<8x512xf32> to vector<8x128xf32>
    %279 = vector.extract_strided_slice %265 {offsets = [0, 384], sizes = [8, 128], strides = [1, 1]} : vector<8x512xf32> to vector<8x128xf32>
    %280 = arith.mulf %271, %279 : vector<8x128xf32>
    %281 = arith.addf %278, %280 : vector<8x128xf32>
    %282 = math.tanh %281 : vector<8x128xf32>
    %cst_61 = arith.constant 1.000000e+00 : f32
    %283 = vector.broadcast %cst_61 : f32 to vector<8x128xf32>
    %284 = arith.subf %283, %277 : vector<8x128xf32>
    %285 = arith.mulf %284, %282 : vector<8x128xf32>
    %286 = arith.mulf %277, %226 : vector<8x128xf32>
    %287 = arith.addf %285, %286 : vector<8x128xf32>
    %c5_i32 = arith.constant 5 : i32
    %c8_i32_62 = arith.constant 8 : i32
    %288 = arith.muli %c5_i32, %c8_i32_62 : i32
    %289 = tpu.assume_multiple %288, 8 : i32
    %290 = arith.index_cast %289 : i32 to index
    %c0_63 = arith.constant 0 : index
    %291 = vector.load %arg14[%290, %c0_63] : memref<64x384xf32, #tpu.memory_space<vmem>>, vector<8x384xf32>
    %292 = arith.truncf %260 : vector<8x128xf32> to vector<8x128xbf16>
    %cst_64 = arith.constant dense<0.000000e+00> : vector<8x384xf32>
    %293 = tpu.matmul %292, %7, %cst_64 {dimension_numbers = #tpu.dot_dimension_numbers<[1], [0], [0], [1], [0, 0, 1, 1], [], []>} : vector<8x128xbf16>, vector<128x384xbf16>, vector<8x384xf32> -> vector<8x384xf32>
    %294 = vector.extract_strided_slice %291 {offsets = [0, 0], sizes = [8, 128], strides = [1, 1]} : vector<8x384xf32> to vector<8x128xf32>
    %295 = vector.extract_strided_slice %293 {offsets = [0, 0], sizes = [8, 128], strides = [1, 1]} : vector<8x384xf32> to vector<8x128xf32>
    %296 = arith.addf %294, %295 : vector<8x128xf32>
    %297 = arith.negf %296 : vector<8x128xf32>
    %298 = math.exp %297 : vector<8x128xf32>
    %cst_65 = arith.constant 1.000000e+00 : f32
    %299 = vector.broadcast %cst_65 : f32 to vector<8x128xf32>
    %300 = arith.addf %299, %298 : vector<8x128xf32>
    %301 = arith.divf %299, %300 : vector<8x128xf32>
    %302 = vector.extract_strided_slice %291 {offsets = [0, 128], sizes = [8, 128], strides = [1, 1]} : vector<8x384xf32> to vector<8x128xf32>
    %303 = vector.extract_strided_slice %293 {offsets = [0, 128], sizes = [8, 128], strides = [1, 1]} : vector<8x384xf32> to vector<8x128xf32>
    %304 = arith.addf %302, %303 : vector<8x128xf32>
    %305 = arith.negf %304 : vector<8x128xf32>
    %306 = math.exp %305 : vector<8x128xf32>
    %cst_66 = arith.constant 1.000000e+00 : f32
    %307 = vector.broadcast %cst_66 : f32 to vector<8x128xf32>
    %308 = arith.addf %307, %306 : vector<8x128xf32>
    %309 = arith.divf %307, %308 : vector<8x128xf32>
    %310 = vector.extract_strided_slice %291 {offsets = [0, 256], sizes = [8, 128], strides = [1, 1]} : vector<8x384xf32> to vector<8x128xf32>
    %311 = vector.extract_strided_slice %293 {offsets = [0, 256], sizes = [8, 128], strides = [1, 1]} : vector<8x384xf32> to vector<8x128xf32>
    %312 = vector.broadcast %8 : vector<1x128xf32> to vector<8x128xf32>
    %313 = arith.addf %311, %312 : vector<8x128xf32>
    %314 = arith.mulf %301, %313 : vector<8x128xf32>
    %315 = arith.addf %310, %314 : vector<8x128xf32>
    %316 = math.tanh %315 : vector<8x128xf32>
    %cst_67 = arith.constant 1.000000e+00 : f32
    %317 = vector.broadcast %cst_67 : f32 to vector<8x128xf32>
    %318 = arith.subf %317, %309 : vector<8x128xf32>
    %319 = arith.mulf %318, %316 : vector<8x128xf32>
    %320 = arith.mulf %309, %260 : vector<8x128xf32>
    %321 = arith.addf %319, %320 : vector<8x128xf32>
    %322 = tpu.concatenate %260, %287 in 1 : vector<8x128xf32>, vector<8x128xf32> -> vector<8x256xf32>
    %323 = arith.truncf %322 : vector<8x256xf32> to vector<8x256xbf16>
    %cst_68 = arith.constant dense<0.000000e+00> : vector<8x512xf32>
    %324 = tpu.matmul %323, %9, %cst_68 {dimension_numbers = #tpu.dot_dimension_numbers<[1], [0], [0], [1], [0, 0, 1, 1], [], []>} : vector<8x256xbf16>, vector<256x512xbf16>, vector<8x512xf32> -> vector<8x512xf32>
    %325 = vector.broadcast %10 : vector<1x512xf32> to vector<8x512xf32>
    %326 = arith.addf %324, %325 : vector<8x512xf32>
    %327 = vector.extract_strided_slice %326 {offsets = [0, 0], sizes = [8, 128], strides = [1, 1]} : vector<8x512xf32> to vector<8x128xf32>
    %328 = arith.negf %327 : vector<8x128xf32>
    %329 = math.exp %328 : vector<8x128xf32>
    %cst_69 = arith.constant 1.000000e+00 : f32
    %330 = vector.broadcast %cst_69 : f32 to vector<8x128xf32>
    %331 = arith.addf %330, %329 : vector<8x128xf32>
    %332 = arith.divf %330, %331 : vector<8x128xf32>
    %333 = vector.extract_strided_slice %326 {offsets = [0, 128], sizes = [8, 128], strides = [1, 1]} : vector<8x512xf32> to vector<8x128xf32>
    %334 = arith.negf %333 : vector<8x128xf32>
    %335 = math.exp %334 : vector<8x128xf32>
    %cst_70 = arith.constant 1.000000e+00 : f32
    %336 = vector.broadcast %cst_70 : f32 to vector<8x128xf32>
    %337 = arith.addf %336, %335 : vector<8x128xf32>
    %338 = arith.divf %336, %337 : vector<8x128xf32>
    %339 = vector.extract_strided_slice %326 {offsets = [0, 256], sizes = [8, 128], strides = [1, 1]} : vector<8x512xf32> to vector<8x128xf32>
    %340 = vector.extract_strided_slice %326 {offsets = [0, 384], sizes = [8, 128], strides = [1, 1]} : vector<8x512xf32> to vector<8x128xf32>
    %341 = arith.mulf %332, %340 : vector<8x128xf32>
    %342 = arith.addf %339, %341 : vector<8x128xf32>
    %343 = math.tanh %342 : vector<8x128xf32>
    %cst_71 = arith.constant 1.000000e+00 : f32
    %344 = vector.broadcast %cst_71 : f32 to vector<8x128xf32>
    %345 = arith.subf %344, %338 : vector<8x128xf32>
    %346 = arith.mulf %345, %343 : vector<8x128xf32>
    %347 = arith.mulf %338, %287 : vector<8x128xf32>
    %348 = arith.addf %346, %347 : vector<8x128xf32>
    %c6_i32 = arith.constant 6 : i32
    %c8_i32_72 = arith.constant 8 : i32
    %349 = arith.muli %c6_i32, %c8_i32_72 : i32
    %350 = tpu.assume_multiple %349, 8 : i32
    %351 = arith.index_cast %350 : i32 to index
    %c0_73 = arith.constant 0 : index
    %352 = vector.load %arg14[%351, %c0_73] : memref<64x384xf32, #tpu.memory_space<vmem>>, vector<8x384xf32>
    %353 = arith.truncf %321 : vector<8x128xf32> to vector<8x128xbf16>
    %cst_74 = arith.constant dense<0.000000e+00> : vector<8x384xf32>
    %354 = tpu.matmul %353, %7, %cst_74 {dimension_numbers = #tpu.dot_dimension_numbers<[1], [0], [0], [1], [0, 0, 1, 1], [], []>} : vector<8x128xbf16>, vector<128x384xbf16>, vector<8x384xf32> -> vector<8x384xf32>
    %355 = vector.extract_strided_slice %352 {offsets = [0, 0], sizes = [8, 128], strides = [1, 1]} : vector<8x384xf32> to vector<8x128xf32>
    %356 = vector.extract_strided_slice %354 {offsets = [0, 0], sizes = [8, 128], strides = [1, 1]} : vector<8x384xf32> to vector<8x128xf32>
    %357 = arith.addf %355, %356 : vector<8x128xf32>
    %358 = arith.negf %357 : vector<8x128xf32>
    %359 = math.exp %358 : vector<8x128xf32>
    %cst_75 = arith.constant 1.000000e+00 : f32
    %360 = vector.broadcast %cst_75 : f32 to vector<8x128xf32>
    %361 = arith.addf %360, %359 : vector<8x128xf32>
    %362 = arith.divf %360, %361 : vector<8x128xf32>
    %363 = vector.extract_strided_slice %352 {offsets = [0, 128], sizes = [8, 128], strides = [1, 1]} : vector<8x384xf32> to vector<8x128xf32>
    %364 = vector.extract_strided_slice %354 {offsets = [0, 128], sizes = [8, 128], strides = [1, 1]} : vector<8x384xf32> to vector<8x128xf32>
    %365 = arith.addf %363, %364 : vector<8x128xf32>
    %366 = arith.negf %365 : vector<8x128xf32>
    %367 = math.exp %366 : vector<8x128xf32>
    %cst_76 = arith.constant 1.000000e+00 : f32
    %368 = vector.broadcast %cst_76 : f32 to vector<8x128xf32>
    %369 = arith.addf %368, %367 : vector<8x128xf32>
    %370 = arith.divf %368, %369 : vector<8x128xf32>
    %371 = vector.extract_strided_slice %352 {offsets = [0, 256], sizes = [8, 128], strides = [1, 1]} : vector<8x384xf32> to vector<8x128xf32>
    %372 = vector.extract_strided_slice %354 {offsets = [0, 256], sizes = [8, 128], strides = [1, 1]} : vector<8x384xf32> to vector<8x128xf32>
    %373 = vector.broadcast %8 : vector<1x128xf32> to vector<8x128xf32>
    %374 = arith.addf %372, %373 : vector<8x128xf32>
    %375 = arith.mulf %362, %374 : vector<8x128xf32>
    %376 = arith.addf %371, %375 : vector<8x128xf32>
    %377 = math.tanh %376 : vector<8x128xf32>
    %cst_77 = arith.constant 1.000000e+00 : f32
    %378 = vector.broadcast %cst_77 : f32 to vector<8x128xf32>
    %379 = arith.subf %378, %370 : vector<8x128xf32>
    %380 = arith.mulf %379, %377 : vector<8x128xf32>
    %381 = arith.mulf %370, %321 : vector<8x128xf32>
    %382 = arith.addf %380, %381 : vector<8x128xf32>
    %383 = tpu.concatenate %321, %348 in 1 : vector<8x128xf32>, vector<8x128xf32> -> vector<8x256xf32>
    %384 = arith.truncf %383 : vector<8x256xf32> to vector<8x256xbf16>
    %cst_78 = arith.constant dense<0.000000e+00> : vector<8x512xf32>
    %385 = tpu.matmul %384, %9, %cst_78 {dimension_numbers = #tpu.dot_dimension_numbers<[1], [0], [0], [1], [0, 0, 1, 1], [], []>} : vector<8x256xbf16>, vector<256x512xbf16>, vector<8x512xf32> -> vector<8x512xf32>
    %386 = vector.broadcast %10 : vector<1x512xf32> to vector<8x512xf32>
    %387 = arith.addf %385, %386 : vector<8x512xf32>
    %388 = vector.extract_strided_slice %387 {offsets = [0, 0], sizes = [8, 128], strides = [1, 1]} : vector<8x512xf32> to vector<8x128xf32>
    %389 = arith.negf %388 : vector<8x128xf32>
    %390 = math.exp %389 : vector<8x128xf32>
    %cst_79 = arith.constant 1.000000e+00 : f32
    %391 = vector.broadcast %cst_79 : f32 to vector<8x128xf32>
    %392 = arith.addf %391, %390 : vector<8x128xf32>
    %393 = arith.divf %391, %392 : vector<8x128xf32>
    %394 = vector.extract_strided_slice %387 {offsets = [0, 128], sizes = [8, 128], strides = [1, 1]} : vector<8x512xf32> to vector<8x128xf32>
    %395 = arith.negf %394 : vector<8x128xf32>
    %396 = math.exp %395 : vector<8x128xf32>
    %cst_80 = arith.constant 1.000000e+00 : f32
    %397 = vector.broadcast %cst_80 : f32 to vector<8x128xf32>
    %398 = arith.addf %397, %396 : vector<8x128xf32>
    %399 = arith.divf %397, %398 : vector<8x128xf32>
    %400 = vector.extract_strided_slice %387 {offsets = [0, 256], sizes = [8, 128], strides = [1, 1]} : vector<8x512xf32> to vector<8x128xf32>
    %401 = vector.extract_strided_slice %387 {offsets = [0, 384], sizes = [8, 128], strides = [1, 1]} : vector<8x512xf32> to vector<8x128xf32>
    %402 = arith.mulf %393, %401 : vector<8x128xf32>
    %403 = arith.addf %400, %402 : vector<8x128xf32>
    %404 = math.tanh %403 : vector<8x128xf32>
    %cst_81 = arith.constant 1.000000e+00 : f32
    %405 = vector.broadcast %cst_81 : f32 to vector<8x128xf32>
    %406 = arith.subf %405, %399 : vector<8x128xf32>
    %407 = arith.mulf %406, %404 : vector<8x128xf32>
    %408 = arith.mulf %399, %348 : vector<8x128xf32>
    %409 = arith.addf %407, %408 : vector<8x128xf32>
    %c7_i32 = arith.constant 7 : i32
    %c8_i32_82 = arith.constant 8 : i32
    %410 = arith.muli %c7_i32, %c8_i32_82 : i32
    %411 = tpu.assume_multiple %410, 8 : i32
    %412 = arith.index_cast %411 : i32 to index
    %c0_83 = arith.constant 0 : index
    %413 = vector.load %arg14[%412, %c0_83] : memref<64x384xf32, #tpu.memory_space<vmem>>, vector<8x384xf32>
    %414 = arith.truncf %382 : vector<8x128xf32> to vector<8x128xbf16>
    %cst_84 = arith.constant dense<0.000000e+00> : vector<8x384xf32>
    %415 = tpu.matmul %414, %7, %cst_84 {dimension_numbers = #tpu.dot_dimension_numbers<[1], [0], [0], [1], [0, 0, 1, 1], [], []>} : vector<8x128xbf16>, vector<128x384xbf16>, vector<8x384xf32> -> vector<8x384xf32>
    %416 = vector.extract_strided_slice %413 {offsets = [0, 0], sizes = [8, 128], strides = [1, 1]} : vector<8x384xf32> to vector<8x128xf32>
    %417 = vector.extract_strided_slice %415 {offsets = [0, 0], sizes = [8, 128], strides = [1, 1]} : vector<8x384xf32> to vector<8x128xf32>
    %418 = arith.addf %416, %417 : vector<8x128xf32>
    %419 = arith.negf %418 : vector<8x128xf32>
    %420 = math.exp %419 : vector<8x128xf32>
    %cst_85 = arith.constant 1.000000e+00 : f32
    %421 = vector.broadcast %cst_85 : f32 to vector<8x128xf32>
    %422 = arith.addf %421, %420 : vector<8x128xf32>
    %423 = arith.divf %421, %422 : vector<8x128xf32>
    %424 = vector.extract_strided_slice %413 {offsets = [0, 128], sizes = [8, 128], strides = [1, 1]} : vector<8x384xf32> to vector<8x128xf32>
    %425 = vector.extract_strided_slice %415 {offsets = [0, 128], sizes = [8, 128], strides = [1, 1]} : vector<8x384xf32> to vector<8x128xf32>
    %426 = arith.addf %424, %425 : vector<8x128xf32>
    %427 = arith.negf %426 : vector<8x128xf32>
    %428 = math.exp %427 : vector<8x128xf32>
    %cst_86 = arith.constant 1.000000e+00 : f32
    %429 = vector.broadcast %cst_86 : f32 to vector<8x128xf32>
    %430 = arith.addf %429, %428 : vector<8x128xf32>
    %431 = arith.divf %429, %430 : vector<8x128xf32>
    %432 = vector.extract_strided_slice %413 {offsets = [0, 256], sizes = [8, 128], strides = [1, 1]} : vector<8x384xf32> to vector<8x128xf32>
    %433 = vector.extract_strided_slice %415 {offsets = [0, 256], sizes = [8, 128], strides = [1, 1]} : vector<8x384xf32> to vector<8x128xf32>
    %434 = vector.broadcast %8 : vector<1x128xf32> to vector<8x128xf32>
    %435 = arith.addf %433, %434 : vector<8x128xf32>
    %436 = arith.mulf %423, %435 : vector<8x128xf32>
    %437 = arith.addf %432, %436 : vector<8x128xf32>
    %438 = math.tanh %437 : vector<8x128xf32>
    %cst_87 = arith.constant 1.000000e+00 : f32
    %439 = vector.broadcast %cst_87 : f32 to vector<8x128xf32>
    %440 = arith.subf %439, %431 : vector<8x128xf32>
    %441 = arith.mulf %440, %438 : vector<8x128xf32>
    %442 = arith.mulf %431, %382 : vector<8x128xf32>
    %443 = arith.addf %441, %442 : vector<8x128xf32>
    %444 = tpu.concatenate %382, %409 in 1 : vector<8x128xf32>, vector<8x128xf32> -> vector<8x256xf32>
    %445 = arith.truncf %444 : vector<8x256xf32> to vector<8x256xbf16>
    %cst_88 = arith.constant dense<0.000000e+00> : vector<8x512xf32>
    %446 = tpu.matmul %445, %9, %cst_88 {dimension_numbers = #tpu.dot_dimension_numbers<[1], [0], [0], [1], [0, 0, 1, 1], [], []>} : vector<8x256xbf16>, vector<256x512xbf16>, vector<8x512xf32> -> vector<8x512xf32>
    %447 = vector.broadcast %10 : vector<1x512xf32> to vector<8x512xf32>
    %448 = arith.addf %446, %447 : vector<8x512xf32>
    %449 = vector.extract_strided_slice %448 {offsets = [0, 0], sizes = [8, 128], strides = [1, 1]} : vector<8x512xf32> to vector<8x128xf32>
    %450 = arith.negf %449 : vector<8x128xf32>
    %451 = math.exp %450 : vector<8x128xf32>
    %cst_89 = arith.constant 1.000000e+00 : f32
    %452 = vector.broadcast %cst_89 : f32 to vector<8x128xf32>
    %453 = arith.addf %452, %451 : vector<8x128xf32>
    %454 = arith.divf %452, %453 : vector<8x128xf32>
    %455 = vector.extract_strided_slice %448 {offsets = [0, 128], sizes = [8, 128], strides = [1, 1]} : vector<8x512xf32> to vector<8x128xf32>
    %456 = arith.negf %455 : vector<8x128xf32>
    %457 = math.exp %456 : vector<8x128xf32>
    %cst_90 = arith.constant 1.000000e+00 : f32
    %458 = vector.broadcast %cst_90 : f32 to vector<8x128xf32>
    %459 = arith.addf %458, %457 : vector<8x128xf32>
    %460 = arith.divf %458, %459 : vector<8x128xf32>
    %461 = vector.extract_strided_slice %448 {offsets = [0, 256], sizes = [8, 128], strides = [1, 1]} : vector<8x512xf32> to vector<8x128xf32>
    %462 = vector.extract_strided_slice %448 {offsets = [0, 384], sizes = [8, 128], strides = [1, 1]} : vector<8x512xf32> to vector<8x128xf32>
    %463 = arith.mulf %454, %462 : vector<8x128xf32>
    %464 = arith.addf %461, %463 : vector<8x128xf32>
    %465 = math.tanh %464 : vector<8x128xf32>
    %cst_91 = arith.constant 1.000000e+00 : f32
    %466 = vector.broadcast %cst_91 : f32 to vector<8x128xf32>
    %467 = arith.subf %466, %460 : vector<8x128xf32>
    %468 = arith.mulf %467, %465 : vector<8x128xf32>
    %469 = arith.mulf %460, %409 : vector<8x128xf32>
    %470 = arith.addf %468, %469 : vector<8x128xf32>
    %c7_i32_92 = arith.constant 7 : i32
    %471 = tpu.concatenate %443, %470 in 1 : vector<8x128xf32>, vector<8x128xf32> -> vector<8x256xf32>
    %472 = arith.truncf %471 : vector<8x256xf32> to vector<8x256xbf16>
    %cst_93 = arith.constant dense<0.000000e+00> : vector<8x512xf32>
    %473 = tpu.matmul %472, %9, %cst_93 {dimension_numbers = #tpu.dot_dimension_numbers<[1], [0], [0], [1], [0, 0, 1, 1], [], []>} : vector<8x256xbf16>, vector<256x512xbf16>, vector<8x512xf32> -> vector<8x512xf32>
    %474 = vector.broadcast %10 : vector<1x512xf32> to vector<8x512xf32>
    %475 = arith.addf %473, %474 : vector<8x512xf32>
    %476 = vector.extract_strided_slice %475 {offsets = [0, 0], sizes = [8, 128], strides = [1, 1]} : vector<8x512xf32> to vector<8x128xf32>
    %477 = arith.negf %476 : vector<8x128xf32>
    %478 = math.exp %477 : vector<8x128xf32>
    %cst_94 = arith.constant 1.000000e+00 : f32
    %479 = vector.broadcast %cst_94 : f32 to vector<8x128xf32>
    %480 = arith.addf %479, %478 : vector<8x128xf32>
    %481 = arith.divf %479, %480 : vector<8x128xf32>
    %482 = vector.extract_strided_slice %475 {offsets = [0, 128], sizes = [8, 128], strides = [1, 1]} : vector<8x512xf32> to vector<8x128xf32>
    %483 = arith.negf %482 : vector<8x128xf32>
    %484 = math.exp %483 : vector<8x128xf32>
    %cst_95 = arith.constant 1.000000e+00 : f32
    %485 = vector.broadcast %cst_95 : f32 to vector<8x128xf32>
    %486 = arith.addf %485, %484 : vector<8x128xf32>
    %487 = arith.divf %485, %486 : vector<8x128xf32>
    %488 = vector.extract_strided_slice %475 {offsets = [0, 256], sizes = [8, 128], strides = [1, 1]} : vector<8x512xf32> to vector<8x128xf32>
    %489 = vector.extract_strided_slice %475 {offsets = [0, 384], sizes = [8, 128], strides = [1, 1]} : vector<8x512xf32> to vector<8x128xf32>
    %490 = arith.mulf %481, %489 : vector<8x128xf32>
    %491 = arith.addf %488, %490 : vector<8x128xf32>
    %492 = math.tanh %491 : vector<8x128xf32>
    %cst_96 = arith.constant 1.000000e+00 : f32
    %493 = vector.broadcast %cst_96 : f32 to vector<8x128xf32>
    %494 = arith.subf %493, %487 : vector<8x128xf32>
    %495 = arith.mulf %494, %492 : vector<8x128xf32>
    %496 = arith.mulf %487, %470 : vector<8x128xf32>
    %497 = arith.addf %495, %496 : vector<8x128xf32>
    %c0_97 = arith.constant 0 : index
    %c0_98 = arith.constant 0 : index
    %498 = vector.load %arg9[%c0_97, %c0_98] : memref<1x128xf32, #tpu.memory_space<vmem>>, vector<1x128xf32>
    %499 = vector.broadcast %498 : vector<1x128xf32> to vector<8x128xf32>
    %500 = arith.subf %497, %499 : vector<8x128xf32>
    %c0_99 = arith.constant 0 : index
    %c0_100 = arith.constant 0 : index
    %501 = vector.load %arg10[%c0_99, %c0_100] : memref<1x128xf32, #tpu.memory_space<vmem>>, vector<1x128xf32>
    %cst_101 = arith.constant 9.99999974E-6 : f32
    %502 = vector.broadcast %cst_101 : f32 to vector<1x128xf32>
    %503 = arith.addf %501, %502 : vector<1x128xf32>
    %504 = math.rsqrt %503 : vector<1x128xf32>
    %505 = vector.broadcast %504 : vector<1x128xf32> to vector<8x128xf32>
    %506 = arith.mulf %500, %505 : vector<8x128xf32>
    %c0_102 = arith.constant 0 : index
    %c0_103 = arith.constant 0 : index
    %507 = vector.load %arg7[%c0_102, %c0_103] : memref<1x128xf32, #tpu.memory_space<vmem>>, vector<1x128xf32>
    %508 = vector.broadcast %507 : vector<1x128xf32> to vector<8x128xf32>
    %509 = arith.mulf %506, %508 : vector<8x128xf32>
    %c0_104 = arith.constant 0 : index
    %c0_105 = arith.constant 0 : index
    %510 = vector.load %arg8[%c0_104, %c0_105] : memref<1x128xf32, #tpu.memory_space<vmem>>, vector<1x128xf32>
    %511 = vector.broadcast %510 : vector<1x128xf32> to vector<8x128xf32>
    %512 = arith.addf %509, %511 : vector<8x128xf32>
    %cst_106 = arith.constant 0.000000e+00 : f32
    %513 = vector.broadcast %cst_106 : f32 to vector<8x128xf32>
    %514 = arith.maximumf %512, %513 : vector<8x128xf32>
    %515 = arith.truncf %514 : vector<8x128xf32> to vector<8x128xbf16>
    %c0_107 = arith.constant 0 : index
    %c0_108 = arith.constant 0 : index
    %516 = vector.load %arg11[%c0_107, %c0_108] : memref<128x128xbf16, #tpu.memory_space<vmem>>, vector<128x128xbf16>
    %cst_109 = arith.constant dense<0.000000e+00> : vector<8x128xf32>
    %517 = tpu.matmul %515, %516, %cst_109 {dimension_numbers = #tpu.dot_dimension_numbers<[1], [0], [0], [1], [0, 0, 1, 1], [], []>} : vector<8x128xbf16>, vector<128x128xbf16>, vector<8x128xf32> -> vector<8x128xf32>
    %c0_110 = arith.constant 0 : index
    %c0_111 = arith.constant 0 : index
    %518 = vector.load %arg12[%c0_110, %c0_111] : memref<1x128xf32, #tpu.memory_space<vmem>>, vector<1x128xf32>
    %519 = vector.broadcast %518 : vector<1x128xf32> to vector<8x128xf32>
    %520 = arith.addf %517, %519 : vector<8x128xf32>
    %c0_112 = arith.constant 0 : index
    %c0_113 = arith.constant 0 : index
    %521 = vector.load %arg13[%c0_112, %c0_113] : memref<8x128xf32, #tpu.memory_space<vmem>>, vector<8x128xf32>
    tpu.vector_store %arg13[%c0_112, %c0_113], %520 {strides = array<i32>} : memref<8x128xf32, #tpu.memory_space<vmem>>, vector<8x128xf32>,
    return
  }
}

</mosaic_0001>

<bundles_post_ra>
// kernel: tpu_custom_call.1
= control target key start
LH: loop header
LB: loop body
LE: loop exit
PB: predicated region body
PF: predicated region fallthrough
CT: control target
= control target key end

     0   :  { %18 = vsyncpa [#allocation4], 0  ;;  %s5521_s0 = inlined_call_operand.hbm [shape: bf16[64,128], index: 0, kind: input, shape index: {}]   ;;  %s5522_s1 = inlined_call_operand.hbm [shape: bf16[128,384], index: 1, kind: input, shape index: {}]   ;;  %s5523_s2 = inlined_call_operand.hbm [shape: bf16[128,384], index: 2, kind: input, shape index: {}]   ;;  %s5524_s3 = inlined_call_operand.hbm [shape: f32[1,384], index: 3, kind: input, shape index: {}]   ;;  %s5525_s4 = inlined_call_operand.vmem [shape: f32[1,128], index: 4, kind: input, shape index: {}]   ;;  %s5526_s5 = inlined_call_operand.hbm [shape: bf16[256,512], index: 5, kind: input, shape index: {}]   ;;  %s5527_s6 = inlined_call_operand.vmem [shape: f32[1,512], index: 6, kind: input, shape index: {}]   ;;  %s5528_s7 = inlined_call_operand.vmem [shape: f32[1,128], index: 7, kind: input, shape index: {}]   ;;  %s5529_s8 = inlined_call_operand.vmem [shape: f32[1,128], index: 8, kind: input, shape index: {}]   ;;  %s5530_s9 = inlined_call_operand.vmem [shape: f32[1,128], index: 9, kind: input, shape index: {}]   ;;  %s5531_s10 = inlined_call_operand.vmem [shape: f32[1,128], index: 10, kind: input, shape index: {}]   ;;  %s5532_s11 = inlined_call_operand.hbm [shape: bf16[128,128], index: 11, kind: input, shape index: {}]   ;;  %s5533_s12 = inlined_call_operand.vmem [shape: f32[1,128], index: 12, kind: input, shape index: {}]   ;;  %s5534_s13 = inlined_call_operand.hbm [shape: f32[8,128], index: 13, kind: output, shape index: {}]  }
   0x1   :  { %19 = vsyncpa [#allocation7], 0 }
   0x2   :  { %20 = vsyncpa [#allocation10], 0 }
   0x3   :  { %21 = vsyncpa [#allocation13], 0  ;;  %s40_s27 = sshll.u32 %s5522_s1, 4  ;;  %s41_s27 = int_to_ptr.hbm [resolvable:$true] %s40_s27 }
   0x4   :  { %22 = vsyncpa [#allocation5], 0  ;;  %s4112_s28 = smov [#allocation6]   ;;  %s67_s15 = sshll.u32 %s5524_s3, 4  ;;  %s68_s15 = int_to_ptr.hbm [resolvable:$true] %s67_s15 }
   0x5   :  { %s42_s29 = sshll.u32 %s4112_s28, 4  ;;  %s4113_s16 = smov 192   ;;  %s43_s29 = int_to_ptr.vmem [resolvable:$true] %s42_s29 }
   0x6   :  { %s4114_s17 = smov 12   ;;  %s4115_s18 = smov [#allocation9]  }
   0x7   :  { %48 = dma.hbm_to_vmem [thread:$0]  %s41_s27, 3072, %s43_s29, [#allocation7], %s4113_s16, %s4113_s16, %s4114_s17  }
   0x8   :  { %s69_s19 = sshll.u32 %s4115_s18, 4  ;;  %s27_s22 = sshll.u32 %s5521_s0, 4  ;;  %s70_s19 = int_to_ptr.vmem [resolvable:$true] %s69_s19  ;;  %s28_s22 = int_to_ptr.hbm [resolvable:$true] %s27_s22 }
   0x9   :  { %72 = dma.hbm_to_vmem [thread:$0]  %s68_s15, 48, %s70_s19, [#allocation10]  }
   0xa   :  { %s4116_s1 = smov [#allocation3]   ;;  %s53_s3 = sshll.u32 %s5523_s2, 4  ;;  %s54_s3 = int_to_ptr.hbm [resolvable:$true] %s53_s3 }
   0xb   :  { %s29_s23 = sshll.u32 %s4116_s1, 4  ;;  %s4117_s26 = smov 64   ;;  %s30_s23 = int_to_ptr.vmem [resolvable:$true] %s29_s23 }
   0xc   :  { %s4118_s28 = smov 4   ;;  %s4119_s27 = smov [#allocation8]  }
   0xd   :  { %35 = dma.hbm_to_vmem [thread:$0]  %s28_s22, 512, %s30_s23, [#allocation4], %s4117_s26, %s4117_s26, %s4118_s28  }
   0xe   :  { %s55_s29 = sshll.u32 %s4119_s27, 4  ;;  %s79_s0 = sshll.u32 %s5526_s5, 4  ;;  %s56_s29 = int_to_ptr.vmem [resolvable:$true] %s55_s29  ;;  %s80_s0 = int_to_ptr.hbm [resolvable:$true] %s79_s0 }
   0xf   :  { %61 = dma.hbm_to_vmem [thread:$0]  %s54_s3, 3072, %s56_s29, [#allocation7], %s4113_s16, %s4113_s16, %s4114_s17  }
  0x10   :  { %s4120_s15 = smov [#allocation11]   ;;  %s102_s2 = sshll.u32 %s5532_s11, 4  ;;  %s103_s2 = int_to_ptr.hbm [resolvable:$true] %s102_s2 }
  0x11   :  { %s81_s18 = sshll.u32 %s4120_s15, 4  ;;  %s4121_s21 = smov 256   ;;  %s82_s18 = int_to_ptr.vmem [resolvable:$true] %s81_s18 }
  0x12   :  { %s4122_s1 = smov 16   ;;  %s4123_s22 = smov [#allocation12]  }
  0x13   :  { %87 = dma.hbm_to_vmem [thread:$0]  %s80_s0, 8192, %s82_s18, [#allocation10], %s4121_s21, %s4121_s21, %s4122_s1  }
  0x14   :  { %s104_s23 = sshll.u32 %s4123_s22, 4  ;;  %s105_s23 = int_to_ptr.vmem [resolvable:$true] %s104_s23 }
  0x15   :  { %110 = dma.hbm_to_vmem [thread:$0]  %s103_s2, 1024, %s105_s23, [#allocation13], %s4117_s26, %s4117_s26, %s4118_s28  }
  0x16   :  { %4102 = dma.done.wait [#allocation4], 512  }
  0x17   :  { %4103 = vsyncadd [#allocation4], 4294966784 }
  0x18   :  { %4104 = dma.done.wait [#allocation7], 6144  }
  0x19   :  { %4105 = vsyncadd [#allocation7], 4294961152 }
  0x1a   :  { %4106 = dma.done.wait [#allocation10], 8240  }
  0x1b   :  { %4107 = vsyncadd [#allocation10], 4294959056 }
  0x1c   :  { %4108 = dma.done.wait [#allocation13], 1024  }
  0x1d   :  { %4109 = vsyncadd [#allocation13], 4294966272  ;;  %v3200_v0 = vld [vmem:[#allocation6 + $0xa8] sm:$0xf]  ;;  %v3652_v1 = vld [vmem:[#allocation6 + $0xb0] sm:$0xf0] }
  0x1e   :  { %v3296_v2 = vld [vmem:[#allocation8 + $0xa8] sm:$0xf]  ;;  %v3201_v3 = vor.u32 %v3652_v1, %v3200_v0  ;;  %v3676_v4 = vld [vmem:[#allocation8 + $0xb0] sm:$0xf0]  ;;  %v3188_v5 = vld [vmem:[#allocation6 + $0x90] sm:$0xf] }
  0x1f   :  { %v3649_v6 = vld [vmem:[#allocation6 + $0x98] sm:$0xf0]  ;;  %v4215_v7 = vor.u32 %v3676_v4, %v3296_v2  ;;  %v3284_v8 = vld [vmem:[#allocation8 + $0x90] sm:$0xf]  ;;  %v3176_v12 = vld [vmem:[#allocation6 + $0x78] sm:$0xf] }
  0x20   :  { %v3673_v9 = vld [vmem:[#allocation8 + $0x98] sm:$0xf0]  ;;  %338 = vmatpush.bf16.msra.mxu0 %v3201_v3  ;;  %v3189_v10 = vor.u32 %v3649_v6, %v3188_v5  ;;  %v3646_v13 = vld [vmem:[#allocation6 + $0x80] sm:$0xf0]  ;;  %v3272_v14 = vld [vmem:[#allocation8 + $0x78] sm:$0xf] }
  0x21   :  { %5693 = vst [vmem:[#allocation20_spill] sm:$0xff] %v4215_v7  ;;  %678 = vmatpush.bf16.msra.mxu3 %v4215_v7  ;;  %v4218_v11 = vor.u32 %v3673_v9, %v3284_v8  ;;  %v3670_v15 = vld [vmem:[#allocation8 + $0x80] sm:$0xf0]  ;;  %v3177_v16 = vor.u32 %v3646_v13, %v3176_v12  ;;  %v3164_v18 = vld [vmem:[#allocation6 + $0x60] sm:$0xf] }
  0x22   :  { %v4221_v17 = vor.u32 %v3670_v15, %v3272_v14  ;;  %v3643_v19 = vld [vmem:[#allocation6 + $0x68] sm:$0xf0]  ;;  %v3260_v20 = vld [vmem:[#allocation8 + $0x60] sm:$0xf]  ;;  %v3152_v23 = vld [vmem:[#allocation6 + $0x48] sm:$0xf] }
  0x23   :  { %5694 = vst [vmem:[#allocation21_spill] sm:$0xff] %v4218_v11  ;;  %v3667_v21 = vld [vmem:[#allocation8 + $0x68] sm:$0xf0]  ;;  %v3165_v22 = vor.u32 %v3643_v19, %v3164_v18  ;;  %v3640_v25 = vld [vmem:[#allocation6 + $0x50] sm:$0xf0] }
  0x24   :  { %339 = vmatpush.bf16.msra.mxu0 %v3189_v10  ;;  %5695 = vst [vmem:[#allocation22_spill] sm:$0xff] %v4221_v17  ;;  %v4224_v24 = vor.u32 %v3667_v21, %v3260_v20  ;;  %v3651_v26 = vld [vmem:[#allocation6 + $0xac] sm:$0xf]  ;;  %v3202_v27 = vld [vmem:[#allocation6 + $0xb4] sm:$0xf0]  ;;  %v3153_v33 = vor.u32 %v3640_v25, %v3152_v23  ;;  %v4242_v20 = vld [vmem:[#allocation3] sm:$0xff] }
  0x25   :  { %679 = vmatpush.bf16.msra.mxu3 %v4218_v11  ;;  %v3248_v28 = vld [vmem:[#allocation8 + $0x48] sm:$0xf]  ;;  %v3664_v29 = vld [vmem:[#allocation8 + $0x50] sm:$0xf0]  ;;  %v3205_v30 = vor.u32 %v3651_v26, %v3202_v27  ;;  %v3190_v32 = vld [vmem:[#allocation6 + $0x9c] sm:$0xf0] }
  0x26   :  { %5696 = vst [vmem:[#allocation23_spill] sm:$0xff] %v4224_v24  ;;  %v3648_v31 = vld [vmem:[#allocation6 + $0x94] sm:$0xf]  ;;  %v3140_v34 = vld [vmem:[#allocation6 + $0x30] sm:$0xf]  ;;  %v4227_v36 = vor.u32 %v3664_v29, %v3248_v28 }
  0x27   :  { %367 = vmatpush.bf16.msra.mxu1 %v3205_v30  ;;  %v3193_v35 = vor.u32 %v3648_v31, %v3190_v32  ;;  %v3637_v37 = vld [vmem:[#allocation6 + $0x38] sm:$0xf0]  ;;  %v3178_v39 = vld [vmem:[#allocation6 + $0x84] sm:$0xf0]  ;;  %v3236_v40 = vld [vmem:[#allocation8 + $0x30] sm:$0xf] }
  0x28   :  { %340 = vmatpush.bf16.msra.mxu0 %v3177_v16  ;;  %5697 = vst [vmem:[#allocation24_spill] sm:$0xff] %v4227_v36  ;;  %v3645_v38 = vld [vmem:[#allocation6 + $0x7c] sm:$0xf]  ;;  %v3141_v42 = vor.u32 %v3637_v37, %v3140_v34  ;;  %v3128_v43 = vld [vmem:[#allocation6 + $0x18] sm:$0xf] }
  0x29   :  { %680 = vmatpush.bf16.msra.mxu3 %v4221_v17  ;;  %v3661_v41 = vld [vmem:[#allocation8 + $0x38] sm:$0xf0]  ;;  %v3634_v44 = vld [vmem:[#allocation6 + $0x20] sm:$0xf0]  ;;  %v3224_v45 = vld [vmem:[#allocation8 + $0x18] sm:$0xf]  ;;  %v3181_v46 = vor.u32 %v3645_v38, %v3178_v39 }
  0x2a   :  { %v4230_v47 = vor.u32 %v3661_v41, %v3236_v40  ;;  %v3642_v48 = vld [vmem:[#allocation6 + $0x64] sm:$0xf]  ;;  %v3166_v49 = vld [vmem:[#allocation6 + $0x6c] sm:$0xf0]  ;;  %v3653_v52 = vld [vmem:[#allocation6 + $0xb8] sm:$0xf0]  ;;  %v3129_v56 = vor.u32 %v3634_v44, %v3128_v43 }
  0x2b   :  { %368 = vmatpush.bf16.msra.mxu1 %v3193_v35  ;;  %v3658_v50 = vld [vmem:[#allocation8 + $0x20] sm:$0xf0]  ;;  %v3208_v51 = vld [vmem:[#allocation6 + $0xb0] sm:$0xf]  ;;  %v3116_v53 = vld [vmem:[#allocation6] sm:$0xf]  ;;  %v3169_v59 = vor.u32 %v3642_v48, %v3166_v49 }
  0x2c   :  { %341 = vmatpush.bf16.msra.mxu0 %v3165_v22  ;;  %v3631_v54 = vld [vmem:[#allocation6 + $0x8] sm:$0xf0]  ;;  %v3209_v55 = vor.u32 %v3653_v52, %v3208_v51  ;;  %v3212_v57 = vld [vmem:[#allocation8] sm:$0xf]  ;;  %v4233_v60 = vor.u32 %v3658_v50, %v3224_v45  ;;  %v3154_v62 = vld [vmem:[#allocation6 + $0x54] sm:$0xf0] }
  0x2d   :  { %681 = vmatpush.bf16.msra.mxu3 %v4224_v24  ;;  %v3655_v58 = vld [vmem:[#allocation8 + $0x8] sm:$0xf0]  ;;  %v3304_v63 = vld [vmem:[#allocation8 + $0xb0] sm:$0xf]  ;;  %v3677_v0 = vld [vmem:[#allocation8 + $0xb8] sm:$0xf0]  ;;  %v3117_v5 = vor.u32 %v3631_v54, %v3116_v53 }
  0x2e   :  { %v3639_v61 = vld [vmem:[#allocation6 + $0x4c] sm:$0xf]  ;;  %396 = vmatpush.bf16.msra.mxu2 %v3209_v55  ;;  %v3196_v1 = vld [vmem:[#allocation6 + $0x98] sm:$0xf]  ;;  %v3650_v4 = vld [vmem:[#allocation6 + $0xa0] sm:$0xf0]  ;;  %v4236_v9 = vor.u32 %v3655_v58, %v3212_v57  ;;  %v4238_v10 = vor.u32 %v3677_v0, %v3304_v63 }
  0x2f   :  { %369 = vmatpush.bf16.msra.mxu1 %v3181_v46  ;;  %v3675_v2 = vld [vmem:[#allocation8 + $0xac] sm:$0xf]  ;;  %v3298_v3 = vld [vmem:[#allocation8 + $0xb4] sm:$0xf0]  ;;  %v3157_v6 = vor.u32 %v3639_v61, %v3154_v62  ;;  %v3197_v8 = vor.u32 %v3650_v4, %v3196_v1  ;;  %v3636_v13 = vld [vmem:[#allocation6 + $0x34] sm:$0xf] }
  0x30   :  { %342 = vmatpush.bf16.msra.mxu0 %v3153_v33  ;;  %5698 = vst [vmem:[#allocation25_spill] sm:$0xff] %v4236_v9  ;;  %v3292_v12 = vld [vmem:[#allocation8 + $0x98] sm:$0xf]  ;;  %v3142_v14 = vld [vmem:[#allocation6 + $0x3c] sm:$0xf0]  ;;  %v4240_v15 = vor.u32 %v3675_v2, %v3298_v3  ;;  %v4124_v39 = vmov 0  }
  0x31   :  { %682 = vmatpush.bf16.msra.mxu3 %v4227_v36  ;;  %5699 = vst [vmem:[#allocation26_spill] sm:$0xff] %v4238_v10  ;;  %v3674_v16 = vld [vmem:[#allocation8 + $0xa0] sm:$0xf0]  ;;  %v3184_v18 = vld [vmem:[#allocation6 + $0x80] sm:$0xf]  ;;  %v3145_v25 = vor.u32 %v3636_v13, %v3142_v14 }
  0x32   :  { %397 = vmatpush.bf16.msra.mxu2 %v3197_v8  ;;  %v3647_v19 = vld [vmem:[#allocation6 + $0x88] sm:$0xf0]  ;;  %v3672_v21 = vld [vmem:[#allocation8 + $0x94] sm:$0xf]  ;;  %v3286_v22 = vld [vmem:[#allocation8 + $0x9c] sm:$0xf0]  ;;  %v4246_v26 = vor.u32 %v3674_v16, %v3292_v12 }
  0x33   :  { %370 = vmatpush.bf16.msra.mxu1 %v3169_v59  ;;  %v3185_v23 = vor.u32 %v3647_v19, %v3184_v18  ;;  %v3280_v27 = vld [vmem:[#allocation8 + $0x80] sm:$0xf]  ;;  %v3633_v28 = vld [vmem:[#allocation6 + $0x1c] sm:$0xf]  ;;  %v3130_v29 = vld [vmem:[#allocation6 + $0x24] sm:$0xf0]  ;;  %v4249_v30 = vor.u32 %v3672_v21, %v3286_v22 }
  0x34   :  { %343 = vmatpush.bf16.msra.mxu0 %v3141_v42  ;;  %5700 = vst [vmem:[#allocation27_spill] sm:$0xff] %v4246_v26  ;;  %v3671_v31 = vld [vmem:[#allocation8 + $0x88] sm:$0xf0]  ;;  %v3172_v32 = vld [vmem:[#allocation6 + $0x68] sm:$0xf]  ;;  %v3133_v40 = vor.u32 %v3633_v28, %v3130_v29 }
  0x35   :  { %683 = vmatpush.bf16.msra.mxu3 %v4230_v47  ;;  %5701 = vst [vmem:[#allocation28_spill] sm:$0xff] %v4249_v30  ;;  %v3644_v33 = vld [vmem:[#allocation6 + $0x70] sm:$0xf0]  ;;  %v3669_v34 = vld [vmem:[#allocation8 + $0x7c] sm:$0xf]  ;;  %v4254_v42 = vor.u32 %v3671_v31, %v3280_v27 }
  0x36   :  { %398 = vmatpush.bf16.msra.mxu2 %v3185_v23  ;;  %v3274_v35 = vld [vmem:[#allocation8 + $0x84] sm:$0xf0]  ;;  %v3173_v37 = vor.u32 %v3644_v33, %v3172_v32  ;;  %v3160_v38 = vld [vmem:[#allocation6 + $0x50] sm:$0xf]  ;;  %v3641_v41 = vld [vmem:[#allocation6 + $0x58] sm:$0xf0] }
  0x37   :  { %371 = vmatpush.bf16.msra.mxu1 %v3157_v6  ;;  %5702 = vst [vmem:[#allocation29_spill] sm:$0xff] %v4254_v42  ;;  %v3630_v43 = vld [vmem:[#allocation6 + $0x4] sm:$0xf]  ;;  %v3118_v44 = vld [vmem:[#allocation6 + $0xc] sm:$0xf0]  ;;  %v4257_v45 = vor.u32 %v3669_v34, %v3274_v35  ;;  %v3161_v50 = vor.u32 %v3641_v41, %v3160_v38  ;;  %v3627_v6 = vld [vmem:[#allocation3 + $0x8] sm:$0xff] }
  0x38   :  { %344 = vmatpush.bf16.msra.mxu0 %v3129_v56  ;;  %v3666_v46 = vld [vmem:[#allocation8 + $0x64] sm:$0xf]  ;;  %v3268_v48 = vld [vmem:[#allocation8 + $0x68] sm:$0xf]  ;;  %v3668_v49 = vld [vmem:[#allocation8 + $0x70] sm:$0xf0]  ;;  %v3121_v54 = vor.u32 %v3630_v43, %v3118_v44 }
  0x39   :  { %684 = vmatpush.bf16.msra.mxu3 %v4233_v60  ;;  %5703 = vst [vmem:[#allocation30_spill] sm:$0xff] %v4257_v45  ;;  %v3262_v51 = vld [vmem:[#allocation8 + $0x6c] sm:$0xf0]  ;;  %v3148_v52 = vld [vmem:[#allocation6 + $0x38] sm:$0xf]  ;;  %v4260_v55 = vor.u32 %v3668_v49, %v3268_v48 }
  0x3a   :  { %399 = vmatpush.bf16.msra.mxu2 %v3173_v37  ;;  %v3638_v53 = vld [vmem:[#allocation6 + $0x40] sm:$0xf0]  ;;  %v4263_v56 = vor.u32 %v3666_v46, %v3262_v51  ;;  %v3663_v57 = vld [vmem:[#allocation8 + $0x4c] sm:$0xf]  ;;  %v3256_v58 = vld [vmem:[#allocation8 + $0x50] sm:$0xf] }
  0x3b   :  { %372 = vmatpush.bf16.msra.mxu1 %v3145_v25  ;;  %5704 = vst [vmem:[#allocation31_spill] sm:$0xff] %v4260_v55  ;;  %v3665_v59 = vld [vmem:[#allocation8 + $0x58] sm:$0xf0]  ;;  %v3149_v61 = vor.u32 %v3638_v53, %v3148_v52  ;;  %v3250_v62 = vld [vmem:[#allocation8 + $0x54] sm:$0xf0]  ;;  %v3628_v37 = vld [vmem:[#allocation3 + $0x10] sm:$0xff] }
  0x3c   :  { %345 = vmatpush.bf16.msra.mxu0 %v3117_v5  ;;  %5705 = vst [vmem:[#allocation32_spill] sm:$0xff] %v4263_v56  ;;  %v3136_v63 = vld [vmem:[#allocation6 + $0x20] sm:$0xf]  ;;  %v3635_v0 = vld [vmem:[#allocation6 + $0x28] sm:$0xf0]  ;;  %v4266_v1 = vor.u32 %v3665_v59, %v3256_v58  ;;  %v4270_v2 = vor.u32 %v3663_v57, %v3250_v62 }
  0x3d   :  { %685 = vmatpush.bf16.msra.mxu3 %v4236_v9  ;;  %v3244_v3 = vld [vmem:[#allocation8 + $0x38] sm:$0xf]  ;;  %v3662_v4 = vld [vmem:[#allocation8 + $0x40] sm:$0xf0]  ;;  %v3137_v5 = vor.u32 %v3635_v0, %v3136_v63  ;;  %v3660_v8 = vld [vmem:[#allocation8 + $0x34] sm:$0xf] }
  0x3e   :  { %400 = vmatpush.bf16.msra.mxu2 %v3161_v50  ;;  %5706 = vst [vmem:[#allocation33_spill] sm:$0xff] %v4266_v1  ;;  %v3238_v12 = vld [vmem:[#allocation8 + $0x3c] sm:$0xf0]  ;;  %v4274_v13 = vor.u32 %v3662_v4, %v3244_v3  ;;  %v3657_v16 = vld [vmem:[#allocation8 + $0x1c] sm:$0xf] }
  0x3f   :  { %346 = vmatmul.bf16.vlgmr.msra.gmra.mxu0 %v4242_v20  ;;  %373 = vmatpush.bf16.msra.mxu1 %v3133_v40  ;;  %5707 = vst [vmem:[#allocation34_spill] sm:$0xff] %v4270_v2  ;;  %v4278_v14 = vor.u32 %v3660_v8, %v3238_v12  ;;  %v3124_v18 = vld [vmem:[#allocation6 + $0x8] sm:$0xf]  ;;  %v3632_v19 = vld [vmem:[#allocation6 + $0x10] sm:$0xf0] }
  0x40   :  { %704 = vmatpush.bf16.msrb.mxu0 %v4238_v10  ;;  %686 = vmatmul.bf16.vlgmr.msra.gmra.mxu3 %v4124_v39  ;;  %5708 = vst [vmem:[#allocation35_spill] sm:$0xff] %v4274_v13  ;;  %v3226_v21 = vld [vmem:[#allocation8 + $0x24] sm:$0xf0]  ;;  %v3232_v22 = vld [vmem:[#allocation8 + $0x20] sm:$0xf]  ;;  %v3125_v25 = vor.u32 %v3632_v19, %v3124_v18 }
  0x41   :  { %691 = vmatpush.bf16.msrb.mxu3 %v4240_v15  ;;  %5709 = vst [vmem:[#allocation36_spill] sm:$0xff] %v4278_v14  ;;  %v3659_v23 = vld [vmem:[#allocation8 + $0x28] sm:$0xf0]  ;;  %v4285_v28 = vor.u32 %v3657_v16, %v3226_v21  ;;  %v3220_v29 = vld [vmem:[#allocation8 + $0x8] sm:$0xf] }
  0x42   :  { %401 = vmatpush.bf16.msra.mxu2 %v3149_v61  ;;  %v4281_v27 = vor.u32 %v3659_v23, %v3232_v22  ;;  %v3656_v31 = vld [vmem:[#allocation8 + $0x10] sm:$0xf0]  ;;  %v3654_v32 = vld [vmem:[#allocation8 + $0x4] sm:$0xf]  ;;  %v3214_v33 = vld [vmem:[#allocation8 + $0xc] sm:$0xf0] }
  0x43   :  { %374 = vmatpush.bf16.msra.mxu1 %v3121_v54  ;;  %5711 = vst [vmem:[#allocation38_spill] sm:$0xff] %v4285_v28  ;;  %v4290_v34 = vor.u32 %v3656_v31, %v3220_v29  ;;  %v4293_v35 = vor.u32 %v3654_v32, %v3214_v33  ;;  %v3424_v40 = vld [vmem:[#allocation11 + $0xe0] sm:$0xf]  ;;  %v3708_v41 = vld [vmem:[#allocation11 + $0xec] sm:$0xf0] }
  0x44   :  { %705 = vmatpush.bf16.msrb.mxu0 %v4246_v26  ;;  %5710 = vst [vmem:[#allocation37_spill] sm:$0xff] %v4281_v27  ;;  %v4319_v43 = vld [vmem:[#allocation9] sm:$0x7]  ;;  %v4321_v46 = vor.u32 %v3708_v41, %v3424_v40  ;;  %v3408_v50 = vld [vmem:[#allocation11 + $0xc0] sm:$0xf] }
  0x45   :  { %692 = vmatpush.bf16.msrb.mxu3 %v4249_v30  ;;  %5712 = vst [vmem:[#allocation39_spill] sm:$0xff] %v4290_v34  ;;  %v4327_v49 = vperm.slane %v4319_v43, 0  ;;  %v3704_v51 = vld [vmem:[#allocation11 + $0xcc] sm:$0xf0]  ;;  %v3392_v53 = vld [vmem:[#allocation11 + $0xa0] sm:$0xf] }
  0x46   :  { %375 = vmatmul.bf16.vlgmr.msra.gmra.mxu1 %v4242_v20  ;;  %402 = vmatpush.bf16.msra.mxu2 %v3137_v5  ;;  %5713 = vst [vmem:[#allocation40_spill] sm:$0xff] %v4293_v35  ;;  %v4329_v52 = vor.u32 %v3704_v51, %v3408_v50  ;;  %v3700_v54 = vld [vmem:[#allocation11 + $0xac] sm:$0xf0]  ;;  %v3376_v63 = vld [vmem:[#allocation11 + $0x80] sm:$0xf] }
  0x47   :  { %775 = vmatpush.bf16.msrb.mxu1 %v4215_v7  ;;  %5714 = vst [vmem:[#allocation41_spill] sm:$0xff] %v4321_v46  ;;  %v4333_v58 = vor.u32 %v3700_v54, %v3392_v53  ;;  %v3696_v0 = vld [vmem:[#allocation11 + $0x8c] sm:$0xf0]  ;;  %v3360_v5 = vld [vmem:[#allocation11 + $0x60] sm:$0xf]  ;;  %v4363_v53 = vperm.slane %v4319_v43, 1 }
  0x48   :  { %706 = vmatpush.bf16.msrb.mxu0 %v4254_v42  ;;  %5716 = vst [vmem:[#allocation43_spill] sm:$0xff] %v4327_v49  ;;  %v4339_v3 = vor.u32 %v3696_v0, %v3376_v63  ;;  %v3552_v8 = vld [vmem:[#allocation11 + $0x1e0] sm:$0xf]  ;;  %v3740_v16 = vld [vmem:[#allocation11 + $0x1ec] sm:$0xf0] }
  0x49   :  { %693 = vmatpush.bf16.msrb.mxu3 %v4257_v45  ;;  %5717 = vst [vmem:[#allocation44_spill] sm:$0xff] %v4329_v52  ;;  %v3706_v18 = vld [vmem:[#allocation11 + $0xe4] sm:$0xf]  ;;  %v3426_v19 = vld [vmem:[#allocation11 + $0xf0] sm:$0xf0]  ;;  %v4346_v22 = vor.u32 %v3740_v16, %v3552_v8 }
  0x4a   :  { %403 = vmatpush.bf16.msra.mxu2 %v3125_v25  ;;  %5718 = vst [vmem:[#allocation45_spill] sm:$0xff] %v4333_v58  ;;  %v4348_v23 = vor.u32 %v3706_v18, %v3426_v19  ;;  %v3738_v25 = vld [vmem:[#allocation11 + $0x1e4] sm:$0xf]  ;;  %v3554_v29 = vld [vmem:[#allocation11 + $0x1f0] sm:$0xf0] }
  0x4b   :  { %776 = vmatpush.bf16.msrb.mxu1 %v4218_v11  ;;  %5720 = vst [vmem:[#allocation47_spill] sm:$0xff] %v4339_v3  ;;  %v4351_v31 = vor.u32 %v3738_v25, %v3554_v29  ;;  %v3344_v32 = vld [vmem:[#allocation11 + $0x40] sm:$0xf]  ;;  %v3688_v33 = vld [vmem:[#allocation11 + $0x4c] sm:$0xf0] }
  0x4c   :  { %707 = vmatpush.bf16.msrb.mxu0 %v4260_v55  ;;  %5723 = vst [vmem:[#allocation50_spill] sm:$0xff] %v4346_v22  ;;  %v3702_v40 = vld [vmem:[#allocation11 + $0xc4] sm:$0xf]  ;;  %v3410_v41 = vld [vmem:[#allocation11 + $0xd0] sm:$0xf0] }
  0x4d   :  { %694 = vmatpush.bf16.msrb.mxu3 %v4263_v56  ;;  %404 = vmatmul.bf16.vlgmr.msra.gmra.mxu2 %v4242_v20  ;;  %v3629_v20 = vld [vmem:[#allocation3 + $0x18] sm:$0xff]  ;;  %5724 = vst [vmem:[#allocation51_spill] sm:$0xff] %v4348_v23  ;;  %v4360_v50 = vor.u32 %v3702_v40, %v3410_v41  ;;  %v3734_v51 = vld [vmem:[#allocation11 + $0x1c4] sm:$0xf]  ;;  %v3684_v8 = vld [vmem:[#allocation11 + $0x2c] sm:$0xf0] }
  0x4e   :  { %788 = vmatpush.bf16.msrb.mxu2 %v4240_v15  ;;  %5725 = vst [vmem:[#allocation52_spill] sm:$0xff] %v4351_v31  ;;  %v3520_v16 = vld [vmem:[#allocation11 + $0x1a0] sm:$0xf]  ;;  %v3732_v25 = vld [vmem:[#allocation11 + $0x1ac] sm:$0xf0] }
  0x4f   :  { %351 = vmatmul.bf16.gmra.mxu0 %v3627_v6  ;;  %777 = vmatpush.bf16.msrb.mxu1 %v4221_v17  ;;  %5728 = vst [vmem:[#allocation55_spill] sm:$0xff] %v4360_v50  ;;  %v3698_v29 = vld [vmem:[#allocation11 + $0xa4] sm:$0xf]  ;;  %v3522_v40 = vld [vmem:[#allocation11 + $0x1b0] sm:$0xf0] }
  0x50   :  { %708 = vmatpush.bf16.msrb.mxu0 %v4266_v1  ;;  %5729 = vst [vmem:[#allocation56_spill] sm:$0xff] %v4363_v53 }
  0x51   :  { %695 = vmatpush.bf16.msrb.mxu3 %v4270_v2 }
  0x52   :  { %789 = vmatpush.bf16.msrb.mxu2 %v4249_v30 }
  0x53   :  { %778 = vmatpush.bf16.msrb.mxu1 %v4224_v24 }
  0x54   :  { %709 = vmatpush.bf16.msrb.mxu0 %v4274_v13 }
  0x55   :  { %696 = vmatpush.bf16.msrb.mxu3 %v4278_v14 }
  0x56   :  { %380 = vmatmul.bf16.gmra.mxu1 %v3627_v6  ;;  %790 = vmatpush.bf16.msrb.mxu2 %v4257_v45 }
  0x57   :  { %779 = vmatpush.bf16.msrb.mxu1 %v4227_v36 }
  0x58   :  { %710 = vmatpush.bf16.msrb.mxu0 %v4281_v27 }
  0x59   :  { %697 = vmatpush.bf16.msrb.mxu3 %v4285_v28 }
  0x5a   :  { %791 = vmatpush.bf16.msrb.mxu2 %v4263_v56 }
  0x5b   :  { %780 = vmatpush.bf16.msrb.mxu1 %v4230_v47 }
  0x5c   :  { %711 = vmatpush.bf16.msrb.mxu0 %v4290_v34 }
  0x5d   :  { %698 = vmatpush.bf16.msrb.mxu3 %v4293_v35  ;;  %409 = vmatmul.bf16.gmra.mxu2 %v3627_v6  ;;  %v3692_v6 = vld [vmem:[#allocation11 + $0x6c] sm:$0xf0] }
  0x5e   :  { %792 = vmatpush.bf16.msrb.mxu2 %v4270_v2  ;;  %v4342_v12 = vor.u32 %v3692_v6, %v3360_v5  ;;  %v3328_v6 = vld [vmem:[#allocation11 + $0x20] sm:$0xf] }
  0x5f   :  { %356 = vmatmul.bf16.gmra.mxu0 %v3628_v37  ;;  %781 = vmatpush.bf16.msrb.mxu1 %v4233_v60  ;;  %v4378_v19 = vor.u32 %v3684_v8, %v3328_v6  ;;  %v3694_v6 = vld [vmem:[#allocation11 + $0x84] sm:$0xf]  ;;  %v3378_v8 = vld [vmem:[#allocation11 + $0x90] sm:$0xf0] }
  0x60   :  { %699 = vmatmul.bf16.vlgmr.msrb.gmra.mxu3 %v4124_v39  ;;  %1192 = vmatpush.bf16.msra.mxu0 %v4321_v46  ;;  %5721 = vst [vmem:[#allocation48_spill] sm:$0xff] %v4342_v12 }
  0x61   :  { %801 = vmatpush.bf16.msra.mxu3 %v4238_v10  ;;  %5732 = vst [vmem:[#allocation59_spill] sm:$0xff] %v4378_v19 }
  0x62   :  { %793 = vmatpush.bf16.msrb.mxu2 %v4278_v14 }
  0x63   :  { %782 = vmatpush.bf16.msrb.mxu1 %v4236_v9 }
  0x64   :  { %1193 = vmatpush.bf16.msra.mxu0 %v4329_v52 }
  0x65   :  { %802 = vmatpush.bf16.msra.mxu3 %v4246_v26 }
  0x66   :  { %385 = vmatmul.bf16.gmra.mxu1 %v3628_v37  ;;  %794 = vmatpush.bf16.msrb.mxu2 %v4285_v28 }
  0x67   :  { %1205 = vmatpush.bf16.msra.mxu1 %v4346_v22 }
  0x68   :  { %1194 = vmatpush.bf16.msra.mxu0 %v4333_v58 }
  0x69   :  { %803 = vmatpush.bf16.msra.mxu3 %v4254_v42 }
  0x6a   :  { %795 = vmatpush.bf16.msrb.mxu2 %v4293_v35 }
  0x6c   :  { %1195 = vmatpush.bf16.msra.mxu0 %v4339_v3 }
  0x6d   :  { %804 = vmatpush.bf16.msra.mxu3 %v4260_v55  ;;  %414 = vmatmul.bf16.gmra.mxu2 %v3628_v37  ;;  %v3536_v37 = vld [vmem:[#allocation11 + $0x1c0] sm:$0xf] }
  0x6e   :  { %1218 = vmatpush.bf16.msra.mxu2 %v4348_v23 }
  0x6f   :  { %361 = vmatmul.bf16.gmra.mxu0 %v3629_v20 }
  0x70   :  { %1196 = vmatpush.bf16.msra.mxu0 %v4342_v12 }
  0x71   :  { %805 = vmatpush.bf16.msra.mxu3 %v4266_v1 }
  0x72   :  { %1219 = vmatpush.bf16.msra.mxu2 %v4360_v50 }
  0x75   :  { %806 = vmatpush.bf16.msra.mxu3 %v4274_v13 }
  0x76   :  { %390 = vmatmul.bf16.gmra.mxu1 %v3629_v20 }
  0x79   :  { %807 = vmatpush.bf16.msra.mxu3 %v4281_v27 }
  0x7d   :  { %808 = vmatpush.bf16.msra.mxu3 %v4290_v34  ;;  %419 = vmatmul.bf16.gmra.mxu2 %v3629_v20  ;;  %v4356_v20 = vor.u32 %v3688_v33, %v3344_v32  ;;  %v3394_v32 = vld [vmem:[#allocation11 + $0xb0] sm:$0xf0]  ;;  %v4380_v33 = vor.u32 %v3732_v25, %v3520_v16  ;;  %v3726_v25 = vld [vmem:[#allocation11 + $0x184] sm:$0xf] }
  0x7f   :  { %712 = vmatmul.bf16.vlgmr.msrb.gmra.mxu0 %v4124_v39  ;;  %5726 = vst [vmem:[#allocation53_spill] sm:$0xff] %v4356_v20 }
  0x80   :  { %1197 = vmatpush.bf16.msra.mxu0 %v4356_v20  ;;  %5733 = vst [vmem:[#allocation60_spill] sm:$0xff] %v4380_v33 }
  0x81   :  { %1231 = vmatpush.bf16.msrb.mxu3 %v4351_v31 }
  0x84   :  { %1198 = vmatpush.bf16.msra.mxu0 %v4378_v19 }
  0xbc   :  { %v347_v38 = vpop.f32.mrf.mxu0 }
  0xbd   :  { %v348_v39 = vadd.f32 %v347_v38, %v4327_v49  ;;  %v3736_v38 = vld [vmem:[#allocation11 + $0x1cc] sm:$0xf0] }
  0xc3   :  { %v687_v44 = vpop.f32.mrf.mxu3 }
  0xc4   :  { %v4323_v48 = vpop.f32.mrf.mxu0  ;;  %v717_v59 = vadd.f32 %v687_v44, %v348_v39  ;;  %v4358_v44 = vor.u32 %v3736_v38, %v3536_v37  ;;  %v3538_v39 = vld [vmem:[#allocation11 + $0x1d0] sm:$0xf0]  ;;  %v4382_v37 = vor.u32 %v3698_v29, %v3394_v32  ;;  %v3730_v38 = vld [vmem:[#allocation11 + $0x1a4] sm:$0xf]  ;;  %v3432_v32 = vld [vmem:[#allocation11 + $0xe8] sm:$0xf] }
  0xc5   :  { %5715 = vst [vmem:[#allocation42_spill] sm:$0xff] %v4323_v48  ;;  %v4366_v54 = vor.u32 %v3734_v51, %v3538_v39  ;;  %v4385_v51 = vor.u32 %v3730_v38, %v3522_v40  ;;  %v3506_v29 = vld [vmem:[#allocation11 + $0x190] sm:$0xf0] }
  0xc6   :  { %v3306_v4 = vmul.f32 -1.442695, %v717_v59  ;;  %5727 = vst [vmem:[#allocation54_spill] sm:$0xff] %v4358_v44  ;;  %v376_v59 = vpop.f32.mrf.mxu1  ;;  %1206 = vmatpush.bf16.msra.mxu1 %v4358_v44  ;;  %1220 = vmatpush.bf16.msra.mxu2 %v4382_v37  ;;  %v4401_v40 = vor.u32 %v3726_v25, %v3506_v29 }
  0xc7   :  { %5730 = vst [vmem:[#allocation57_spill] sm:$0xff] %v4366_v54  ;;  %1232 = vmatpush.bf16.msrb.mxu3 %v4366_v54 }
  0xc8   :  { %3770 = vpow2.f32 %v3306_v4  ;;  %v377_v4 = vadd.f32 %v376_v59, %v4363_v53  ;;  %5734 = vst [vmem:[#allocation61_spill] sm:$0xff] %v4382_v37  ;;  %v3680_v59 = vld [vmem:[#allocation11 + $0xc] sm:$0xf0] }
  0xc9   :  { %5735 = vst [vmem:[#allocation62_spill] sm:$0xff] %v4385_v51 }
  0xca   :  { %1207 = vmatpush.bf16.msra.mxu1 %v4380_v33  ;;  %5740 = vst [vmem:[#allocation67_spill] sm:$0xff] %v4401_v40 }
  0xcb   :  { %v689_v57 = vpop.f32.mrf.mxu3  ;;  %1233 = vmatpush.bf16.msrb.mxu3 %v4385_v51  ;;  %v3400_v51 = vld [vmem:[#allocation11 + $0xa8] sm:$0xf] }
  0xcc   :  { %v352_v61 = vpop.f32.mrf.mxu0 }
  0xcd   :  { %v4336_v62 = vadd.f32 %v352_v61, %v4327_v49 }
  0xce   :  { %v3771_v57 = vpop.eup %3770 }
  0xcf   :  { %5719 = vst [vmem:[#allocation46_spill] sm:$0xff] %v4336_v62  ;;  %v4371_v63 = vadd.f32 1.0, %v3771_v57  ;;  %v3312_v57 = vld [vmem:[#allocation11] sm:$0xf]  ;;  %1234 = vmatpush.bf16.msrb.mxu3 %v4401_v40  ;;  %v3720_v40 = vld [vmem:[#allocation11 + $0x14c] sm:$0xf0] }
  0xd1   :  { %3772 = vrcp.f32 %v4371_v63  ;;  %vm727_vm1 = vweird.f32 %v4371_v63 }
  0xd4   :  { %v4344_v21 = vpop.f32.mrf.mxu0 }
  0xd5   :  { %5722 = vst [vmem:[#allocation49_spill] sm:$0xff] %v4344_v21  ;;  %v3490_v21 = vld [vmem:[#allocation11 + $0x170] sm:$0xf0] }
  0xd7   :  { %v4398_v38 = vpop.eup %3772 }
  0xd8   :  { %v723_v25 = vmul.f32 %v4398_v38, %v4371_v63  ;;  %vm728_vm0 = vweird.f32 %v4398_v38 }
  0xd9   :  { %vm4477_vm2 = vmor %vm727_vm1, %vm728_vm0 }
  0xdc   :  { %v357_v61 = vpop.f32.mrf.mxu0 }
  0xdd   :  { %v4374_v0 = vadd.f32 %v357_v61, %v4327_v49  ;;  %v3504_v61 = vld [vmem:[#allocation11 + $0x180] sm:$0xf] }
  0xdf   :  { %5731 = vst [vmem:[#allocation58_spill] sm:$0xff] %v4374_v0  ;;  %v3722_v0 = vld [vmem:[#allocation11 + $0x164] sm:$0xf] }
  0xe0   :  { %v4415_v29 = vor.u32 %v3722_v0, %v3490_v21  ;;  %v3686_v0 = vld [vmem:[#allocation11 + $0x44] sm:$0xf] }
  0xe2   :  { %5744 = vst [vmem:[#allocation71_spill] sm:$0xff] %v4415_v29  ;;  %1235 = vmatpush.bf16.msrb.mxu3 %v4415_v29  ;;  %v3330_v29 = vld [vmem:[#allocation11 + $0x30] sm:$0xf0] }
  0xe3   :  { %v700_v5 = vpop.f32.mrf.mxu3 }
  0xe4   :  { %v737_v18 = vadd.f32 %v700_v5, %v377_v4  ;;  %v4387_v39 = vpop.f32.mrf.mxu0  ;;  %v4392_v4 = vor.u32 %v3680_v59, %v3312_v57  ;;  %v3728_v5 = vld [vmem:[#allocation11 + $0x18c] sm:$0xf0]  ;;  %v3488_v59 = vld [vmem:[#allocation11 + $0x160] sm:$0xf] }
  0xe5   :  { %5736 = vst [vmem:[#allocation63_spill] sm:$0xff] %v4387_v39  ;;  %v4394_v16 = vor.u32 %v3728_v5, %v3504_v61  ;;  %v3724_v61 = vld [vmem:[#allocation11 + $0x16c] sm:$0xf0]  ;;  %v3690_v5 = vld [vmem:[#allocation11 + $0x64] sm:$0xf] }
  0xe6   :  { %v3307_v41 = vmul.f32 -1.442695, %v737_v18  ;;  %5737 = vst [vmem:[#allocation64_spill] sm:$0xff] %v4392_v4  ;;  %v4396_v18 = vor.u32 %v3694_v6, %v3378_v8  ;;  %1199 = vmatpush.bf16.msra.mxu0 %v4392_v4  ;;  %v4408_v6 = vor.u32 %v3724_v61, %v3488_v59  ;;  %v3362_v8 = vld [vmem:[#allocation11 + $0x70] sm:$0xf0] }
  0xe7   :  { %5738 = vst [vmem:[#allocation65_spill] sm:$0xff] %v4394_v16  ;;  %1208 = vmatpush.bf16.msra.mxu1 %v4394_v16  ;;  %v3472_v61 = vld [vmem:[#allocation11 + $0x140] sm:$0xf] }
  0xe8   :  { %3774 = vpow2.f32 %v3307_v41  ;;  %5739 = vst [vmem:[#allocation66_spill] sm:$0xff] %v4396_v18  ;;  %v3709_v41 = vld [vmem:[#allocation11 + $0xf4] sm:$0xf0]  ;;  %1221 = vmatpush.bf16.msra.mxu2 %v4396_v18  ;;  %v4427_v21 = vor.u32 %v3720_v40, %v3472_v61  ;;  %v3716_v61 = vld [vmem:[#allocation11 + $0x12c] sm:$0xf0] }
  0xe9   :  { %v4405_v57 = vor.u32 %v3709_v41, %v3432_v32  ;;  %5742 = vst [vmem:[#allocation69_spill] sm:$0xff] %v4408_v6  ;;  %v3416_v32 = vld [vmem:[#allocation11 + $0xc8] sm:$0xf]  ;;  %v3705_v41 = vld [vmem:[#allocation11 + $0xd4] sm:$0xf0] }
  0xea   :  { %v4417_v53 = vor.u32 %v3705_v41, %v3416_v32  ;;  %5747 = vst [vmem:[#allocation74_spill] sm:$0xff] %v4427_v21  ;;  %v3474_v32 = vld [vmem:[#allocation11 + $0x150] sm:$0xf0] }
  0xeb   :  { %v702_v39 = vpop.f32.mrf.mxu3  ;;  %5741 = vst [vmem:[#allocation68_spill] sm:$0xff] %v4405_v57  ;;  %1244 = vmatpush.bf16.msrb.mxu0 %v4405_v57  ;;  %1209 = vmatpush.bf16.msra.mxu1 %v4408_v6  ;;  %v733_v57 = vand.u32 2147483648, %v4371_v63 }
  0xec   :  { %v4413_v39 = vor.u32 %v3690_v5, %v3362_v8  ;;  %5745 = vst [vmem:[#allocation72_spill] sm:$0xff] %v4417_v53  ;;  %v362_v59 = vpop.f32.mrf.mxu0  ;;  %v3346_v5 = vld [vmem:[#allocation11 + $0x50] sm:$0xf0]  ;;  %v3718_v8 = vld [vmem:[#allocation11 + $0x144] sm:$0xf] }
  0xed   :  { %v4424_v18 = vadd.f32 %v362_v59, %v4327_v49  ;;  %v4431_v41 = vor.u32 %v3686_v0, %v3346_v5  ;;  %v3701_v59 = vld [vmem:[#allocation11 + $0xb4] sm:$0xf0]  ;;  %v3682_v49 = vld [vmem:[#allocation11 + $0x24] sm:$0xf]  ;;  %v3458_v5 = vld [vmem:[#allocation11 + $0x130] sm:$0xf0] }
  0xee   :  { %5743 = vst [vmem:[#allocation70_spill] sm:$0xff] %v4413_v39  ;;  %v3775_v62 = vpop.eup %3774  ;;  %1222 = vmatpush.bf16.msra.mxu2 %v4413_v39  ;;  %v4433_v39 = vor.u32 %v3718_v8, %v3474_v32  ;;  %v4436_v40 = vor.u32 %v3701_v59, %v3400_v51  ;;  %v3714_v0 = vld [vmem:[#allocation11 + $0x124] sm:$0xf]  ;;  %v4444_v32 = vor.u32 %v3682_v49, %v3330_v29  ;;  %v3384_v51 = vld [vmem:[#allocation11 + $0x88] sm:$0xf] }
  0xef   :  { %v4419_v48 = vadd.f32 1.0, %v3775_v62  ;;  %5746 = vst [vmem:[#allocation73_spill] sm:$0xff] %v4424_v18  ;;  %v724_v62 = vsub.f32 1.0, %v723_v25  ;;  %1245 = vmatpush.bf16.msrb.mxu0 %v4417_v53  ;;  %v3456_v18 = vld [vmem:[#allocation11 + $0x120] sm:$0xf]  ;;  %1210 = vmatpush.bf16.msra.mxu1 %v4427_v21  ;;  %v4446_v37 = vor.u32 %v3714_v0, %v3458_v5 }
  0xf0   :  { %5748 = vst [vmem:[#allocation75_spill] sm:$0xff] %v4431_v41  ;;  %1236 = vmatpush.bf16.msrb.mxu3 %v4433_v39  ;;  %v4440_v25 = vor.u32 %v3716_v61, %v3456_v18  ;;  %v3697_v59 = vld [vmem:[#allocation11 + $0x94] sm:$0xf0]  ;;  %v3440_v53 = vld [vmem:[#allocation11 + $0x100] sm:$0xf] }
  0xf1   :  { %3776 = vrcp.f32 %v4419_v48  ;;  %5749 = vst [vmem:[#allocation76_spill] sm:$0xff] %v4433_v39  ;;  %v725_v8 = vmul.f32 %v4398_v38, %v724_v62  ;;  %v4448_v54 = vor.u32 %v3697_v59, %v3384_v51  ;;  %v3678_v39 = vld [vmem:[#allocation11 + $0x4] sm:$0xf]  ;;  %v3314_v18 = vld [vmem:[#allocation11 + $0x10] sm:$0xf0]  ;;  %vm747_vm4 = vweird.f32 %v4419_v48 }
  0xf2   :  { %5750 = vst [vmem:[#allocation77_spill] sm:$0xff] %v4436_v40  ;;  %1223 = vmatpush.bf16.msra.mxu2 %v4431_v41  ;;  %v3712_v41 = vld [vmem:[#allocation11 + $0x10c] sm:$0xf0]  ;;  %v3710_v49 = vld [vmem:[#allocation11 + $0x104] sm:$0xf]  ;;  %v4461_v51 = vor.u32 %v3678_v39, %v3314_v18 }
  0xf3   :  { %5751 = vst [vmem:[#allocation78_spill] sm:$0xff] %v4440_v25  ;;  %1246 = vmatpush.bf16.msrb.mxu0 %v4436_v40  ;;  %1211 = vmatpush.bf16.msra.mxu1 %v4440_v25  ;;  %v4455_v62 = vor.u32 %v3712_v41, %v3440_v53  ;;  %v3442_v29 = vld [vmem:[#allocation11 + $0x110] sm:$0xf0]  ;;  %v3368_v0 = vld [vmem:[#allocation11 + $0x68] sm:$0xf] }
  0xf4   :  { %5752 = vst [vmem:[#allocation79_spill] sm:$0xff] %v4444_v32  ;;  %v4452_v50 = vpop.f32.mrf.mxu0  ;;  %1237 = vmatpush.bf16.msrb.mxu3 %v4446_v37  ;;  %v4463_v59 = vor.u32 %v3710_v49, %v3442_v29  ;;  %v3693_v40 = vld [vmem:[#allocation11 + $0x74] sm:$0xf0]  ;;  %v3352_v39 = vld [vmem:[#allocation11 + $0x48] sm:$0xf]  ;;  %v4475_v49 = vperm.slane %v4319_v43, 2 }
  0xf5   :  { %5753 = vst [vmem:[#allocation80_spill] sm:$0xff] %v4446_v37  ;;  %v4468_v53 = vor.u32 %v3693_v40, %v3368_v0  ;;  %v731_v37 = vand.u32 2147483647, %v4371_v63  ;;  %v3689_v18 = vld [vmem:[#allocation11 + $0x54] sm:$0xf0]  ;;  %v734_v0 = vor.u32 1.1754944e-38, %v733_v57 }
  0xf6   :  { %5754 = vst [vmem:[#allocation81_spill] sm:$0xff] %v4448_v54  ;;  %1224 = vmatpush.bf16.msra.mxu2 %v4444_v32  ;;  %v4484_v40 = vld [vmem:[%s5525_s4] ss:$0 sm:$0xff]  ;;  %v4493_v29 = vor.u32 %v3689_v18, %v3352_v39  ;;  %v3685_v32 = vld [vmem:[#allocation11 + $0x34] sm:$0xf0] }
  0xf7   :  { %v4450_v61 = vpop.eup %3776  ;;  %5755 = vst [vmem:[#allocation82_spill] sm:$0xff] %v4452_v50  ;;  %v726_v50 = vadd.f32 %v4398_v38, %v725_v8  ;;  %1247 = vmatpush.bf16.msrb.mxu0 %v4448_v54  ;;  %1212 = vmatpush.bf16.msra.mxu1 %v4455_v62  ;;  %v405_v54 = vpop.f32.mrf.mxu2  ;;  %vm732_vm3 = vcmp.eq.f32.partialorder %v731_v37, 8.507059e+37  ;;  %v3320_v39 = vld [vmem:[#allocation11 + $0x8] sm:$0xf]  ;;  %v3681_v37 = vld [vmem:[#allocation11 + $0x14] sm:$0xf0] }
  0xf8   :  { %5756 = vst [vmem:[#allocation83_spill] sm:$0xff] %v4455_v62  ;;  %v743_v5 = vmul.f32 %v4450_v61, %v4419_v48  ;;  %1238 = vmatpush.bf16.msrb.mxu3 %v4463_v59  ;;  %vm748_vm5 = vweird.f32 %v4450_v61  ;;  %v4507_v8 = vor.u32 %v3681_v37, %v3320_v39  ;;  %v3562_v39 = vld [vmem:[#allocation11 + $0x1f8] sm:$0xf0] }
  0xf9   :  { %5757 = vst [vmem:[#allocation84_spill] sm:$0xff] %v4461_v51  ;;  %v730_v43 = vsel %vm4477_vm2, %v4398_v38, %v726_v50  ;;  %v753_v38 = vand.u32 2147483648, %v4419_v48  ;;  %vm749_vm6 = vmor %vm747_vm4, %vm748_vm5 }
  0xfa   :  { %5758 = vst [vmem:[#allocation85_spill] sm:$0xff] %v4463_v59  ;;  %v744_v41 = vsub.f32 1.0, %v743_v5  ;;  %1225 = vmatpush.bf16.msra.mxu2 %v4461_v51  ;;  %v3336_v5 = vld [vmem:[#allocation11 + $0x28] sm:$0xf]  ;;  %v406_v51 = vadd.f32 %v405_v54, %v4475_v49  ;;  %v735_v4 = vsel %vm732_vm3, %v734_v0, %v730_v43  ;;  %v751_v54 = vand.u32 2147483647, %v4419_v48 }
  0xfb   :  { %5759 = vst [vmem:[#allocation86_spill] sm:$0xff] %v4468_v53  ;;  %1248 = vmatpush.bf16.msrb.mxu0 %v4468_v53  ;;  %v4501_v50 = vor.u32 %v3685_v32, %v3336_v5  ;;  %v3560_v48 = vld [vmem:[#allocation11 + $0x1e8] sm:$0xf] }
  0xfc   :  { %5760 = vst [vmem:[#allocation87_spill] sm:$0xff] %v4475_v49  ;;  %v745_v63 = vmul.f32 %v4450_v61, %v744_v41  ;;  %v713_v62 = vpop.f32.mrf.mxu0  ;;  %vm752_vm7 = vcmp.eq.f32.partialorder %v751_v54, 8.507059e+37  ;;  %v3741_v49 = vld [vmem:[#allocation11 + $0x1f4] sm:$0xf0] }
  0xfd   :  { %5763 = vst [vmem:[#allocation88_spill] sm:$0xff] %v4493_v29  ;;  %v760_v59 = vadd.f32 %v4484_v40, %v713_v62  ;;  %v4516_v37 = vor.u32 %v3741_v49, %v3560_v48 }
  0xfe   :  { %v746_v41 = vadd.f32 %v4450_v61, %v745_v63  ;;  %5764 = vst [vmem:[#allocation89_spill] sm:$0xff] %v4501_v50  ;;  %v754_v63 = vor.u32 1.1754944e-38, %v753_v38 }
  0xff   :  { %1249 = vmatpush.bf16.msrb.mxu0 %v4493_v29  ;;  %v761_v57 = vmul.f32 %v760_v59, %v735_v4  ;;  %5765 = vst [vmem:[#allocation90_spill] sm:$0xff] %v4507_v8 }
 0x100   :  { %v750_v62 = vsel %vm749_vm6, %v4450_v61, %v746_v41  ;;  %v3739_v41 = vld [vmem:[#allocation11 + $0x1ec] sm:$0xf] }
 0x101   :  { %v762_v18 = vadd.f32 %v761_v57, %v406_v51  ;;  %v755_v43 = vsel %vm752_vm7, %v754_v63, %v750_v62  ;;  %v3707_v51 = vld [vmem:[#allocation11 + $0xec] sm:$0xf]  ;;  %v3434_v57 = vld [vmem:[#allocation11 + $0xf8] sm:$0xf0]  ;;  %v4520_v62 = vor.u32 %v3739_v41, %v3562_v39  ;;  %v3737_v63 = vld [vmem:[#allocation11 + $0x1d4] sm:$0xf0] }
 0x102   :  { %v764_v4 = vsub.f32 1.0, %v755_v43  ;;  %v766_v5 = vmul.f32 0.0, %v755_v43  ;;  %v4518_v54 = vor.u32 %v3707_v51, %v3434_v57  ;;  %v3418_v43 = vld [vmem:[#allocation11 + $0xd8] sm:$0xf0]  ;;  %v3733_v51 = vld [vmem:[#allocation11 + $0x1b4] sm:$0xf0] }
 0x103   :  { %1250 = vmatpush.bf16.msrb.mxu0 %v4501_v50  ;;  %3778 = vtanh.f32 %v762_v18  ;;  %v3544_v18 = vld [vmem:[#allocation11 + $0x1c8] sm:$0xf]  ;;  %5768 = vst [vmem:[#allocation93_spill] sm:$0xff] %v4520_v62  ;;  %v3699_v57 = vld [vmem:[#allocation11 + $0xac] sm:$0xf] }
 0x104   :  { %v715_v32 = vpop.f32.mrf.mxu0  ;;  %5767 = vst [vmem:[#allocation92_spill] sm:$0xff] %v4518_v54  ;;  %v4528_v49 = vor.u32 %v3737_v63, %v3544_v18  ;;  %v3402_v41 = vld [vmem:[#allocation11 + $0xb8] sm:$0xf0]  ;;  %v3731_v39 = vld [vmem:[#allocation11 + $0x1ac] sm:$0xf] }
 0x105   :  { %v3703_v32 = vld [vmem:[#allocation11 + $0xcc] sm:$0xf]  ;;  %v4540_v63 = vor.u32 %v3699_v57, %v3402_v41  ;;  %v3496_v57 = vld [vmem:[#allocation11 + $0x168] sm:$0xf]  ;;  %v3725_v41 = vld [vmem:[#allocation11 + $0x174] sm:$0xf0] }
 0x107   :  { %1251 = vmatpush.bf16.msrb.mxu0 %v4507_v8  ;;  %5771 = vst [vmem:[#allocation96_spill] sm:$0xff] %v4540_v63 }
 0x109   :  { %v3779_v59 = vpop.eup %3778 }
 0x10a   :  { %v765_v0 = vmul.f32 %v3779_v59, %v764_v4  ;;  %v3735_v4 = vld [vmem:[#allocation11 + $0x1cc] sm:$0xf]  ;;  %v3546_v59 = vld [vmem:[#allocation11 + $0x1d8] sm:$0xf0] }
 0x10b   :  { %v4533_v48 = vor.u32 %v3735_v4, %v3546_v59  ;;  %v3729_v4 = vld [vmem:[#allocation11 + $0x194] sm:$0xf0]  ;;  %v3695_v59 = vld [vmem:[#allocation11 + $0x8c] sm:$0xf] }
 0x10c   :  { %v4510_v61 = vadd.f32 %v766_v5, %v765_v0  ;;  %v4530_v0 = vor.u32 %v3703_v32, %v3418_v43  ;;  %v3528_v5 = vld [vmem:[#allocation11 + $0x1a8] sm:$0xf] }
 0x10d   :  { %5770 = vst [vmem:[#allocation95_spill] sm:$0xff] %v4533_v48  ;;  %v4538_v18 = vor.u32 %v3733_v51, %v3528_v5  ;;  %v3512_v32 = vld [vmem:[#allocation11 + $0x188] sm:$0xf] }
 0x10e   :  { %5766 = vst [vmem:[#allocation91_spill] sm:$0xff] %v4510_v61  ;;  %v4514_v38 = vpack.c.bf16 %v4510_v61, %v4510_v61  ;;  %v3530_v61 = vld [vmem:[#allocation11 + $0x1b8] sm:$0xf0]  ;;  %v4548_v5 = vor.u32 %v3729_v4, %v3512_v32  ;;  %v4558_v32 = vor.u32 %v3725_v41, %v3496_v57  ;;  %v3480_v4 = vld [vmem:[#allocation11 + $0x148] sm:$0xf] }
 0x10f   :  { %5769 = vst [vmem:[#allocation94_spill] sm:$0xff] %v4530_v0  ;;  %v4543_v43 = vor.u32 %v3731_v39, %v3530_v61  ;;  %v3691_v39 = vld [vmem:[#allocation11 + $0x6c] sm:$0xf]  ;;  %v3717_v41 = vld [vmem:[#allocation11 + $0x134] sm:$0xf0] }
 0x110   :  { %783 = vmatmul.bf16.vlgmr.msrb.gmra.mxu1 %v4514_v38  ;;  %796 = vmatmul.bf16.vlgmr.msrb.gmra.mxu2 %v4514_v38  ;;  %5773 = vst [vmem:[#allocation98_spill] sm:$0xff] %v4548_v5 }
 0x111   :  { %809 = vmatmul.bf16.vlgmr.msra.gmra.mxu3 %v4514_v38  ;;  %1200 = vmatmul.bf16.vlgmr.msra.gmra.mxu0 %v4514_v38  ;;  %5772 = vst [vmem:[#allocation97_spill] sm:$0xff] %v4543_v43 }
 0x112   :  { %1257 = vmatpush.bf16.msrb.mxu1 %v4516_v37  ;;  %1270 = vmatpush.bf16.msrb.mxu2 %v4518_v54  ;;  %v3514_v54 = vld [vmem:[#allocation11 + $0x198] sm:$0xf0] }
 0x113   :  { %1283 = vmatpush.bf16.msra.mxu3 %v4520_v62  ;;  %1348 = vmatpush.bf16.msra.mxu0 %v4215_v7  ;;  %v3386_v62 = vld [vmem:[#allocation11 + $0x98] sm:$0xf0]  ;;  %v3727_v7 = vld [vmem:[#allocation11 + $0x18c] sm:$0xf] }
 0x114   :  { %v4550_v51 = vor.u32 %v3695_v59, %v3386_v62  ;;  %v4553_v61 = vor.u32 %v3727_v7, %v3514_v54  ;;  %v3721_v54 = vld [vmem:[#allocation11 + $0x154] sm:$0xf0]  ;;  %v3687_v59 = vld [vmem:[#allocation11 + $0x4c] sm:$0xf] }
 0x116   :  { %1258 = vmatpush.bf16.msrb.mxu1 %v4528_v49  ;;  %1271 = vmatpush.bf16.msrb.mxu2 %v4530_v0  ;;  %5774 = vst [vmem:[#allocation99_spill] sm:$0xff] %v4550_v51  ;;  %v3498_v0 = vld [vmem:[#allocation11 + $0x178] sm:$0xf0] }
 0x117   :  { %1284 = vmatpush.bf16.msra.mxu3 %v4533_v48  ;;  %1349 = vmatpush.bf16.msra.mxu0 %v4218_v11  ;;  %5775 = vst [vmem:[#allocation100_spill] sm:$0xff] %v4553_v61  ;;  %v3370_v48 = vld [vmem:[#allocation11 + $0x78] sm:$0xf0]  ;;  %v3723_v11 = vld [vmem:[#allocation11 + $0x16c] sm:$0xf] }
 0x118   :  { %v4560_v62 = vor.u32 %v3691_v39, %v3370_v48  ;;  %v4563_v7 = vor.u32 %v3723_v11, %v3498_v0  ;;  %v4570_v11 = vor.u32 %v3721_v54, %v3480_v4  ;;  %v3464_v48 = vld [vmem:[#allocation11 + $0x128] sm:$0xf]  ;;  %v3683_v39 = vld [vmem:[#allocation11 + $0x2c] sm:$0xf] }
 0x119   :  { %v4580_v4 = vor.u32 %v3717_v41, %v3464_v48  ;;  %v3448_v54 = vld [vmem:[#allocation11 + $0x108] sm:$0xf] }
 0x11a   :  { %1259 = vmatpush.bf16.msrb.mxu1 %v4538_v18  ;;  %1272 = vmatpush.bf16.msrb.mxu2 %v4540_v63  ;;  %5776 = vst [vmem:[#allocation101_spill] sm:$0xff] %v4560_v62  ;;  %v3466_v63 = vld [vmem:[#allocation11 + $0x138] sm:$0xf0] }
 0x11b   :  { %1285 = vmatpush.bf16.msra.mxu3 %v4543_v43  ;;  %1350 = vmatpush.bf16.msra.mxu0 %v4221_v17  ;;  %5777 = vst [vmem:[#allocation102_spill] sm:$0xff] %v4563_v7  ;;  %v3354_v43 = vld [vmem:[#allocation11 + $0x58] sm:$0xf0]  ;;  %v4125_v17 = vmov 0.0|0.0  }
 0x11c   :  { %v4572_v0 = vor.u32 %v3687_v59, %v3354_v43  ;;  %v3679_v59 = vld [vmem:[#allocation11 + $0xc] sm:$0xf] }
 0x11e   :  { %1260 = vmatpush.bf16.msrb.mxu1 %v4548_v5  ;;  %1273 = vmatpush.bf16.msrb.mxu2 %v4550_v51  ;;  %v3719_v5 = vld [vmem:[#allocation11 + $0x14c] sm:$0xf]  ;;  %v3482_v51 = vld [vmem:[#allocation11 + $0x158] sm:$0xf0] }
 0x11f   :  { %1286 = vmatpush.bf16.msra.mxu3 %v4553_v61  ;;  %1351 = vmatpush.bf16.msra.mxu0 %v4224_v24  ;;  %v4575_v57 = vor.u32 %v3719_v5, %v3482_v51  ;;  %v3338_v24 = vld [vmem:[#allocation11 + $0x38] sm:$0xf0]  ;;  %v3715_v61 = vld [vmem:[#allocation11 + $0x12c] sm:$0xf]  ;;  %v3713_v51 = vld [vmem:[#allocation11 + $0x114] sm:$0xf0] }
 0x120   :  { %1213 = vmatmul.bf16.vlgmr.msra.gmra.mxu1 %v4125_v17  ;;  %1226 = vmatmul.bf16.vlgmr.msra.gmra.mxu2 %v4514_v38  ;;  %v4582_v43 = vor.u32 %v3683_v39, %v3338_v24  ;;  %v4585_v5 = vor.u32 %v3715_v61, %v3466_v63  ;;  %v4590_v48 = vor.u32 %v3713_v51, %v3448_v54  ;;  %v5780_v63 = vld [vmem:[#allocation83_spill] sm:$0xff]  ;;  %v5783_v39 = vld [vmem:[#allocation72_spill] sm:$0xff]  ;;  %v5785_v51 = vld [vmem:[#allocation61_spill] sm:$0xff] }
 0x121   :  { %1239 = vmatmul.bf16.vlgmr.msrb.gmra.mxu3 %v4125_v17  ;;  %1252 = vmatmul.bf16.vlgmr.msrb.gmra.mxu0 %v4514_v38  ;;  %v5781_v61 = vld [vmem:[#allocation55_spill] sm:$0xff] }
 0x122   :  { %1261 = vmatpush.bf16.msrb.mxu1 %v4558_v32  ;;  %1274 = vmatpush.bf16.msrb.mxu2 %v4560_v62  ;;  %v3450_v62 = vld [vmem:[#allocation11 + $0x118] sm:$0xf0] }
 0x123   :  { %1287 = vmatpush.bf16.msra.mxu3 %v4563_v7  ;;  %1352 = vmatpush.bf16.msra.mxu0 %v4227_v36  ;;  %v3322_v7 = vld [vmem:[#allocation11 + $0x18] sm:$0xf0]  ;;  %v3711_v36 = vld [vmem:[#allocation11 + $0x10c] sm:$0xf] }
 0x124   :  { %v4592_v24 = vor.u32 %v3679_v59, %v3322_v7  ;;  %v4595_v41 = vor.u32 %v3711_v36, %v3450_v62  ;;  %v5778_v36 = vld [vmem:[#allocation64_spill] sm:$0xff]  ;;  %v4639_v62 = vpop.f32.mrf.mxu2  ;;  %v5782_v7 = vld [vmem:[#allocation57_spill] sm:$0xff]  ;;  %v5786_v59 = vld [vmem:[#allocation62_spill] sm:$0xff] }
 0x126   :  { %1262 = vmatpush.bf16.msrb.mxu1 %v4570_v11  ;;  %1275 = vmatpush.bf16.msrb.mxu2 %v4572_v0 }
 0x127   :  { %1288 = vmatpush.bf16.msra.mxu3 %v4575_v57  ;;  %1353 = vmatpush.bf16.msra.mxu0 %v4230_v47 }
 0x12a   :  { %1263 = vmatpush.bf16.msrb.mxu1 %v4580_v4  ;;  %1276 = vmatpush.bf16.msrb.mxu2 %v4582_v43 }
 0x12b   :  { %1289 = vmatpush.bf16.msra.mxu3 %v4585_v5  ;;  %1354 = vmatpush.bf16.msra.mxu0 %v4233_v60 }
 0x12e   :  { %1264 = vmatpush.bf16.msrb.mxu1 %v4590_v48  ;;  %1277 = vmatpush.bf16.msrb.mxu2 %v4592_v24 }
 0x12f   :  { %1290 = vmatpush.bf16.msra.mxu3 %v4595_v41  ;;  %1355 = vmatpush.bf16.msra.mxu0 %v4236_v9 }
 0x131   :  { %1265 = vmatmul.bf16.vlgmr.msrb.gmra.mxu1 %v4125_v17  ;;  %1278 = vmatmul.bf16.vlgmr.msrb.gmra.mxu2 %v4514_v38  ;;  %v5779_v38 = vld [vmem:[#allocation68_spill] sm:$0xff] }
 0x132   :  { %1361 = vmatpush.bf16.msra.mxu1 %v4240_v15  ;;  %1374 = vmatpush.bf16.msra.mxu2 %v4238_v10 }
 0x133   :  { %1436 = vmatpush.bf16.msrb.mxu3 %v4321_v46  ;;  %1449 = vmatpush.bf16.msrb.mxu0 %v4346_v22 }
 0x134   :  { %1291 = vmatmul.bf16.vlgmr.msra.gmra.mxu3 %v4125_v17  ;;  %v378_v17 = vpop.f32.mrf.mxu1 }
 0x136   :  { %1362 = vmatpush.bf16.msra.mxu1 %v4249_v30  ;;  %1375 = vmatpush.bf16.msra.mxu2 %v4246_v26 }
 0x137   :  { %1437 = vmatpush.bf16.msrb.mxu3 %v4329_v52  ;;  %1450 = vmatpush.bf16.msrb.mxu0 %v4358_v44 }
 0x13a   :  { %1363 = vmatpush.bf16.msra.mxu1 %v4257_v45  ;;  %1376 = vmatpush.bf16.msra.mxu2 %v4254_v42 }
 0x13b   :  { %1438 = vmatpush.bf16.msrb.mxu3 %v4333_v58  ;;  %1451 = vmatpush.bf16.msrb.mxu0 %v4380_v33 }
 0x13c   :  { %v4643_v54 = vpop.f32.mrf.mxu1 }
 0x13d   :  { %5784 = vst [vmem:[#allocation103_spill] sm:$0xff] %v4643_v54  ;;  %v5795_v54 = vld [vmem:[#allocation75_spill] sm:$0xff] }
 0x13e   :  { %1364 = vmatpush.bf16.msra.mxu1 %v4263_v56  ;;  %1377 = vmatpush.bf16.msra.mxu2 %v4260_v55 }
 0x13f   :  { %1439 = vmatpush.bf16.msrb.mxu3 %v4339_v3  ;;  %1452 = vmatpush.bf16.msrb.mxu0 %v4394_v16 }
 0x142   :  { %1365 = vmatpush.bf16.msra.mxu1 %v4270_v2  ;;  %1378 = vmatpush.bf16.msra.mxu2 %v4266_v1 }
 0x143   :  { %1440 = vmatpush.bf16.msrb.mxu3 %v4342_v12  ;;  %1453 = vmatpush.bf16.msrb.mxu0 %v4408_v6 }
 0x146   :  { %1366 = vmatpush.bf16.msra.mxu1 %v4278_v14  ;;  %1379 = vmatpush.bf16.msra.mxu2 %v4274_v13 }
 0x147   :  { %1441 = vmatpush.bf16.msrb.mxu3 %v4356_v20  ;;  %1454 = vmatpush.bf16.msrb.mxu0 %v4427_v21 }
 0x14a   :  { %1367 = vmatpush.bf16.msra.mxu1 %v4285_v28  ;;  %1380 = vmatpush.bf16.msra.mxu2 %v4281_v27 }
 0x14b   :  { %1442 = vmatpush.bf16.msrb.mxu3 %v4378_v19  ;;  %1455 = vmatpush.bf16.msrb.mxu0 %v4440_v25 }
 0x14e   :  { %1368 = vmatpush.bf16.msra.mxu1 %v4293_v35  ;;  %1381 = vmatpush.bf16.msra.mxu2 %v4290_v34 }
 0x14f   :  { %1443 = vmatpush.bf16.msrb.mxu3 %v5778_v36  ;;  %1456 = vmatpush.bf16.msrb.mxu0 %v5780_v63  ;;  %v5788_v36 = vld [vmem:[#allocation66_spill] sm:$0xff]  ;;  %v5790_v63 = vld [vmem:[#allocation67_spill] sm:$0xff] }
 0x152   :  { %1462 = vmatpush.bf16.msrb.mxu1 %v4348_v23  ;;  %1475 = vmatpush.bf16.msrb.mxu2 %v4351_v31  ;;  %v5787_v31 = vld [vmem:[#allocation77_spill] sm:$0xff]  ;;  %v5792_v23 = vld [vmem:[#allocation70_spill] sm:$0xff] }
 0x153   :  { %1488 = vmatpush.bf16.msra.mxu3 %v5779_v38  ;;  %v4649_v38 = vpop.f32.mrf.mxu2 }
 0x154   :  { %5789 = vst [vmem:[#allocation104_spill] sm:$0xff] %v4649_v38  ;;  %v5798_v38 = vld [vmem:[#allocation79_spill] sm:$0xff] }
 0x156   :  { %1463 = vmatpush.bf16.msrb.mxu1 %v5781_v61  ;;  %1476 = vmatpush.bf16.msrb.mxu2 %v5782_v7  ;;  %v5791_v61 = vld [vmem:[#allocation81_spill] sm:$0xff]  ;;  %v4654_v7 = vpop.f32.mrf.mxu1 }
 0x157   :  { %1489 = vmatpush.bf16.msra.mxu3 %v5783_v39  ;;  %5793 = vst [vmem:[#allocation105_spill] sm:$0xff] %v4654_v7  ;;  %v5794_v39 = vld [vmem:[#allocation71_spill] sm:$0xff]  ;;  %v5801_v7 = vld [vmem:[#allocation84_spill] sm:$0xff] }
 0x15a   :  { %1464 = vmatpush.bf16.msrb.mxu1 %v5785_v51  ;;  %1477 = vmatpush.bf16.msrb.mxu2 %v5786_v59  ;;  %v5796_v59 = vld [vmem:[#allocation76_spill] sm:$0xff] }
 0x15b   :  { %1490 = vmatpush.bf16.msra.mxu3 %v5787_v31 }
 0x15e   :  { %1465 = vmatpush.bf16.msrb.mxu1 %v5788_v36  ;;  %1478 = vmatpush.bf16.msrb.mxu2 %v5790_v63  ;;  %v4661_v36 = vpop.f32.mrf.mxu2  ;;  %v5799_v63 = vld [vmem:[#allocation80_spill] sm:$0xff] }
 0x15f   :  { %1491 = vmatpush.bf16.msra.mxu3 %v5791_v61  ;;  %5797 = vst [vmem:[#allocation106_spill] sm:$0xff] %v4661_v36 }
 0x162   :  { %1466 = vmatpush.bf16.msrb.mxu1 %v5792_v23  ;;  %1479 = vmatpush.bf16.msrb.mxu2 %v5794_v39  ;;  %v4666_v23 = vpop.f32.mrf.mxu1  ;;  %v5802_v39 = vld [vmem:[#allocation85_spill] sm:$0xff] }
 0x163   :  { %1492 = vmatpush.bf16.msra.mxu3 %v4468_v53  ;;  %5800 = vst [vmem:[#allocation107_spill] sm:$0xff] %v4666_v23  ;;  %v5810_v23 = vld [vmem:[#allocation43_spill] sm:$0xff] }
 0x166   :  { %1467 = vmatpush.bf16.msrb.mxu1 %v5795_v54  ;;  %1480 = vmatpush.bf16.msrb.mxu2 %v5796_v59  ;;  %v4671_v54 = vpop.f32.mrf.mxu2 }
 0x167   :  { %1493 = vmatpush.bf16.msra.mxu3 %v4493_v29  ;;  %5803 = vst [vmem:[#allocation108_spill] sm:$0xff] %v4671_v54  ;;  %v5812_v54 = vld [vmem:[#allocation56_spill] sm:$0xff] }
 0x168   :  { %v379_v51 = vadd.f32 %v378_v17, %v5812_v54 }
 0x16a   :  { %1468 = vmatpush.bf16.msrb.mxu1 %v5798_v38  ;;  %1481 = vmatpush.bf16.msrb.mxu2 %v5799_v63  ;;  %v4673_v59 = vpop.f32.mrf.mxu1 }
 0x16b   :  { %1494 = vmatpush.bf16.msra.mxu3 %v4501_v50  ;;  %5804 = vst [vmem:[#allocation109_spill] sm:$0xff] %v4673_v59 }
 0x16e   :  { %1469 = vmatpush.bf16.msrb.mxu1 %v5801_v7  ;;  %1482 = vmatpush.bf16.msrb.mxu2 %v5802_v39  ;;  %v4675_v29 = vpop.f32.mrf.mxu2  ;;  %v5811_v7 = vld [vmem:[#allocation42_spill] sm:$0xff] }
 0x16f   :  { %1495 = vmatpush.bf16.msra.mxu3 %v4507_v8  ;;  %5805 = vst [vmem:[#allocation110_spill] sm:$0xff] %v4675_v29  ;;  %v350_v53 = vadd.f32 %v5811_v7, %v5810_v23 }
 0x172   :  { %v4677_v36 = vpop.f32.mrf.mxu1 }
 0x173   :  { %5806 = vst [vmem:[#allocation111_spill] sm:$0xff] %v4677_v36 }
 0x176   :  { %v4679_v38 = vpop.f32.mrf.mxu2 }
 0x177   :  { %5807 = vst [vmem:[#allocation112_spill] sm:$0xff] %v4679_v38  ;;  %v4691_v38 = vld [vmem:[%s5527_s6] sm:$0xf] }
 0x178   :  { %v4694_v7 = vperm.slane %v4691_v38, 0 }
 0x17a   :  { %v4681_v63 = vpop.f32.mrf.mxu1  ;;  %5813 = vst [vmem:[#allocation42_spill] sm:$0xff] %v4694_v7 }
 0x17b   :  { %5808 = vst [vmem:[#allocation113_spill] sm:$0xff] %v4681_v63 }
 0x17e   :  { %v4683_v50 = vpop.f32.mrf.mxu2 }
 0x17f   :  { %5809 = vst [vmem:[#allocation114_spill] sm:$0xff] %v4683_v50 }
 0x18d   :  { %v784_v39 = vpop.f32.mrf.mxu1 }
 0x18e   :  { %v814_v61 = vadd.f32 %v784_v39, %v350_v53  ;;  %v1201_v8 = vpop.f32.mrf.mxu0 }
 0x190   :  { %v3308_v31 = vmul.f32 -1.442695, %v814_v61 }
 0x192   :  { %3780 = vpow2.f32 %v3308_v31  ;;  %v1202_v31 = vadd.f32 %v1201_v8, %v4694_v7 }
 0x193   :  { %v797_v59 = vpop.f32.mrf.mxu2 }
 0x194   :  { %v834_v29 = vadd.f32 %v797_v59, %v379_v51  ;;  %v810_v34 = vpop.f32.mrf.mxu3 }
 0x195   :  { %v786_v63 = vpop.f32.mrf.mxu1 }
 0x196   :  { %v3309_v50 = vmul.f32 -1.442695, %v834_v29  ;;  %v1203_v36 = vpop.f32.mrf.mxu0  ;;  %v4700_v29 = vperm.slane %v4691_v38, 1 }
 0x198   :  { %v3781_v25 = vpop.eup %3780  ;;  %3782 = vpow2.f32 %v3309_v50  ;;  %5814 = vst [vmem:[#allocation115_spill] sm:$0xff] %v4700_v29 }
 0x199   :  { %v818_v53 = vadd.f32 1.0, %v3781_v25 }
 0x19b   :  { %3784 = vrcp.f32 %v818_v53  ;;  %v799_v17 = vpop.f32.mrf.mxu2  ;;  %vm824_vm9 = vweird.f32 %v818_v53 }
 0x19c   :  { %v812_v61 = vpop.f32.mrf.mxu3 }
 0x19d   :  { %v1214_v39 = vpop.f32.mrf.mxu1  ;;  %v830_v61 = vand.u32 2147483648, %v818_v53 }
 0x19e   :  { %v3783_v51 = vpop.eup %3782  ;;  %v1215_v59 = vadd.f32 %v1214_v39, %v1202_v31  ;;  %v4697_v23 = vpop.f32.mrf.mxu0  ;;  %v828_v31 = vand.u32 2147483647, %v818_v53 }
 0x19f   :  { %v838_v54 = vadd.f32 1.0, %v3783_v51 }
 0x1a0   :  { %v3566_v63 = vmul.f32 -1.442695, %v1215_v59  ;;  %vm829_vm11 = vcmp.eq.f32.partialorder %v828_v31, 8.507059e+37 }
 0x1a1   :  { %v3785_v36 = vpop.eup %3784  ;;  %3786 = vrcp.f32 %v838_v54  ;;  %v848_v6 = vand.u32 2147483647, %v838_v54  ;;  %vm844_vm13 = vweird.f32 %v838_v54 }
 0x1a2   :  { %v820_v35 = vmul.f32 %v3785_v36, %v818_v53  ;;  %3788 = vpow2.f32 %v3566_v63  ;;  %vm825_vm8 = vweird.f32 %v3785_v36  ;;  %v831_v63 = vor.u32 1.1754944e-38, %v830_v61 }
 0x1a3   :  { %v1227_v25 = vpop.f32.mrf.mxu2  ;;  %vm826_vm10 = vmor %vm824_vm9, %vm825_vm8  ;;  %vm849_vm15 = vcmp.eq.f32.partialorder %v848_v6, 8.507059e+37 }
 0x1a4   :  { %v821_v50 = vsub.f32 1.0, %v820_v35  ;;  %v1228_v17 = vadd.f32 %v1227_v25, %v4700_v29  ;;  %v1240_v8 = vpop.f32.mrf.mxu3  ;;  %v854_v35 = vadd.f32 %v4484_v40, %v810_v34 }
 0x1a5   :  { %v1216_v7 = vpop.f32.mrf.mxu1 }
 0x1a6   :  { %v822_v19 = vmul.f32 %v3785_v36, %v821_v50  ;;  %v1241_v39 = vadd.f32 %v1240_v8, %v1228_v17  ;;  %v1255_v51 = vpop.f32.mrf.mxu0  ;;  %v5815_v7 = vld [vmem:[#allocation87_spill] sm:$0xff] }
 0x1a7   :  { %v3787_v59 = vpop.eup %3786  ;;  %v408_v50 = vadd.f32 %v4639_v62, %v5815_v7 }
 0x1a8   :  { %v3789_v27 = vpop.eup %3788  ;;  %v840_v21 = vmul.f32 %v3787_v59, %v838_v54  ;;  %v823_v28 = vadd.f32 %v3785_v36, %v822_v19  ;;  %v3567_v20 = vmul.f32 -1.442695, %v1241_v39  ;;  %vm845_vm12 = vweird.f32 %v3787_v59 }
 0x1a9   :  { %v1299_v13 = vadd.f32 1.0, %v3789_v27  ;;  %v850_v19 = vand.u32 2147483648, %v838_v54  ;;  %vm846_vm14 = vmor %vm844_vm13, %vm845_vm12  ;;  %v4710_v54 = vperm.slane %v4691_v38, 2 }
 0x1aa   :  { %v841_v25 = vsub.f32 1.0, %v840_v21  ;;  %v827_v29 = vsel %vm826_vm10, %v3785_v36, %v823_v28  ;;  %3790 = vpow2.f32 %v3567_v20  ;;  %v4707_v36 = vperm.slane %v4691_v38, 3 }
 0x1ab   :  { %v832_v17 = vsel %vm829_vm11, %v831_v63, %v827_v29  ;;  %3792 = vrcp.f32 %v1299_v13  ;;  %v1229_v8 = vpop.f32.mrf.mxu2  ;;  %v851_v21 = vor.u32 1.1754944e-38, %v850_v19  ;;  %v1309_v6 = vand.u32 2147483647, %v1299_v13 }
 0x1ac   :  { %v842_v51 = vmul.f32 %v3787_v59, %v841_v25  ;;  %v855_v53 = vmul.f32 %v854_v35, %v832_v17  ;;  %v1242_v39 = vpop.f32.mrf.mxu3  ;;  %v1311_v17 = vand.u32 2147483648, %v1299_v13  ;;  %vm1305_vm1 = vweird.f32 %v1299_v13 }
 0x1ad   :  { %v5816_v39 = vld [vmem:[#allocation91_spill] sm:$0xff]  ;;  %v1254_v38 = vadd.f32 %v4697_v23, %v4710_v54  ;;  %vm1310_vm3 = vcmp.eq.f32.partialorder %v1309_v6, 8.507059e+37 }
 0x1ae   :  { %v843_v61 = vadd.f32 %v3787_v59, %v842_v51  ;;  %v856_v34 = vadd.f32 %v855_v53, %v408_v50  ;;  %v1266_v27 = vpop.f32.mrf.mxu1 }
 0x1b0   :  { %v3791_v28 = vpop.eup %3790  ;;  %v847_v20 = vsel %vm846_vm14, %v3787_v59, %v843_v61  ;;  %3794 = vtanh.f32 %v856_v34 }
 0x1b1   :  { %v3793_v40 = vpop.eup %3792  ;;  %v1318_v62 = vadd.f32 1.0, %v3791_v28  ;;  %v852_v29 = vsel %vm849_vm15, %v851_v21, %v847_v20  ;;  %v1312_v20 = vor.u32 1.1754944e-38, %v1311_v17  ;;  %v5817_v17 = vld [vmem:[#allocation92_spill] sm:$0xff] }
 0x1b2   :  { %v1301_v31 = vmul.f32 %v3793_v40, %v1299_v13  ;;  %v858_v25 = vsub.f32 1.0, %v852_v29  ;;  %vm1306_vm0 = vweird.f32 %v3793_v40  ;;  %v860_v61 = vmul.f32 %v852_v29, %v5816_v39 }
 0x1b3   :  { %3796 = vrcp.f32 %v1318_v62  ;;  %vm1307_vm2 = vmor %vm1305_vm1, %vm1306_vm0  ;;  %vm1324_vm5 = vweird.f32 %v1318_v62 }
 0x1b4   :  { %v1279_v63 = vpop.f32.mrf.mxu2  ;;  %v1302_v35 = vsub.f32 1.0, %v1301_v31 }
 0x1b5   :  { %v1280_v59 = vadd.f32 %v1279_v63, %v4707_v36 }
 0x1b6   :  { %v3795_v8 = vpop.eup %3794  ;;  %v1303_v51 = vmul.f32 %v3793_v40, %v1302_v35  ;;  %v1268_v19 = vpop.f32.mrf.mxu1 }
 0x1b7   :  { %v1292_v50 = vpop.f32.mrf.mxu3  ;;  %v859_v53 = vmul.f32 %v3795_v8, %v858_v25  ;;  %v1267_v8 = vadd.f32 %v1266_v27, %v1254_v38  ;;  %v1330_v19 = vand.u32 2147483648, %v1318_v62  ;;  %v5821_v38 = vld [vmem:[#allocation95_spill] sm:$0xff] }
 0x1b8   :  { %v1304_v34 = vadd.f32 %v3793_v40, %v1303_v51  ;;  %v1293_v7 = vadd.f32 %v1292_v50, %v1280_v59  ;;  %v5819_v59 = vld [vmem:[#allocation20_spill] sm:$0xff] }
 0x1b9   :  { %v3797_v28 = vpop.eup %3796  ;;  %v4714_v21 = vadd.f32 %v860_v61, %v859_v53  ;;  %v1331_v6 = vor.u32 1.1754944e-38, %v1330_v19  ;;  %v5820_v61 = vld [vmem:[#allocation94_spill] sm:$0xff]  ;;  %v5827_v19 = vld [vmem:[#allocation99_spill] sm:$0xff] }
 0x1ba   :  { %v1320_v31 = vmul.f32 %v3797_v28, %v1318_v62  ;;  %v1308_v63 = vsel %vm1307_vm2, %v3793_v40, %v1304_v34  ;;  %vm1325_vm4 = vweird.f32 %v3797_v28  ;;  %v1328_v40 = vand.u32 2147483647, %v1318_v62 }
 0x1bb   :  { %v4720_v35 = vpack.c.bf16 %v4714_v21, %v4714_v21  ;;  %v1313_v25 = vsel %vm1310_vm3, %v1312_v20, %v1308_v63  ;;  %vm1326_vm6 = vmor %vm1324_vm5, %vm1325_vm4  ;;  %v5823_v63 = vld [vmem:[#allocation96_spill] sm:$0xff] }
 0x1bc   :  { %v1321_v29 = vsub.f32 1.0, %v1320_v31  ;;  %v1334_v13 = vmul.f32 %v1313_v25, %v1293_v7  ;;  %v1281_v51 = vpop.f32.mrf.mxu2  ;;  %v5818_v7 = vld [vmem:[#allocation93_spill] sm:$0xff]  ;;  %vm1329_vm7 = vcmp.eq.f32.partialorder %v1328_v40, 8.507059e+37 }
 0x1bd   :  { %1356 = vmatmul.bf16.vlgmr.msra.gmra.mxu0 %v4720_v35  ;;  %1369 = vmatmul.bf16.vlgmr.msra.gmra.mxu1 %v4720_v35  ;;  %v5822_v31 = vld [vmem:[#allocation21_spill] sm:$0xff]  ;;  %v5826_v51 = vld [vmem:[#allocation98_spill] sm:$0xff] }
 0x1be   :  { %v1322_v23 = vmul.f32 %v3797_v28, %v1321_v29  ;;  %v1335_v50 = vadd.f32 %v1334_v13, %v1267_v8  ;;  %1382 = vmatmul.bf16.vlgmr.msra.gmra.mxu2 %v4720_v35  ;;  %1444 = vmatmul.bf16.vlgmr.msrb.gmra.mxu3 %v4720_v35  ;;  %v5824_v8 = vld [vmem:[#allocation97_spill] sm:$0xff] }
 0x1bf   :  { %v1294_v53 = vpop.f32.mrf.mxu3  ;;  %1501 = vmatpush.bf16.msra.mxu0 %v4516_v37  ;;  %1514 = vmatpush.bf16.msra.mxu1 %v5817_v17  ;;  %v5830_v40 = vld [vmem:[#allocation101_spill] sm:$0xff] }
 0x1c0   :  { %3798 = vtanh.f32 %v1335_v50  ;;  %1527 = vmatpush.bf16.msra.mxu2 %v5818_v7  ;;  %v1323_v27 = vadd.f32 %v3797_v28, %v1322_v23  ;;  %1592 = vmatpush.bf16.msrb.mxu3 %v5819_v59  ;;  %v5828_v23 = vld [vmem:[#allocation100_spill] sm:$0xff]  ;;  %v5829_v50 = vld [vmem:[#allocation23_spill] sm:$0xff] }
 0x1c2   :  { %v1327_v39 = vsel %vm1326_vm6, %v3797_v28, %v1323_v27  ;;  %v5825_v28 = vld [vmem:[#allocation22_spill] sm:$0xff] }
 0x1c3   :  { %1502 = vmatpush.bf16.msra.mxu0 %v4528_v49  ;;  %1515 = vmatpush.bf16.msra.mxu1 %v5820_v61  ;;  %v1332_v34 = vsel %vm1329_vm7, %v1331_v6, %v1327_v39  ;;  %v5831_v27 = vld [vmem:[#allocation102_spill] sm:$0xff]  ;;  %v5832_v6 = vld [vmem:[#allocation24_spill] sm:$0xff]  ;;  %v5834_v39 = vld [vmem:[#allocation35_spill] sm:$0xff] }
 0x1c4   :  { %1528 = vmatpush.bf16.msra.mxu2 %v5821_v38  ;;  %v1337_v20 = vsub.f32 1.0, %v1332_v34  ;;  %1593 = vmatpush.bf16.msrb.mxu3 %v5822_v31  ;;  %v1339_v29 = vmul.f32 0.0, %v1332_v34  ;;  %v5835_v34 = vld [vmem:[#allocation53_spill] sm:$0xff] }
 0x1c6   :  { %v3799_v62 = vpop.eup %3798 }
 0x1c7   :  { %1503 = vmatpush.bf16.msra.mxu0 %v4538_v18  ;;  %1516 = vmatpush.bf16.msra.mxu1 %v5823_v63  ;;  %v1338_v25 = vmul.f32 %v3799_v62, %v1337_v20  ;;  %v5836_v20 = vld [vmem:[#allocation38_spill] sm:$0xff] }
 0x1c8   :  { %1529 = vmatpush.bf16.msra.mxu2 %v5824_v8  ;;  %1594 = vmatpush.bf16.msrb.mxu3 %v5825_v28  ;;  %v5837_v62 = vld [vmem:[#allocation74_spill] sm:$0xff] }
 0x1c9   :  { %v4738_v13 = vadd.f32 %v1339_v29, %v1338_v25  ;;  %v5838_v25 = vld [vmem:[#allocation37_spill] sm:$0xff]  ;;  %v5839_v29 = vld [vmem:[#allocation59_spill] sm:$0xff] }
 0x1cb   :  { %1504 = vmatpush.bf16.msra.mxu0 %v5826_v51  ;;  %1517 = vmatpush.bf16.msra.mxu1 %v5827_v19  ;;  %v1435_v53 = vpack.c.bf16 %v4738_v13, %v4738_v13 }
 0x1cc   :  { %1530 = vmatpush.bf16.msra.mxu2 %v5828_v23  ;;  %1595 = vmatpush.bf16.msrb.mxu3 %v5829_v50 }
 0x1cd   :  { %1457 = vmatmul.bf16.vlgmr.msrb.gmra.mxu0 %v1435_v53  ;;  %1470 = vmatmul.bf16.vlgmr.msrb.gmra.mxu1 %v4720_v35 }
 0x1ce   :  { %1483 = vmatmul.bf16.vlgmr.msrb.gmra.mxu2 %v1435_v53  ;;  %1496 = vmatmul.bf16.vlgmr.msra.gmra.mxu3 %v4720_v35 }
 0x1cf   :  { %1505 = vmatpush.bf16.msra.mxu0 %v4558_v32  ;;  %1518 = vmatpush.bf16.msra.mxu1 %v5830_v40 }
 0x1d0   :  { %1531 = vmatpush.bf16.msra.mxu2 %v5831_v27  ;;  %1596 = vmatpush.bf16.msrb.mxu3 %v5832_v6 }
 0x1d3   :  { %1506 = vmatpush.bf16.msra.mxu0 %v4570_v11  ;;  %1519 = vmatpush.bf16.msra.mxu1 %v4572_v0 }
 0x1d4   :  { %1532 = vmatpush.bf16.msra.mxu2 %v4575_v57  ;;  %1597 = vmatpush.bf16.msrb.mxu3 %v4230_v47 }
 0x1d7   :  { %1507 = vmatpush.bf16.msra.mxu0 %v4580_v4  ;;  %1520 = vmatpush.bf16.msra.mxu1 %v4582_v43 }
 0x1d8   :  { %1533 = vmatpush.bf16.msra.mxu2 %v4585_v5  ;;  %1598 = vmatpush.bf16.msrb.mxu3 %v4233_v60 }
 0x1db   :  { %1508 = vmatpush.bf16.msra.mxu0 %v4590_v48  ;;  %1521 = vmatpush.bf16.msra.mxu1 %v4592_v24 }
 0x1dc   :  { %1534 = vmatpush.bf16.msra.mxu2 %v4595_v41  ;;  %1599 = vmatpush.bf16.msrb.mxu3 %v4236_v9 }
 0x1de   :  { %1509 = vmatmul.bf16.vlgmr.msra.gmra.mxu0 %v1435_v53  ;;  %1522 = vmatmul.bf16.vlgmr.msra.gmra.mxu1 %v4720_v35  ;;  %v5833_v35 = vld [vmem:[#allocation69_spill] sm:$0xff] }
 0x1df   :  { %1605 = vmatpush.bf16.msrb.mxu0 %v4240_v15  ;;  %1618 = vmatpush.bf16.msrb.mxu1 %v4238_v10 }
 0x1e0   :  { %1680 = vmatpush.bf16.msrb.mxu2 %v4321_v46  ;;  %1693 = vmatpush.bf16.msra.mxu3 %v4346_v22 }
 0x1e1   :  { %1535 = vmatmul.bf16.vlgmr.msra.gmra.mxu2 %v1435_v53  ;;  %v5840_v53 = vld [vmem:[#allocation40_spill] sm:$0xff] }
 0x1e3   :  { %1606 = vmatpush.bf16.msrb.mxu0 %v4249_v30  ;;  %1619 = vmatpush.bf16.msrb.mxu1 %v4246_v26 }
 0x1e4   :  { %1681 = vmatpush.bf16.msrb.mxu2 %v4329_v52  ;;  %1694 = vmatpush.bf16.msra.mxu3 %v4358_v44 }
 0x1e7   :  { %1607 = vmatpush.bf16.msrb.mxu0 %v4257_v45  ;;  %1620 = vmatpush.bf16.msrb.mxu1 %v4254_v42 }
 0x1e8   :  { %1682 = vmatpush.bf16.msrb.mxu2 %v4333_v58  ;;  %1695 = vmatpush.bf16.msra.mxu3 %v4380_v33 }
 0x1eb   :  { %1608 = vmatpush.bf16.msrb.mxu0 %v4263_v56  ;;  %1621 = vmatpush.bf16.msrb.mxu1 %v4260_v55 }
 0x1ec   :  { %1683 = vmatpush.bf16.msrb.mxu2 %v4339_v3  ;;  %1696 = vmatpush.bf16.msra.mxu3 %v4394_v16 }
 0x1ef   :  { %1609 = vmatpush.bf16.msrb.mxu0 %v4270_v2  ;;  %1622 = vmatpush.bf16.msrb.mxu1 %v4266_v1  ;;  %v5841_v1 = vld [vmem:[#allocation78_spill] sm:$0xff] }
 0x1f0   :  { %1684 = vmatpush.bf16.msrb.mxu2 %v4342_v12  ;;  %1697 = vmatpush.bf16.msra.mxu3 %v5833_v35  ;;  %v5842_v12 = vld [vmem:[#allocation39_spill] sm:$0xff]  ;;  %v5844_v35 = vld [vmem:[#allocation52_spill] sm:$0xff] }
 0x1f3   :  { %1610 = vmatpush.bf16.msrb.mxu0 %v4278_v14  ;;  %1623 = vmatpush.bf16.msrb.mxu1 %v5834_v39  ;;  %v5843_v14 = vld [vmem:[#allocation51_spill] sm:$0xff]  ;;  %v5845_v39 = vld [vmem:[#allocation64_spill] sm:$0xff] }
 0x1f4   :  { %1685 = vmatpush.bf16.msrb.mxu2 %v5835_v34  ;;  %1698 = vmatpush.bf16.msra.mxu3 %v5837_v62  ;;  %v5846_v34 = vld [vmem:[#allocation68_spill] sm:$0xff]  ;;  %v5848_v62 = vld [vmem:[#allocation55_spill] sm:$0xff] }
 0x1f7   :  { %1611 = vmatpush.bf16.msrb.mxu0 %v5836_v20  ;;  %1624 = vmatpush.bf16.msrb.mxu1 %v5838_v25  ;;  %v5847_v20 = vld [vmem:[#allocation83_spill] sm:$0xff]  ;;  %v5849_v25 = vld [vmem:[#allocation57_spill] sm:$0xff] }
 0x1f8   :  { %1686 = vmatpush.bf16.msrb.mxu2 %v5839_v29  ;;  %1699 = vmatpush.bf16.msra.mxu3 %v5841_v1  ;;  %v5850_v29 = vld [vmem:[#allocation72_spill] sm:$0xff]  ;;  %v5852_v1 = vld [vmem:[#allocation62_spill] sm:$0xff] }
 0x1fb   :  { %1612 = vmatpush.bf16.msrb.mxu0 %v5840_v53  ;;  %1625 = vmatpush.bf16.msrb.mxu1 %v5842_v12  ;;  %v5851_v53 = vld [vmem:[#allocation61_spill] sm:$0xff] }
 0x1fc   :  { %1687 = vmatpush.bf16.msrb.mxu2 %v5845_v39  ;;  %1700 = vmatpush.bf16.msra.mxu3 %v5847_v20  ;;  %v5853_v12 = vld [vmem:[#allocation77_spill] sm:$0xff]  ;;  %v5858_v20 = vld [vmem:[#allocation71_spill] sm:$0xff] }
 0x1fd   :  { %v5856_v39 = vld [vmem:[#allocation81_spill] sm:$0xff] }
 0x1ff   :  { %1706 = vmatpush.bf16.msra.mxu0 %v5843_v14  ;;  %1719 = vmatpush.bf16.msra.mxu1 %v5844_v35  ;;  %v5854_v14 = vld [vmem:[#allocation66_spill] sm:$0xff]  ;;  %v5855_v35 = vld [vmem:[#allocation67_spill] sm:$0xff] }
 0x200   :  { %1732 = vmatpush.bf16.msra.mxu2 %v5846_v34  ;;  %v5857_v34 = vld [vmem:[#allocation70_spill] sm:$0xff] }
 0x203   :  { %1707 = vmatpush.bf16.msra.mxu0 %v5848_v62  ;;  %1720 = vmatpush.bf16.msra.mxu1 %v5849_v25  ;;  %v5859_v62 = vld [vmem:[#allocation86_spill] sm:$0xff]  ;;  %v5860_v25 = vld [vmem:[#allocation75_spill] sm:$0xff] }
 0x204   :  { %1733 = vmatpush.bf16.msra.mxu2 %v5850_v29  ;;  %v5861_v29 = vld [vmem:[#allocation76_spill] sm:$0xff] }
 0x207   :  { %1708 = vmatpush.bf16.msra.mxu0 %v5851_v53  ;;  %1721 = vmatpush.bf16.msra.mxu1 %v5852_v1  ;;  %v5862_v53 = vld [vmem:[#allocation88_spill] sm:$0xff]  ;;  %v5863_v1 = vld [vmem:[#allocation79_spill] sm:$0xff] }
 0x208   :  { %1734 = vmatpush.bf16.msra.mxu2 %v5853_v12  ;;  %v5864_v12 = vld [vmem:[#allocation80_spill] sm:$0xff] }
 0x20b   :  { %1709 = vmatpush.bf16.msra.mxu0 %v5854_v14  ;;  %1722 = vmatpush.bf16.msra.mxu1 %v5855_v35  ;;  %v5865_v14 = vld [vmem:[#allocation89_spill] sm:$0xff]  ;;  %v5866_v35 = vld [vmem:[#allocation84_spill] sm:$0xff] }
 0x20c   :  { %1735 = vmatpush.bf16.msra.mxu2 %v5856_v39  ;;  %v5867_v39 = vld [vmem:[#allocation85_spill] sm:$0xff] }
 0x20f   :  { %1710 = vmatpush.bf16.msra.mxu0 %v5857_v34  ;;  %1723 = vmatpush.bf16.msra.mxu1 %v5858_v20  ;;  %v5868_v34 = vld [vmem:[#allocation90_spill] sm:$0xff]  ;;  %v5869_v20 = vld [vmem:[#allocation56_spill] sm:$0xff] }
 0x210   :  { %1736 = vmatpush.bf16.msra.mxu2 %v5859_v62  ;;  %v5870_v62 = vld [vmem:[#allocation103_spill] sm:$0xff] }
 0x211   :  { %v382_v16 = vadd.f32 %v5870_v62, %v5869_v20  ;;  %v5872_v62 = vld [vmem:[#allocation42_spill] sm:$0xff] }
 0x213   :  { %1711 = vmatpush.bf16.msra.mxu0 %v5860_v25  ;;  %1724 = vmatpush.bf16.msra.mxu1 %v5861_v29  ;;  %v5871_v29 = vld [vmem:[#allocation46_spill] sm:$0xff] }
 0x214   :  { %1737 = vmatpush.bf16.msra.mxu2 %v5862_v53 }
 0x217   :  { %1712 = vmatpush.bf16.msra.mxu0 %v5863_v1  ;;  %1725 = vmatpush.bf16.msra.mxu1 %v5864_v12 }
 0x218   :  { %1738 = vmatpush.bf16.msra.mxu2 %v5865_v14 }
 0x21b   :  { %1713 = vmatpush.bf16.msra.mxu0 %v5866_v35  ;;  %1726 = vmatpush.bf16.msra.mxu1 %v5867_v39 }
 0x21c   :  { %1739 = vmatpush.bf16.msra.mxu2 %v5868_v34 }
 0x23a   :  { %v1357_v25 = vpop.f32.mrf.mxu0  ;;  %v1370_v2 = vpop.f32.mrf.mxu1 }
 0x23b   :  { %v1387_v3 = vadd.f32 %v1357_v25, %v5871_v29  ;;  %v1407_v53 = vadd.f32 %v1370_v2, %v382_v16 }
 0x23d   :  { %v3568_v55 = vmul.f32 -1.442695, %v1387_v3  ;;  %v3569_v1 = vmul.f32 -1.442695, %v1407_v53 }
 0x23f   :  { %3800 = vpow2.f32 %v3568_v55 }
 0x240   :  { %3802 = vpow2.f32 %v3569_v1 }
 0x241   :  { %v1383_v12 = vpop.f32.mrf.mxu2  ;;  %v1445_v14 = vpop.f32.mrf.mxu3 }
 0x242   :  { %v1359_v33 = vpop.f32.mrf.mxu0  ;;  %v1372_v35 = vpop.f32.mrf.mxu1  ;;  %v1446_v20 = vadd.f32 %v1445_v14, %v5872_v62 }
 0x243   :  { %v5873_v35 = vld [vmem:[#allocation115_spill] sm:$0xff] }
 0x245   :  { %v3801_v56 = vpop.eup %3800 }
 0x246   :  { %v3803_v39 = vpop.eup %3802  ;;  %v1391_v58 = vadd.f32 1.0, %v3801_v56 }
 0x247   :  { %v1411_v34 = vadd.f32 1.0, %v3803_v39 }
 0x248   :  { %3804 = vrcp.f32 %v1391_v58  ;;  %v1403_v26 = vand.u32 2147483648, %v1391_v58  ;;  %vm1397_vm9 = vweird.f32 %v1391_v58 }
 0x249   :  { %3806 = vrcp.f32 %v1411_v34  ;;  %v1385_v42 = vpop.f32.mrf.mxu2  ;;  %v1447_v44 = vpop.f32.mrf.mxu3  ;;  %vm1417_vm13 = vweird.f32 %v1411_v34 }
 0x24a   :  { %v1458_v25 = vpop.f32.mrf.mxu0  ;;  %v1471_v2 = vpop.f32.mrf.mxu1 }
 0x24b   :  { %v1459_v3 = vadd.f32 %v1458_v25, %v1446_v20  ;;  %v1472_v53 = vadd.f32 %v1471_v2, %v5873_v35  ;;  %v1401_v20 = vand.u32 2147483647, %v1391_v58 }
 0x24d   :  { %v3570_v16 = vmul.f32 -1.442695, %v1459_v3  ;;  %vm1402_vm11 = vcmp.eq.f32.partialorder %v1401_v20, 8.507059e+37 }
 0x24e   :  { %v3805_v55 = vpop.eup %3804 }
 0x24f   :  { %v3807_v1 = vpop.eup %3806  ;;  %v1393_v29 = vmul.f32 %v3805_v55, %v1391_v58  ;;  %3808 = vpow2.f32 %v3570_v16  ;;  %vm1398_vm8 = vweird.f32 %v3805_v55  ;;  %v1404_v16 = vor.u32 1.1754944e-38, %v1403_v26 }
 0x250   :  { %v1413_v33 = vmul.f32 %v3807_v1, %v1411_v34  ;;  %vm1399_vm10 = vmor %vm1397_vm9, %vm1398_vm8  ;;  %vm1418_vm12 = vweird.f32 %v3807_v1 }
 0x251   :  { %v1394_v45 = vsub.f32 1.0, %v1393_v29  ;;  %v1484_v56 = vpop.f32.mrf.mxu2  ;;  %v4826_v39 = vpop.f32.mrf.mxu3  ;;  %vm1419_vm14 = vmor %vm1417_vm13, %vm1418_vm12 }
 0x252   :  { %v1414_v52 = vsub.f32 1.0, %v1413_v33  ;;  %v1485_v14 = vadd.f32 %v1484_v56, %v1472_v53  ;;  %v1460_v42 = vpop.f32.mrf.mxu0  ;;  %v1473_v44 = vpop.f32.mrf.mxu1  ;;  %v4831_v33 = vld [vmem:[%s5525_s4] ss:$0 sm:$0xff]  ;;  %v5875_v56 = vld [vmem:[#allocation87_spill] sm:$0xff] }
 0x253   :  { %v1395_v62 = vmul.f32 %v3805_v55, %v1394_v45  ;;  %5874 = vst [vmem:[#allocation91_spill] sm:$0xff] %v4831_v33  ;;  %v1427_v45 = vadd.f32 %v4831_v33, %v1383_v12 }
 0x254   :  { %v1415_v25 = vmul.f32 %v3807_v1, %v1414_v52  ;;  %v3571_v3 = vmul.f32 -1.442695, %v1485_v14  ;;  %v1423_v14 = vand.u32 2147483648, %v1411_v34 }
 0x255   :  { %v3809_v22 = vpop.eup %3808  ;;  %v1396_v30 = vadd.f32 %v3805_v55, %v1395_v62  ;;  %v5876_v62 = vld [vmem:[#allocation104_spill] sm:$0xff] }
 0x256   :  { %v1543_v2 = vadd.f32 1.0, %v3809_v22  ;;  %3810 = vpow2.f32 %v3571_v3  ;;  %v1416_v53 = vadd.f32 %v3807_v1, %v1415_v25  ;;  %v411_v58 = vadd.f32 %v5876_v62, %v5875_v56 }
 0x257   :  { %v1400_v29 = vsel %vm1399_vm10, %v3805_v55, %v1396_v30  ;;  %v1421_v30 = vand.u32 2147483647, %v1411_v34  ;;  %v1424_v12 = vor.u32 1.1754944e-38, %v1423_v14 }
 0x258   :  { %v1405_v52 = vsel %vm1402_vm11, %v1404_v16, %v1400_v29  ;;  %3812 = vrcp.f32 %v1543_v2  ;;  %v1420_v35 = vsel %vm1419_vm14, %v3807_v1, %v1416_v53  ;;  %vm1549_vm1 = vweird.f32 %v1543_v2 }
 0x259   :  { %v1428_v26 = vmul.f32 %v1427_v45, %v1405_v52  ;;  %v1486_v22 = vpop.f32.mrf.mxu2  ;;  %v1499_v42 = vpop.f32.mrf.mxu3  ;;  %vm1422_vm15 = vcmp.eq.f32.partialorder %v1421_v30, 8.507059e+37 }
 0x25a   :  { %v1425_v29 = vsel %vm1422_vm15, %v1424_v12, %v1420_v35  ;;  %v1555_v22 = vand.u32 2147483648, %v1543_v2 }
 0x25b   :  { %v1429_v55 = vadd.f32 %v1428_v26, %v411_v58  ;;  %v1510_v44 = vpop.f32.mrf.mxu0  ;;  %v1523_v20 = vpop.f32.mrf.mxu1  ;;  %v1431_v45 = vsub.f32 1.0, %v1425_v29  ;;  %v1553_v58 = vand.u32 2147483647, %v1543_v2  ;;  %v1433_v1 = vmul.f32 %v1425_v29, %v4714_v21 }
 0x25c   :  { %v3811_v3 = vpop.eup %3810  ;;  %v1524_v14 = vadd.f32 %v1523_v20, %v4707_v36 }
 0x25d   :  { %3814 = vtanh.f32 %v1429_v55  ;;  %v1562_v25 = vadd.f32 1.0, %v3811_v3  ;;  %v1556_v3 = vor.u32 1.1754944e-38, %v1555_v22  ;;  %vm1554_vm3 = vcmp.eq.f32.partialorder %v1553_v58, 8.507059e+37 }
 0x25e   :  { %v3813_v16 = vpop.eup %3812 }
 0x25f   :  { %3816 = vrcp.f32 %v1562_v25  ;;  %v1545_v62 = vmul.f32 %v3813_v16, %v1543_v2  ;;  %vm1550_vm0 = vweird.f32 %v3813_v16  ;;  %v1574_v20 = vand.u32 2147483648, %v1562_v25 }
 0x260   :  { %vm1551_vm2 = vmor %vm1549_vm1, %vm1550_vm0  ;;  %vm1568_vm5 = vweird.f32 %v1562_v25 }
 0x261   :  { %v1546_v56 = vsub.f32 1.0, %v1545_v62 }
 0x263   :  { %v3815_v42 = vpop.eup %3814  ;;  %v1547_v34 = vmul.f32 %v3813_v16, %v1546_v56  ;;  %v1512_v26 = vpop.f32.mrf.mxu0  ;;  %v1498_v56 = vadd.f32 %v4826_v39, %v4710_v54  ;;  %v1572_v39 = vand.u32 2147483647, %v1562_v25 }
 0x264   :  { %v1536_v52 = vpop.f32.mrf.mxu2  ;;  %v1525_v33 = vpop.f32.mrf.mxu1  ;;  %v1432_v9 = vmul.f32 %v3815_v42, %v1431_v45 }
 0x265   :  { %v3817_v53 = vpop.eup %3816  ;;  %v1548_v30 = vadd.f32 %v3813_v16, %v1547_v34  ;;  %v1537_v12 = vadd.f32 %v1536_v52, %v1524_v14  ;;  %v1511_v45 = vadd.f32 %v1510_v44, %v1498_v56  ;;  %vm1573_vm7 = vcmp.eq.f32.partialorder %v1572_v39, 8.507059e+37  ;;  %v5881_v56 = vld [vmem:[#allocation44_spill] sm:$0xff]  ;;  %v5892_v39 = vld [vmem:[#allocation33_spill] sm:$0xff] }
 0x266   :  { %v4838_v35 = vadd.f32 %v1433_v1, %v1432_v9  ;;  %v1564_v55 = vmul.f32 %v3817_v53, %v1562_v25  ;;  %vm1569_vm4 = vweird.f32 %v3817_v53 }
 0x267   :  { %v1552_v62 = vsel %vm1551_vm2, %v3813_v16, %v1548_v30  ;;  %vm1570_vm6 = vmor %vm1568_vm5, %vm1569_vm4  ;;  %v1575_v16 = vor.u32 1.1754944e-38, %v1574_v20  ;;  %v5878_v30 = vld [vmem:[#allocation28_spill] sm:$0xff] }
 0x268   :  { %v4844_v33 = vpack.c.bf16 %v4838_v35, %v4838_v35  ;;  %v1565_v21 = vsub.f32 1.0, %v1564_v55  ;;  %v1557_v29 = vsel %vm1554_vm3, %v1556_v3, %v1552_v62  ;;  %v5879_v55 = vld [vmem:[#allocation50_spill] sm:$0xff]  ;;  %v5880_v3 = vld [vmem:[#allocation27_spill] sm:$0xff]  ;;  %v5887_v20 = vld [vmem:[#allocation60_spill] sm:$0xff] }
 0x269   :  { %v1578_v2 = vmul.f32 %v1557_v29, %v1537_v12  ;;  %v5882_v12 = vld [vmem:[#allocation30_spill] sm:$0xff]  ;;  %v5885_v29 = vld [vmem:[#allocation45_spill] sm:$0xff] }
 0x26a   :  { %v1566_v9 = vmul.f32 %v3817_v53, %v1565_v21  ;;  %1600 = vmatmul.bf16.vlgmr.msrb.gmra.mxu3 %v4844_v33  ;;  %1613 = vmatmul.bf16.vlgmr.msrb.gmra.mxu0 %v4844_v33  ;;  %v5883_v62 = vld [vmem:[#allocation54_spill] sm:$0xff]  ;;  %v5884_v21 = vld [vmem:[#allocation29_spill] sm:$0xff] }
 0x26b   :  { %v1579_v52 = vadd.f32 %v1578_v2, %v1511_v45  ;;  %1626 = vmatmul.bf16.vlgmr.msrb.gmra.mxu1 %v4844_v33  ;;  %1688 = vmatmul.bf16.vlgmr.msrb.gmra.mxu2 %v4844_v33  ;;  %v5888_v45 = vld [vmem:[#allocation31_spill] sm:$0xff] }
 0x26c   :  { %v1538_v42 = vpop.f32.mrf.mxu2  ;;  %1745 = vmatpush.bf16.msrb.mxu3 %v4516_v37  ;;  %1758 = vmatpush.bf16.msrb.mxu0 %v5817_v17  ;;  %v1567_v44 = vadd.f32 %v3817_v53, %v1566_v9  ;;  %v5889_v2 = vld [vmem:[#allocation47_spill] sm:$0xff]  ;;  %v5890_v9 = vld [vmem:[#allocation34_spill] sm:$0xff] }
 0x26d   :  { %3818 = vtanh.f32 %v1579_v52  ;;  %1771 = vmatpush.bf16.msrb.mxu1 %v5818_v7  ;;  %1836 = vmatpush.bf16.msrb.mxu2 %v5819_v59  ;;  %v5891_v42 = vld [vmem:[#allocation65_spill] sm:$0xff]  ;;  %v5893_v52 = vld [vmem:[#allocation48_spill] sm:$0xff] }
 0x26e   :  { %v1571_v22 = vsel %vm1570_vm6, %v3817_v53, %v1567_v44  ;;  %v5894_v44 = vld [vmem:[#allocation36_spill] sm:$0xff] }
 0x26f   :  { %v1576_v34 = vsel %vm1573_vm7, %v1575_v16, %v1571_v22  ;;  %v5895_v16 = vld [vmem:[#allocation69_spill] sm:$0xff]  ;;  %v5896_v22 = vld [vmem:[#allocation35_spill] sm:$0xff] }
 0x270   :  { %1746 = vmatpush.bf16.msrb.mxu3 %v4528_v49  ;;  %1759 = vmatpush.bf16.msrb.mxu0 %v5820_v61  ;;  %v1581_v25 = vsub.f32 1.0, %v1576_v34  ;;  %v1583_v1 = vmul.f32 %v1576_v34, %v4738_v13  ;;  %v5877_v13 = vld [vmem:[#allocation25_spill] sm:$0xff] }
 0x271   :  { %1772 = vmatpush.bf16.msrb.mxu1 %v5821_v38  ;;  %1837 = vmatpush.bf16.msrb.mxu2 %v5822_v31  ;;  %v5897_v34 = vld [vmem:[#allocation53_spill] sm:$0xff] }
 0x273   :  { %v3819_v58 = vpop.eup %3818 }
 0x274   :  { %1747 = vmatpush.bf16.msrb.mxu3 %v4538_v18  ;;  %1760 = vmatpush.bf16.msrb.mxu0 %v5823_v63  ;;  %v1582_v26 = vmul.f32 %v3819_v58, %v1581_v25  ;;  %v5898_v25 = vld [vmem:[#allocation38_spill] sm:$0xff] }
 0x275   :  { %1773 = vmatpush.bf16.msrb.mxu1 %v5824_v8  ;;  %1838 = vmatpush.bf16.msrb.mxu2 %v5825_v28  ;;  %v5899_v58 = vld [vmem:[#allocation74_spill] sm:$0xff] }
 0x276   :  { %v4863_v53 = vadd.f32 %v1583_v1, %v1582_v26  ;;  %v5900_v26 = vld [vmem:[#allocation37_spill] sm:$0xff]  ;;  %v5901_v1 = vld [vmem:[#allocation59_spill] sm:$0xff] }
 0x278   :  { %1748 = vmatpush.bf16.msrb.mxu3 %v5826_v51  ;;  %1761 = vmatpush.bf16.msrb.mxu0 %v5827_v19  ;;  %v1679_v14 = vpack.c.bf16 %v4863_v53, %v4863_v53 }
 0x279   :  { %1774 = vmatpush.bf16.msrb.mxu1 %v5828_v23  ;;  %1839 = vmatpush.bf16.msrb.mxu2 %v5829_v50 }
 0x27a   :  { %1701 = vmatmul.bf16.vlgmr.msra.gmra.mxu3 %v1679_v14  ;;  %1714 = vmatmul.bf16.vlgmr.msra.gmra.mxu0 %v4844_v33 }
 0x27b   :  { %1727 = vmatmul.bf16.vlgmr.msra.gmra.mxu1 %v1679_v14  ;;  %1740 = vmatmul.bf16.vlgmr.msra.gmra.mxu2 %v4844_v33 }
 0x27c   :  { %1749 = vmatpush.bf16.msrb.mxu3 %v4558_v32  ;;  %1762 = vmatpush.bf16.msrb.mxu0 %v5830_v40 }
 0x27d   :  { %1775 = vmatpush.bf16.msrb.mxu1 %v5831_v27  ;;  %1840 = vmatpush.bf16.msrb.mxu2 %v5832_v6 }
 0x280   :  { %1750 = vmatpush.bf16.msrb.mxu3 %v4570_v11  ;;  %1763 = vmatpush.bf16.msrb.mxu0 %v4572_v0 }
 0x281   :  { %1776 = vmatpush.bf16.msrb.mxu1 %v4575_v57  ;;  %1841 = vmatpush.bf16.msrb.mxu2 %v4230_v47 }
 0x284   :  { %1751 = vmatpush.bf16.msrb.mxu3 %v4580_v4  ;;  %1764 = vmatpush.bf16.msrb.mxu0 %v4582_v43 }
 0x285   :  { %1777 = vmatpush.bf16.msrb.mxu1 %v4585_v5  ;;  %1842 = vmatpush.bf16.msrb.mxu2 %v4233_v60 }
 0x288   :  { %1752 = vmatpush.bf16.msrb.mxu3 %v4590_v48  ;;  %1765 = vmatpush.bf16.msrb.mxu0 %v4592_v24 }
 0x289   :  { %1778 = vmatpush.bf16.msrb.mxu1 %v4595_v41  ;;  %1843 = vmatpush.bf16.msrb.mxu2 %v5877_v13 }
 0x28b   :  { %1753 = vmatmul.bf16.vlgmr.msrb.gmra.mxu3 %v1679_v14  ;;  %1766 = vmatmul.bf16.vlgmr.msrb.gmra.mxu0 %v4844_v33  ;;  %v5886_v33 = vld [vmem:[#allocation32_spill] sm:$0xff] }
 0x28c   :  { %1849 = vmatpush.bf16.msra.mxu3 %v4240_v15  ;;  %1862 = vmatpush.bf16.msra.mxu0 %v4238_v10 }
 0x28d   :  { %1924 = vmatpush.bf16.msra.mxu1 %v4321_v46  ;;  %1937 = vmatpush.bf16.msra.mxu2 %v5879_v55 }
 0x28e   :  { %1779 = vmatmul.bf16.vlgmr.msrb.gmra.mxu1 %v1679_v14  ;;  %v5902_v14 = vld [vmem:[#allocation40_spill] sm:$0xff] }
 0x290   :  { %1850 = vmatpush.bf16.msra.mxu3 %v5878_v30  ;;  %1863 = vmatpush.bf16.msra.mxu0 %v5880_v3 }
 0x291   :  { %1925 = vmatpush.bf16.msra.mxu1 %v5881_v56  ;;  %1938 = vmatpush.bf16.msra.mxu2 %v5883_v62 }
 0x294   :  { %1851 = vmatpush.bf16.msra.mxu3 %v5882_v12  ;;  %1864 = vmatpush.bf16.msra.mxu0 %v5884_v21 }
 0x295   :  { %1926 = vmatpush.bf16.msra.mxu1 %v5885_v29  ;;  %1939 = vmatpush.bf16.msra.mxu2 %v5887_v20 }
 0x298   :  { %1852 = vmatpush.bf16.msra.mxu3 %v5886_v33  ;;  %1865 = vmatpush.bf16.msra.mxu0 %v5888_v45  ;;  %v5934_v45 = vld [vmem:[#allocation49_spill] sm:$0xff] }
 0x299   :  { %1927 = vmatpush.bf16.msra.mxu1 %v5889_v2  ;;  %1940 = vmatpush.bf16.msra.mxu2 %v5891_v42 }
 0x29c   :  { %1853 = vmatpush.bf16.msra.mxu3 %v5890_v9  ;;  %1866 = vmatpush.bf16.msra.mxu0 %v5892_v39  ;;  %v5903_v39 = vld [vmem:[#allocation78_spill] sm:$0xff] }
 0x29d   :  { %1928 = vmatpush.bf16.msra.mxu1 %v5893_v52  ;;  %1941 = vmatpush.bf16.msra.mxu2 %v5895_v16  ;;  %v5904_v52 = vld [vmem:[#allocation39_spill] sm:$0xff]  ;;  %v5906_v16 = vld [vmem:[#allocation52_spill] sm:$0xff] }
 0x2a0   :  { %1854 = vmatpush.bf16.msra.mxu3 %v5894_v44  ;;  %1867 = vmatpush.bf16.msra.mxu0 %v5896_v22  ;;  %v5905_v44 = vld [vmem:[#allocation51_spill] sm:$0xff]  ;;  %v5907_v22 = vld [vmem:[#allocation64_spill] sm:$0xff] }
 0x2a1   :  { %1929 = vmatpush.bf16.msra.mxu1 %v5897_v34  ;;  %1942 = vmatpush.bf16.msra.mxu2 %v5899_v58  ;;  %v5908_v34 = vld [vmem:[#allocation68_spill] sm:$0xff]  ;;  %v5910_v58 = vld [vmem:[#allocation55_spill] sm:$0xff] }
 0x2a4   :  { %1855 = vmatpush.bf16.msra.mxu3 %v5898_v25  ;;  %1868 = vmatpush.bf16.msra.mxu0 %v5900_v26  ;;  %v5909_v25 = vld [vmem:[#allocation83_spill] sm:$0xff]  ;;  %v5911_v26 = vld [vmem:[#allocation57_spill] sm:$0xff] }
 0x2a5   :  { %1930 = vmatpush.bf16.msra.mxu1 %v5901_v1  ;;  %1943 = vmatpush.bf16.msra.mxu2 %v5903_v39  ;;  %v5912_v1 = vld [vmem:[#allocation72_spill] sm:$0xff]  ;;  %v5914_v39 = vld [vmem:[#allocation62_spill] sm:$0xff] }
 0x2a8   :  { %1856 = vmatpush.bf16.msra.mxu3 %v5902_v14  ;;  %1869 = vmatpush.bf16.msra.mxu0 %v5904_v52  ;;  %v5913_v14 = vld [vmem:[#allocation61_spill] sm:$0xff] }
 0x2a9   :  { %1931 = vmatpush.bf16.msra.mxu1 %v5907_v22  ;;  %1944 = vmatpush.bf16.msra.mxu2 %v5909_v25  ;;  %v5915_v52 = vld [vmem:[#allocation77_spill] sm:$0xff]  ;;  %v5920_v25 = vld [vmem:[#allocation71_spill] sm:$0xff] }
 0x2aa   :  { %v5918_v22 = vld [vmem:[#allocation81_spill] sm:$0xff] }
 0x2ac   :  { %1950 = vmatpush.bf16.msrb.mxu3 %v5905_v44  ;;  %1963 = vmatpush.bf16.msrb.mxu0 %v5906_v16  ;;  %v5916_v44 = vld [vmem:[#allocation66_spill] sm:$0xff]  ;;  %v5917_v16 = vld [vmem:[#allocation67_spill] sm:$0xff] }
 0x2ad   :  { %1976 = vmatpush.bf16.msrb.mxu1 %v5908_v34  ;;  %v5919_v34 = vld [vmem:[#allocation70_spill] sm:$0xff] }
 0x2b0   :  { %1951 = vmatpush.bf16.msrb.mxu3 %v5910_v58  ;;  %1964 = vmatpush.bf16.msrb.mxu0 %v5911_v26  ;;  %v5921_v58 = vld [vmem:[#allocation86_spill] sm:$0xff]  ;;  %v5922_v26 = vld [vmem:[#allocation75_spill] sm:$0xff] }
 0x2b1   :  { %1977 = vmatpush.bf16.msrb.mxu1 %v5912_v1  ;;  %v5923_v1 = vld [vmem:[#allocation76_spill] sm:$0xff] }
 0x2b4   :  { %1952 = vmatpush.bf16.msrb.mxu3 %v5913_v14  ;;  %1965 = vmatpush.bf16.msrb.mxu0 %v5914_v39  ;;  %v5924_v14 = vld [vmem:[#allocation88_spill] sm:$0xff]  ;;  %v5925_v39 = vld [vmem:[#allocation79_spill] sm:$0xff] }
 0x2b5   :  { %1978 = vmatpush.bf16.msrb.mxu1 %v5915_v52  ;;  %v5926_v52 = vld [vmem:[#allocation80_spill] sm:$0xff] }
 0x2b8   :  { %1953 = vmatpush.bf16.msrb.mxu3 %v5916_v44  ;;  %1966 = vmatpush.bf16.msrb.mxu0 %v5917_v16  ;;  %v5927_v44 = vld [vmem:[#allocation89_spill] sm:$0xff]  ;;  %v5928_v16 = vld [vmem:[#allocation84_spill] sm:$0xff] }
 0x2b9   :  { %1979 = vmatpush.bf16.msrb.mxu1 %v5918_v22  ;;  %v5929_v22 = vld [vmem:[#allocation85_spill] sm:$0xff] }
 0x2bc   :  { %1954 = vmatpush.bf16.msrb.mxu3 %v5919_v34  ;;  %1967 = vmatpush.bf16.msrb.mxu0 %v5920_v25  ;;  %v5930_v34 = vld [vmem:[#allocation90_spill] sm:$0xff]  ;;  %v5931_v25 = vld [vmem:[#allocation56_spill] sm:$0xff] }
 0x2bd   :  { %1980 = vmatpush.bf16.msrb.mxu1 %v5921_v58  ;;  %v5932_v58 = vld [vmem:[#allocation105_spill] sm:$0xff] }
 0x2be   :  { %v384_v42 = vadd.f32 %v5932_v58, %v5931_v25 }
 0x2c0   :  { %1955 = vmatpush.bf16.msrb.mxu3 %v5922_v26  ;;  %1968 = vmatpush.bf16.msrb.mxu0 %v5923_v1 }
 0x2c1   :  { %1981 = vmatpush.bf16.msrb.mxu1 %v5924_v14  ;;  %v5933_v14 = vld [vmem:[#allocation43_spill] sm:$0xff] }
 0x2c4   :  { %1956 = vmatpush.bf16.msrb.mxu3 %v5925_v39  ;;  %1969 = vmatpush.bf16.msrb.mxu0 %v5926_v52  ;;  %v355_v39 = vadd.f32 %v5934_v45, %v5933_v14 }
 0x2c5   :  { %1982 = vmatpush.bf16.msrb.mxu1 %v5927_v44 }
 0x2c8   :  { %1957 = vmatpush.bf16.msrb.mxu3 %v5928_v16  ;;  %1970 = vmatpush.bf16.msrb.mxu0 %v5929_v22 }
 0x2c9   :  { %1983 = vmatpush.bf16.msrb.mxu1 %v5930_v34 }
 0x2e7   :  { %v1614_v26 = vpop.f32.mrf.mxu0 }
 0x2e8   :  { %v1651_v9 = vadd.f32 %v1614_v26, %v384_v42  ;;  %v1627_v1 = vpop.f32.mrf.mxu1  ;;  %v5935_v26 = vld [vmem:[#allocation115_spill] sm:$0xff] }
 0x2ea   :  { %v3573_v2 = vmul.f32 -1.442695, %v1651_v9 }
 0x2ec   :  { %3820 = vpow2.f32 %v3573_v2 }
 0x2ed   :  { %v1601_v52 = vpop.f32.mrf.mxu3 }
 0x2ee   :  { %v1631_v20 = vadd.f32 %v1601_v52, %v355_v39  ;;  %v1689_v44 = vpop.f32.mrf.mxu2 }
 0x2ef   :  { %v1616_v33 = vpop.f32.mrf.mxu0 }
 0x2f0   :  { %v3572_v16 = vmul.f32 -1.442695, %v1631_v20  ;;  %v1629_v29 = vpop.f32.mrf.mxu1  ;;  %v5936_v33 = vld [vmem:[#allocation42_spill] sm:$0xff] }
 0x2f1   :  { %v1690_v20 = vadd.f32 %v1689_v44, %v5936_v33 }
 0x2f2   :  { %v3821_v22 = vpop.eup %3820  ;;  %3822 = vpow2.f32 %v3572_v16 }
 0x2f3   :  { %v4950_v34 = vadd.f32 1.0, %v3821_v22 }
 0x2f5   :  { %v1603_v21 = vpop.f32.mrf.mxu3  ;;  %3824 = vrcp.f32 %v4950_v34  ;;  %v1667_v13 = vand.u32 2147483648, %v4950_v34  ;;  %vm1661_vm13 = vweird.f32 %v4950_v34 }
 0x2f6   :  { %v1691_v42 = vpop.f32.mrf.mxu2 }
 0x2f7   :  { %v1715_v58 = vpop.f32.mrf.mxu0 }
 0x2f8   :  { %v3823_v9 = vpop.eup %3822  ;;  %v1716_v25 = vadd.f32 %v1715_v58, %v5935_v26  ;;  %v1728_v45 = vpop.f32.mrf.mxu1 }
 0x2f9   :  { %v1635_v2 = vadd.f32 1.0, %v3823_v9 }
 0x2fa   :  { %v1729_v14 = vadd.f32 %v1728_v45, %v1716_v25 }
 0x2fb   :  { %3826 = vrcp.f32 %v1635_v2  ;;  %v3825_v39 = vpop.eup %3824  ;;  %v1647_v26 = vand.u32 2147483648, %v1635_v2  ;;  %vm1641_vm9 = vweird.f32 %v1635_v2 }
 0x2fc   :  { %v3575_v29 = vmul.f32 -1.442695, %v1729_v14  ;;  %v1657_v21 = vmul.f32 %v3825_v39, %v4950_v34  ;;  %vm1662_vm12 = vweird.f32 %v3825_v39 }
 0x2fd   :  { %v1702_v52 = vpop.f32.mrf.mxu3  ;;  %vm1663_vm14 = vmor %vm1661_vm13, %vm1662_vm12 }
 0x2fe   :  { %3828 = vpow2.f32 %v3575_v29  ;;  %v1703_v16 = vadd.f32 %v1702_v52, %v1690_v20  ;;  %v4955_v22 = vpop.f32.mrf.mxu2  ;;  %v1658_v9 = vsub.f32 1.0, %v1657_v21  ;;  %v1645_v20 = vand.u32 2147483647, %v1635_v2 }
 0x2ff   :  { %v1717_v42 = vpop.f32.mrf.mxu0 }
 0x300   :  { %v3574_v62 = vmul.f32 -1.442695, %v1703_v16  ;;  %v1730_v12 = vpop.f32.mrf.mxu1  ;;  %v1659_v52 = vmul.f32 %v3825_v39, %v1658_v9  ;;  %vm1646_vm11 = vcmp.eq.f32.partialorder %v1645_v20, 8.507059e+37  ;;  %v5939_v9 = vld [vmem:[#allocation106_spill] sm:$0xff] }
 0x301   :  { %v3827_v56 = vpop.eup %3826 }
 0x302   :  { %v1637_v58 = vmul.f32 %v3827_v56, %v1635_v2  ;;  %3830 = vpow2.f32 %v3574_v62  ;;  %vm1642_vm8 = vweird.f32 %v3827_v56  ;;  %v1648_v62 = vor.u32 1.1754944e-38, %v1647_v26 }
 0x303   :  { %vm1643_vm10 = vmor %vm1641_vm9, %vm1642_vm8  ;;  %v1665_v26 = vand.u32 2147483647, %v4950_v34 }
 0x304   :  { %v3829_v25 = vpop.eup %3828  ;;  %v1638_v45 = vsub.f32 1.0, %v1637_v58  ;;  %v5937_v58 = vld [vmem:[#allocation91_spill] sm:$0xff] }
 0x305   :  { %v4958_v3 = vadd.f32 1.0, %v3829_v25  ;;  %v1704_v44 = vpop.f32.mrf.mxu3  ;;  %v1671_v55 = vadd.f32 %v5937_v58, %v1627_v1  ;;  %vm1666_vm15 = vcmp.eq.f32.partialorder %v1665_v26, 8.507059e+37 }
 0x306   :  { %v1639_v14 = vmul.f32 %v3827_v56, %v1638_v45  ;;  %v1743_v29 = vpop.f32.mrf.mxu2  ;;  %v1660_v44 = vadd.f32 %v3825_v39, %v1659_v52 }
 0x307   :  { %3832 = vrcp.f32 %v4958_v3  ;;  %v5938_v29 = vld [vmem:[#allocation87_spill] sm:$0xff]  ;;  %vm1812_vm5 = vweird.f32 %v4958_v3 }
 0x308   :  { %v3831_v42 = vpop.eup %3830  ;;  %v1640_v16 = vadd.f32 %v3827_v56, %v1639_v14  ;;  %v1767_v12 = vpop.f32.mrf.mxu0  ;;  %v413_v30 = vadd.f32 %v5939_v9, %v5938_v29  ;;  %v1664_v20 = vsel %vm1663_vm14, %v3825_v39, %v1660_v44 }
 0x309   :  { %v1787_v21 = vadd.f32 1.0, %v3831_v42  ;;  %v1668_v42 = vor.u32 1.1754944e-38, %v1667_v13 }
 0x30a   :  { %v1644_v25 = vsel %vm1643_vm10, %v3827_v56, %v1640_v16 }
 0x30b   :  { %v1780_v33 = vpop.f32.mrf.mxu1  ;;  %v1649_v45 = vsel %vm1646_vm11, %v1648_v62, %v1644_v25  ;;  %3834 = vrcp.f32 %v1787_v21  ;;  %v1799_v46 = vand.u32 2147483648, %v1787_v21  ;;  %v1797_v39 = vand.u32 2147483647, %v1787_v21 }
 0x30c   :  { %v1672_v14 = vmul.f32 %v1671_v55, %v1649_v45  ;;  %v1669_v55 = vsel %vm1666_vm15, %v1668_v42, %v1664_v20  ;;  %vm1793_vm1 = vweird.f32 %v1787_v21  ;;  %v1742_v42 = vadd.f32 %v4955_v22, %v4710_v54 }
 0x30d   :  { %v4965_v2 = vpop.eup %3832  ;;  %v1675_v58 = vsub.f32 1.0, %v1669_v55  ;;  %v1677_v13 = vmul.f32 %v1669_v55, %v4838_v35  ;;  %v1800_v20 = vor.u32 1.1754944e-38, %v1799_v46  ;;  %vm1798_vm3 = vcmp.eq.f32.partialorder %v1797_v39, 8.507059e+37  ;;  %v5941_v39 = vld [vmem:[#allocation25_spill] sm:$0xff] }
 0x30e   :  { %v1673_v1 = vadd.f32 %v1672_v14, %v413_v30  ;;  %v1754_v56 = vpop.f32.mrf.mxu3  ;;  %v1808_v52 = vmul.f32 %v4965_v2, %v4958_v3  ;;  %v1768_v30 = vadd.f32 %v1767_v12, %v4707_v36  ;;  %vm1813_vm4 = vweird.f32 %v4965_v2 }
 0x30f   :  { %v1755_v46 = vadd.f32 %v1754_v56, %v1742_v42  ;;  %vm1814_vm6 = vmor %vm1812_vm5, %vm1813_vm4  ;;  %v5948_v42 = vld [vmem:[#allocation29_spill] sm:$0xff] }
 0x310   :  { %3836 = vtanh.f32 %v1673_v1  ;;  %v1769_v16 = vpop.f32.mrf.mxu0  ;;  %v1809_v9 = vsub.f32 1.0, %v1808_v52 }
 0x311   :  { %v3835_v62 = vpop.eup %3834 }
 0x312   :  { %v1789_v45 = vmul.f32 %v3835_v62, %v1787_v21  ;;  %vm1794_vm0 = vweird.f32 %v3835_v62  ;;  %v1810_v1 = vmul.f32 %v4965_v2, %v1809_v9  ;;  %v1818_v21 = vand.u32 2147483648, %v4958_v3 }
 0x313   :  { %v1782_v25 = vpop.f32.mrf.mxu1  ;;  %vm1795_vm2 = vmor %vm1793_vm1, %vm1794_vm0 }
 0x314   :  { %v1790_v29 = vsub.f32 1.0, %v1789_v45  ;;  %v1781_v25 = vadd.f32 %v1780_v33, %v1768_v30  ;;  %v1811_v35 = vadd.f32 %v4965_v2, %v1810_v1  ;;  %v1816_v45 = vand.u32 2147483647, %v4958_v3  ;;  %v5944_v1 = vld [vmem:[#allocation27_spill] sm:$0xff] }
 0x316   :  { %v3837_v34 = vpop.eup %3836  ;;  %v1791_v14 = vmul.f32 %v3835_v62, %v1790_v29  ;;  %v1756_v44 = vpop.f32.mrf.mxu3  ;;  %v1815_v22 = vsel %vm1814_vm6, %v4965_v2, %v1811_v35  ;;  %vm1817_vm7 = vcmp.eq.f32.partialorder %v1816_v45, 8.507059e+37  ;;  %v5952_v35 = vld [vmem:[#allocation31_spill] sm:$0xff]  ;;  %v5957_v45 = vld [vmem:[#allocation48_spill] sm:$0xff] }
 0x317   :  { %v1676_v16 = vmul.f32 %v3837_v34, %v1675_v58  ;;  %v5942_v44 = vld [vmem:[#allocation28_spill] sm:$0xff] }
 0x318   :  { %v1792_v26 = vadd.f32 %v3835_v62, %v1791_v14 }
 0x319   :  { %v4974_v52 = vadd.f32 %v1677_v13, %v1676_v16  ;;  %v5943_v13 = vld [vmem:[#allocation50_spill] sm:$0xff]  ;;  %v5945_v16 = vld [vmem:[#allocation44_spill] sm:$0xff] }
 0x31a   :  { %v1796_v12 = vsel %vm1795_vm2, %v3835_v62, %v1792_v26  ;;  %v1819_v62 = vor.u32 1.1754944e-38, %v1818_v21  ;;  %v5946_v26 = vld [vmem:[#allocation30_spill] sm:$0xff] }
 0x31b   :  { %v1801_v29 = vsel %vm1798_vm3, %v1800_v20, %v1796_v12  ;;  %v1835_v58 = vpack.c.bf16 %v4974_v52, %v4974_v52  ;;  %v5947_v20 = vld [vmem:[#allocation54_spill] sm:$0xff]  ;;  %v5950_v12 = vld [vmem:[#allocation32_spill] sm:$0xff] }
 0x31c   :  { %v1822_v55 = vmul.f32 %v1801_v29, %v1781_v25  ;;  %v1820_v3 = vsel %vm1817_vm7, %v1819_v62, %v1815_v22  ;;  %v5949_v25 = vld [vmem:[#allocation45_spill] sm:$0xff]  ;;  %v5951_v29 = vld [vmem:[#allocation60_spill] sm:$0xff]  ;;  %v5954_v21 = vld [vmem:[#allocation34_spill] sm:$0xff] }
 0x31d   :  { %1844 = vmatmul.bf16.vlgmr.msrb.gmra.mxu2 %v1835_v58  ;;  %1857 = vmatmul.bf16.vlgmr.msra.gmra.mxu3 %v1835_v58  ;;  %v1825_v2 = vsub.f32 1.0, %v1820_v3  ;;  %v1827_v34 = vmul.f32 %v1820_v3, %v4863_v53  ;;  %v5940_v53 = vld [vmem:[#allocation41_spill] sm:$0xff]  ;;  %v5960_v62 = vld [vmem:[#allocation35_spill] sm:$0xff] }
 0x31e   :  { %v1823_v33 = vadd.f32 %v1822_v55, %v1755_v46  ;;  %1870 = vmatmul.bf16.vlgmr.msra.gmra.mxu0 %v1835_v58  ;;  %1932 = vmatmul.bf16.vlgmr.msra.gmra.mxu1 %v1835_v58  ;;  %v5955_v55 = vld [vmem:[#allocation65_spill] sm:$0xff] }
 0x31f   :  { %1989 = vmatpush.bf16.msrb.mxu2 %v4516_v37  ;;  %2002 = vmatpush.bf16.msra.mxu3 %v5817_v17  ;;  %v5956_v46 = vld [vmem:[#allocation33_spill] sm:$0xff] }
 0x320   :  { %3838 = vtanh.f32 %v1823_v33  ;;  %2015 = vmatpush.bf16.msra.mxu0 %v5818_v7  ;;  %2080 = vmatpush.bf16.msra.mxu1 %v5819_v59  ;;  %v5958_v33 = vld [vmem:[#allocation36_spill] sm:$0xff]  ;;  %v5959_v22 = vld [vmem:[#allocation69_spill] sm:$0xff] }
 0x321   :  { %v5961_v3 = vld [vmem:[#allocation53_spill] sm:$0xff] }
 0x323   :  { %1990 = vmatpush.bf16.msrb.mxu2 %v4528_v49  ;;  %2003 = vmatpush.bf16.msra.mxu3 %v5820_v61 }
 0x324   :  { %2016 = vmatpush.bf16.msra.mxu0 %v5821_v38  ;;  %2081 = vmatpush.bf16.msra.mxu1 %v5822_v31 }
 0x326   :  { %v3839_v56 = vpop.eup %3838 }
 0x327   :  { %v1826_v9 = vmul.f32 %v3839_v56, %v1825_v2  ;;  %1991 = vmatpush.bf16.msrb.mxu2 %v4538_v18  ;;  %2004 = vmatpush.bf16.msra.mxu3 %v5823_v63  ;;  %v5962_v2 = vld [vmem:[#allocation38_spill] sm:$0xff] }
 0x328   :  { %2017 = vmatpush.bf16.msra.mxu0 %v5824_v8  ;;  %2082 = vmatpush.bf16.msra.mxu1 %v5825_v28  ;;  %v5963_v56 = vld [vmem:[#allocation74_spill] sm:$0xff] }
 0x329   :  { %v4999_v30 = vadd.f32 %v1827_v34, %v1826_v9  ;;  %v5964_v9 = vld [vmem:[#allocation37_spill] sm:$0xff]  ;;  %v5965_v34 = vld [vmem:[#allocation59_spill] sm:$0xff] }
 0x32b   :  { %1992 = vmatpush.bf16.msrb.mxu2 %v5826_v51  ;;  %2005 = vmatpush.bf16.msra.mxu3 %v5827_v19  ;;  %v1923_v14 = vpack.c.bf16 %v4999_v30, %v4999_v30 }
 0x32c   :  { %2018 = vmatpush.bf16.msra.mxu0 %v5828_v23  ;;  %2083 = vmatpush.bf16.msra.mxu1 %v5829_v50 }
 0x32d   :  { %1945 = vmatmul.bf16.vlgmr.msra.gmra.mxu2 %v1923_v14  ;;  %1958 = vmatmul.bf16.vlgmr.msrb.gmra.mxu3 %v1835_v58 }
 0x32e   :  { %1971 = vmatmul.bf16.vlgmr.msrb.gmra.mxu0 %v1923_v14  ;;  %1984 = vmatmul.bf16.vlgmr.msrb.gmra.mxu1 %v1835_v58 }
 0x32f   :  { %1993 = vmatpush.bf16.msrb.mxu2 %v4558_v32  ;;  %2006 = vmatpush.bf16.msra.mxu3 %v5830_v40 }
 0x330   :  { %2019 = vmatpush.bf16.msra.mxu0 %v5831_v27  ;;  %2084 = vmatpush.bf16.msra.mxu1 %v5832_v6 }
 0x333   :  { %1994 = vmatpush.bf16.msrb.mxu2 %v4570_v11  ;;  %2007 = vmatpush.bf16.msra.mxu3 %v4572_v0 }
 0x334   :  { %2020 = vmatpush.bf16.msra.mxu0 %v4575_v57  ;;  %2085 = vmatpush.bf16.msra.mxu1 %v4230_v47 }
 0x337   :  { %1995 = vmatpush.bf16.msrb.mxu2 %v4580_v4  ;;  %2008 = vmatpush.bf16.msra.mxu3 %v4582_v43 }
 0x338   :  { %2021 = vmatpush.bf16.msra.mxu0 %v4585_v5  ;;  %2086 = vmatpush.bf16.msra.mxu1 %v4233_v60 }
 0x33b   :  { %1996 = vmatpush.bf16.msrb.mxu2 %v4590_v48  ;;  %2009 = vmatpush.bf16.msra.mxu3 %v4592_v24 }
 0x33c   :  { %2022 = vmatpush.bf16.msra.mxu0 %v4595_v41  ;;  %2087 = vmatpush.bf16.msra.mxu1 %v5941_v39 }
 0x33e   :  { %1997 = vmatmul.bf16.vlgmr.msrb.gmra.mxu2 %v1923_v14  ;;  %2010 = vmatmul.bf16.vlgmr.msra.gmra.mxu3 %v1835_v58  ;;  %v5953_v58 = vld [vmem:[#allocation47_spill] sm:$0xff] }
 0x33f   :  { %2093 = vmatpush.bf16.msra.mxu2 %v4240_v15  ;;  %2106 = vmatpush.bf16.msrb.mxu3 %v4238_v10 }
 0x340   :  { %2168 = vmatpush.bf16.msrb.mxu0 %v5940_v53  ;;  %2181 = vmatpush.bf16.msrb.mxu1 %v5943_v13 }
 0x341   :  { %2023 = vmatmul.bf16.vlgmr.msra.gmra.mxu0 %v1923_v14  ;;  %v5966_v14 = vld [vmem:[#allocation40_spill] sm:$0xff] }
 0x343   :  { %2094 = vmatpush.bf16.msra.mxu2 %v5942_v44  ;;  %2107 = vmatpush.bf16.msrb.mxu3 %v5944_v1 }
 0x344   :  { %2169 = vmatpush.bf16.msrb.mxu0 %v5945_v16  ;;  %2182 = vmatpush.bf16.msrb.mxu1 %v5947_v20 }
 0x347   :  { %2095 = vmatpush.bf16.msra.mxu2 %v5946_v26  ;;  %2108 = vmatpush.bf16.msrb.mxu3 %v5948_v42 }
 0x348   :  { %2170 = vmatpush.bf16.msrb.mxu0 %v5949_v25  ;;  %2183 = vmatpush.bf16.msrb.mxu1 %v5951_v29 }
 0x34b   :  { %2096 = vmatpush.bf16.msra.mxu2 %v5950_v12  ;;  %2109 = vmatpush.bf16.msrb.mxu3 %v5952_v35 }
 0x34c   :  { %2171 = vmatpush.bf16.msrb.mxu0 %v5953_v58  ;;  %2184 = vmatpush.bf16.msrb.mxu1 %v5955_v55  ;;  %v5995_v55 = vld [vmem:[#allocation56_spill] sm:$0xff] }
 0x34f   :  { %2097 = vmatpush.bf16.msra.mxu2 %v5954_v21  ;;  %2110 = vmatpush.bf16.msrb.mxu3 %v5956_v46  ;;  %v5967_v46 = vld [vmem:[#allocation78_spill] sm:$0xff] }
 0x350   :  { %2172 = vmatpush.bf16.msrb.mxu0 %v5957_v45  ;;  %2185 = vmatpush.bf16.msrb.mxu1 %v5959_v22  ;;  %v5968_v45 = vld [vmem:[#allocation39_spill] sm:$0xff]  ;;  %v5970_v22 = vld [vmem:[#allocation52_spill] sm:$0xff] }
 0x353   :  { %2098 = vmatpush.bf16.msra.mxu2 %v5958_v33  ;;  %2111 = vmatpush.bf16.msrb.mxu3 %v5960_v62  ;;  %v5969_v33 = vld [vmem:[#allocation51_spill] sm:$0xff]  ;;  %v5971_v62 = vld [vmem:[#allocation64_spill] sm:$0xff] }
 0x354   :  { %2173 = vmatpush.bf16.msrb.mxu0 %v5961_v3  ;;  %2186 = vmatpush.bf16.msrb.mxu1 %v5963_v56  ;;  %v5972_v3 = vld [vmem:[#allocation68_spill] sm:$0xff]  ;;  %v5974_v56 = vld [vmem:[#allocation55_spill] sm:$0xff] }
 0x357   :  { %2099 = vmatpush.bf16.msra.mxu2 %v5962_v2  ;;  %2112 = vmatpush.bf16.msrb.mxu3 %v5964_v9  ;;  %v5973_v2 = vld [vmem:[#allocation83_spill] sm:$0xff]  ;;  %v5975_v9 = vld [vmem:[#allocation57_spill] sm:$0xff] }
 0x358   :  { %2174 = vmatpush.bf16.msrb.mxu0 %v5965_v34  ;;  %2187 = vmatpush.bf16.msrb.mxu1 %v5967_v46  ;;  %v5976_v34 = vld [vmem:[#allocation72_spill] sm:$0xff]  ;;  %v5978_v46 = vld [vmem:[#allocation62_spill] sm:$0xff] }
 0x35b   :  { %2100 = vmatpush.bf16.msra.mxu2 %v5966_v14  ;;  %2113 = vmatpush.bf16.msrb.mxu3 %v5968_v45  ;;  %v5977_v14 = vld [vmem:[#allocation61_spill] sm:$0xff] }
 0x35c   :  { %2175 = vmatpush.bf16.msrb.mxu0 %v5971_v62  ;;  %2188 = vmatpush.bf16.msrb.mxu1 %v5973_v2  ;;  %v5979_v45 = vld [vmem:[#allocation77_spill] sm:$0xff]  ;;  %v5984_v2 = vld [vmem:[#allocation71_spill] sm:$0xff] }
 0x35d   :  { %v5982_v62 = vld [vmem:[#allocation81_spill] sm:$0xff] }
 0x35f   :  { %2194 = vmatpush.bf16.msrb.mxu2 %v5969_v33  ;;  %2207 = vmatpush.bf16.msra.mxu3 %v5970_v22  ;;  %v5980_v33 = vld [vmem:[#allocation66_spill] sm:$0xff]  ;;  %v5981_v22 = vld [vmem:[#allocation67_spill] sm:$0xff] }
 0x360   :  { %2220 = vmatpush.bf16.msra.mxu0 %v5972_v3  ;;  %v5983_v3 = vld [vmem:[#allocation70_spill] sm:$0xff] }
 0x363   :  { %2195 = vmatpush.bf16.msrb.mxu2 %v5974_v56  ;;  %2208 = vmatpush.bf16.msra.mxu3 %v5975_v9  ;;  %v5985_v56 = vld [vmem:[#allocation86_spill] sm:$0xff]  ;;  %v5986_v9 = vld [vmem:[#allocation75_spill] sm:$0xff] }
 0x364   :  { %2221 = vmatpush.bf16.msra.mxu0 %v5976_v34  ;;  %v5987_v34 = vld [vmem:[#allocation76_spill] sm:$0xff] }
 0x367   :  { %2196 = vmatpush.bf16.msrb.mxu2 %v5977_v14  ;;  %2209 = vmatpush.bf16.msra.mxu3 %v5978_v46  ;;  %v5988_v14 = vld [vmem:[#allocation88_spill] sm:$0xff]  ;;  %v5989_v46 = vld [vmem:[#allocation79_spill] sm:$0xff] }
 0x368   :  { %2222 = vmatpush.bf16.msra.mxu0 %v5979_v45  ;;  %v5990_v45 = vld [vmem:[#allocation80_spill] sm:$0xff] }
 0x36b   :  { %2197 = vmatpush.bf16.msrb.mxu2 %v5980_v33  ;;  %2210 = vmatpush.bf16.msra.mxu3 %v5981_v22  ;;  %v5991_v33 = vld [vmem:[#allocation89_spill] sm:$0xff]  ;;  %v5992_v22 = vld [vmem:[#allocation84_spill] sm:$0xff] }
 0x36c   :  { %2223 = vmatpush.bf16.msra.mxu0 %v5982_v62  ;;  %v5993_v62 = vld [vmem:[#allocation85_spill] sm:$0xff] }
 0x36f   :  { %2198 = vmatpush.bf16.msrb.mxu2 %v5983_v3  ;;  %2211 = vmatpush.bf16.msra.mxu3 %v5984_v2  ;;  %v5994_v3 = vld [vmem:[#allocation90_spill] sm:$0xff] }
 0x370   :  { %2224 = vmatpush.bf16.msra.mxu0 %v5985_v56 }
 0x373   :  { %2199 = vmatpush.bf16.msrb.mxu2 %v5986_v9  ;;  %2212 = vmatpush.bf16.msra.mxu3 %v5987_v34  ;;  %v5996_v9 = vld [vmem:[#allocation107_spill] sm:$0xff] }
 0x374   :  { %2225 = vmatpush.bf16.msra.mxu0 %v5988_v14  ;;  %v387_v21 = vadd.f32 %v5996_v9, %v5995_v55  ;;  %v5997_v14 = vld [vmem:[#allocation58_spill] sm:$0xff] }
 0x375   :  { %v5998_v55 = vld [vmem:[#allocation42_spill] sm:$0xff] }
 0x377   :  { %2200 = vmatpush.bf16.msrb.mxu2 %v5989_v46  ;;  %2213 = vmatpush.bf16.msra.mxu3 %v5990_v45 }
 0x378   :  { %2226 = vmatpush.bf16.msra.mxu0 %v5991_v33 }
 0x37b   :  { %2201 = vmatpush.bf16.msrb.mxu2 %v5992_v22  ;;  %2214 = vmatpush.bf16.msra.mxu3 %v5993_v62 }
 0x37c   :  { %2227 = vmatpush.bf16.msra.mxu0 %v5994_v3 }
 0x39b   :  { %v1871_v2 = vpop.f32.mrf.mxu0  ;;  %v1933_v56 = vpop.f32.mrf.mxu1 }
 0x39c   :  { %v1934_v16 = vadd.f32 %v1933_v56, %v5998_v55 }
 0x3a0   :  { %v1845_v34 = vpop.f32.mrf.mxu2  ;;  %v1858_v58 = vpop.f32.mrf.mxu3 }
 0x3a1   :  { %v1875_v35 = vadd.f32 %v1845_v34, %v5997_v14  ;;  %v1895_v46 = vadd.f32 %v1858_v58, %v387_v21 }
 0x3a3   :  { %v3576_v29 = vmul.f32 -1.442695, %v1875_v35  ;;  %v3577_v45 = vmul.f32 -1.442695, %v1895_v46  ;;  %v1873_v12 = vpop.f32.mrf.mxu0  ;;  %v1935_v33 = vpop.f32.mrf.mxu1 }
 0x3a4   :  { %v5999_v12 = vld [vmem:[#allocation115_spill] sm:$0xff] }
 0x3a5   :  { %3840 = vpow2.f32 %v3576_v29 }
 0x3a6   :  { %3842 = vpow2.f32 %v3577_v45 }
 0x3a8   :  { %v1847_v22 = vpop.f32.mrf.mxu2  ;;  %v1860_v62 = vpop.f32.mrf.mxu3 }
 0x3ab   :  { %v3841_v25 = vpop.eup %3840  ;;  %v1972_v3 = vpop.f32.mrf.mxu0 }
 0x3ac   :  { %v5082_v42 = vpop.f32.mrf.mxu1  ;;  %v3843_v20 = vpop.eup %3842  ;;  %v1879_v26 = vadd.f32 1.0, %v3841_v25 }
 0x3ad   :  { %v1899_v9 = vadd.f32 1.0, %v3843_v20 }
 0x3ae   :  { %3844 = vrcp.f32 %v1879_v26  ;;  %v1891_v13 = vand.u32 2147483648, %v1879_v26  ;;  %vm1885_vm9 = vweird.f32 %v1879_v26 }
 0x3af   :  { %3846 = vrcp.f32 %v1899_v9  ;;  %vm1905_vm13 = vweird.f32 %v1899_v9 }
 0x3b0   :  { %v1946_v58 = vpop.f32.mrf.mxu2  ;;  %v1959_v35 = vpop.f32.mrf.mxu3 }
 0x3b1   :  { %v1947_v21 = vadd.f32 %v1946_v58, %v1934_v16  ;;  %v1960_v46 = vadd.f32 %v1959_v35, %v5999_v12  ;;  %v1889_v16 = vand.u32 2147483647, %v1879_v26 }
 0x3b3   :  { %v3578_v29 = vmul.f32 -1.442695, %v1947_v21  ;;  %v1973_v45 = vadd.f32 %v1972_v3, %v1960_v46  ;;  %v1974_v33 = vpop.f32.mrf.mxu0  ;;  %v1892_v21 = vor.u32 1.1754944e-38, %v1891_v13  ;;  %vm1890_vm11 = vcmp.eq.f32.partialorder %v1889_v16, 8.507059e+37 }
 0x3b4   :  { %v1987_v22 = vpop.f32.mrf.mxu1  ;;  %v3845_v62 = vpop.eup %3844  ;;  %v1909_v13 = vand.u32 2147483647, %v1899_v9 }
 0x3b5   :  { %v3847_v34 = vpop.eup %3846  ;;  %v1881_v14 = vmul.f32 %v3845_v62, %v1879_v26  ;;  %3848 = vpow2.f32 %v3578_v29  ;;  %v3579_v1 = vmul.f32 -1.442695, %v1973_v45  ;;  %vm1886_vm8 = vweird.f32 %v3845_v62  ;;  %v6000_v45 = vld [vmem:[#allocation91_spill] sm:$0xff] }
 0x3b6   :  { %v1901_v25 = vmul.f32 %v3847_v34, %v1899_v9  ;;  %vm1887_vm10 = vmor %vm1885_vm9, %vm1886_vm8  ;;  %v1915_v22 = vadd.f32 %v6000_v45, %v1871_v2  ;;  %vm1906_vm12 = vweird.f32 %v3847_v34  ;;  %v1911_v26 = vand.u32 2147483648, %v1899_v9 }
 0x3b7   :  { %v1882_v20 = vsub.f32 1.0, %v1881_v14  ;;  %3850 = vpow2.f32 %v3579_v1  ;;  %vm1907_vm14 = vmor %vm1905_vm13, %vm1906_vm12  ;;  %vm1910_vm15 = vcmp.eq.f32.partialorder %v1909_v13, 8.507059e+37 }
 0x3b8   :  { %v1902_v56 = vsub.f32 1.0, %v1901_v25  ;;  %v1948_v55 = vpop.f32.mrf.mxu2  ;;  %v1961_v44 = vpop.f32.mrf.mxu3  ;;  %v6001_v25 = vld [vmem:[#allocation87_spill] sm:$0xff] }
 0x3b9   :  { %v1883_v39 = vmul.f32 %v3845_v62, %v1882_v20  ;;  %v6002_v20 = vld [vmem:[#allocation108_spill] sm:$0xff] }
 0x3ba   :  { %v1903_v58 = vmul.f32 %v3847_v34, %v1902_v56  ;;  %v416_v56 = vadd.f32 %v6002_v20, %v6001_v25 }
 0x3bb   :  { %v3849_v35 = vpop.eup %3848  ;;  %v1884_v3 = vadd.f32 %v3845_v62, %v1883_v39 }
 0x3bc   :  { %v2031_v46 = vadd.f32 1.0, %v3849_v35  ;;  %v1904_v55 = vadd.f32 %v3847_v34, %v1903_v58 }
 0x3bd   :  { %v3851_v29 = vpop.eup %3850  ;;  %v1888_v14 = vsel %vm1887_vm10, %v3845_v62, %v1884_v3  ;;  %v1912_v3 = vor.u32 1.1754944e-38, %v1911_v26 }
 0x3be   :  { %v2024_v33 = vpop.f32.mrf.mxu0  ;;  %v1893_v1 = vsel %vm1890_vm11, %v1892_v21, %v1888_v14  ;;  %3852 = vrcp.f32 %v2031_v46  ;;  %v5087_v44 = vadd.f32 1.0, %v3851_v29  ;;  %v1908_v16 = vsel %vm1907_vm14, %v3847_v34, %v1904_v55 }
 0x3bf   :  { %v1916_v39 = vmul.f32 %v1915_v22, %v1893_v1  ;;  %v1913_v29 = vsel %vm1910_vm15, %v1912_v3, %v1908_v16  ;;  %v2041_v9 = vand.u32 2147483647, %v2031_v46  ;;  %v2043_v25 = vand.u32 2147483648, %v2031_v46 }
 0x3c0   :  { %3854 = vrcp.f32 %v5087_v44  ;;  %v1919_v20 = vsub.f32 1.0, %v1913_v29  ;;  %v1921_v13 = vmul.f32 %v1913_v29, %v4974_v52  ;;  %vm2037_vm1 = vweird.f32 %v2031_v46 }
 0x3c1   :  { %v1917_v35 = vadd.f32 %v1916_v39, %v416_v56  ;;  %v1998_v2 = vpop.f32.mrf.mxu2  ;;  %v2011_v62 = vpop.f32.mrf.mxu3  ;;  %vm2042_vm3 = vcmp.eq.f32.partialorder %v2041_v9, 8.507059e+37  ;;  %vm2056_vm5 = vweird.f32 %v5087_v44 }
 0x3c2   :  { %v2012_v39 = vadd.f32 %v2011_v62, %v4707_v36 }
 0x3c3   :  { %3856 = vtanh.f32 %v1917_v35 }
 0x3c4   :  { %v3853_v58 = vpop.eup %3852 }
 0x3c5   :  { %v2033_v45 = vmul.f32 %v3853_v58, %v2031_v46  ;;  %vm2038_vm0 = vweird.f32 %v3853_v58 }
 0x3c6   :  { %v2026_v21 = vpop.f32.mrf.mxu0  ;;  %v3855_v14 = vpop.eup %3854  ;;  %vm2039_vm2 = vmor %vm2037_vm1, %vm2038_vm0 }
 0x3c7   :  { %v2052_v22 = vmul.f32 %v3855_v14, %v5087_v44  ;;  %v2034_v1 = vsub.f32 1.0, %v2033_v45  ;;  %v2044_v21 = vor.u32 1.1754944e-38, %v2043_v25  ;;  %v1986_v45 = vadd.f32 %v5082_v42, %v4710_v54 }
 0x3c8   :  { %vm2057_vm4 = vweird.f32 %v3855_v14  ;;  %v2060_v25 = vand.u32 2147483647, %v5087_v44 }
 0x3c9   :  { %v3857_v12 = vpop.eup %3856  ;;  %v2053_v56 = vsub.f32 1.0, %v2052_v22  ;;  %v2035_v53 = vmul.f32 %v3853_v58, %v2034_v1  ;;  %v2000_v34 = vpop.f32.mrf.mxu2  ;;  %v2025_v22 = vadd.f32 %v2024_v33, %v2012_v39  ;;  %v1999_v46 = vadd.f32 %v1998_v2, %v1986_v45  ;;  %vm2058_vm6 = vmor %vm2056_vm5, %vm2057_vm4  ;;  %v6005_v39 = vld [vmem:[#allocation25_spill] sm:$0xff] }
 0x3ca   :  { %v2013_v55 = vpop.f32.mrf.mxu3  ;;  %v1920_v26 = vmul.f32 %v3857_v12, %v1919_v20  ;;  %vm2061_vm7 = vcmp.eq.f32.partialorder %v2060_v25, 8.507059e+37  ;;  %v6006_v34 = vld [vmem:[#allocation28_spill] sm:$0xff]  ;;  %v6013_v45 = vld [vmem:[#allocation45_spill] sm:$0xff] }
 0x3cb   :  { %v2054_v35 = vmul.f32 %v3855_v14, %v2053_v56  ;;  %v2036_v16 = vadd.f32 %v3853_v58, %v2035_v53  ;;  %v2062_v53 = vand.u32 2147483648, %v5087_v44  ;;  %v6004_v56 = vld [vmem:[#allocation41_spill] sm:$0xff]  ;;  %v6007_v55 = vld [vmem:[#allocation50_spill] sm:$0xff]  ;;  %v6021_v25 = vld [vmem:[#allocation48_spill] sm:$0xff] }
 0x3cc   :  { %v5095_v3 = vadd.f32 %v1921_v13, %v1920_v26  ;;  %v6008_v26 = vld [vmem:[#allocation27_spill] sm:$0xff]  ;;  %v6009_v13 = vld [vmem:[#allocation44_spill] sm:$0xff] }
 0x3cd   :  { %v2040_v10 = vsel %vm2039_vm2, %v3853_v58, %v2036_v16  ;;  %v2055_v12 = vadd.f32 %v3855_v14, %v2054_v35  ;;  %v6010_v35 = vld [vmem:[#allocation30_spill] sm:$0xff] }
 0x3ce   :  { %v5101_v62 = vpack.c.bf16 %v5095_v3, %v5095_v3  ;;  %v2045_v52 = vsel %vm2042_vm3, %v2044_v21, %v2040_v10  ;;  %v2063_v10 = vor.u32 1.1754944e-38, %v2062_v53  ;;  %v6011_v16 = vld [vmem:[#allocation54_spill] sm:$0xff]  ;;  %v6012_v21 = vld [vmem:[#allocation29_spill] sm:$0xff] }
 0x3cf   :  { %v2066_v29 = vmul.f32 %v2045_v52, %v2025_v22  ;;  %v2059_v33 = vsel %vm2058_vm6, %v3855_v14, %v2055_v12  ;;  %v6014_v22 = vld [vmem:[#allocation32_spill] sm:$0xff]  ;;  %v6016_v12 = vld [vmem:[#allocation31_spill] sm:$0xff]  ;;  %v6018_v53 = vld [vmem:[#allocation34_spill] sm:$0xff] }
 0x3d0   :  { %2088 = vmatmul.bf16.vlgmr.msra.gmra.mxu1 %v5101_v62  ;;  %2101 = vmatmul.bf16.vlgmr.msra.gmra.mxu2 %v5101_v62  ;;  %v2064_v44 = vsel %vm2061_vm7, %v2063_v10, %v2059_v33  ;;  %v6017_v52 = vld [vmem:[#allocation47_spill] sm:$0xff]  ;;  %v6023_v33 = vld [vmem:[#allocation69_spill] sm:$0xff] }
 0x3d1   :  { %v2067_v42 = vadd.f32 %v2066_v29, %v1999_v46  ;;  %2114 = vmatmul.bf16.vlgmr.msrb.gmra.mxu3 %v5101_v62  ;;  %2176 = vmatmul.bf16.vlgmr.msrb.gmra.mxu0 %v5101_v62  ;;  %v2069_v2 = vsub.f32 1.0, %v2064_v44  ;;  %v2071_v1 = vmul.f32 %v2064_v44, %v4999_v30  ;;  %v6003_v30 = vld [vmem:[#allocation26_spill] sm:$0xff]  ;;  %v6019_v46 = vld [vmem:[#allocation65_spill] sm:$0xff]  ;;  %v6024_v10 = vld [vmem:[#allocation35_spill] sm:$0xff] }
 0x3d2   :  { %2233 = vmatpush.bf16.msra.mxu1 %v4516_v37  ;;  %2246 = vmatpush.bf16.msra.mxu2 %v5817_v17  ;;  %v6020_v29 = vld [vmem:[#allocation33_spill] sm:$0xff] }
 0x3d3   :  { %3858 = vtanh.f32 %v2067_v42  ;;  %2259 = vmatpush.bf16.msrb.mxu3 %v5818_v7  ;;  %2324 = vmatpush.bf16.msrb.mxu0 %v5819_v59  ;;  %v6022_v42 = vld [vmem:[#allocation36_spill] sm:$0xff]  ;;  %v6025_v44 = vld [vmem:[#allocation53_spill] sm:$0xff] }
 0x3d6   :  { %2234 = vmatpush.bf16.msra.mxu1 %v4528_v49  ;;  %2247 = vmatpush.bf16.msra.mxu2 %v5820_v61 }
 0x3d7   :  { %2260 = vmatpush.bf16.msrb.mxu3 %v5821_v38  ;;  %2325 = vmatpush.bf16.msrb.mxu0 %v5822_v31 }
 0x3d9   :  { %v3859_v58 = vpop.eup %3858 }
 0x3da   :  { %v2070_v14 = vmul.f32 %v3859_v58, %v2069_v2  ;;  %2235 = vmatpush.bf16.msra.mxu1 %v4538_v18  ;;  %2248 = vmatpush.bf16.msra.mxu2 %v5823_v63  ;;  %v6026_v2 = vld [vmem:[#allocation38_spill] sm:$0xff] }
 0x3db   :  { %2261 = vmatpush.bf16.msrb.mxu3 %v5824_v8  ;;  %2326 = vmatpush.bf16.msrb.mxu0 %v5825_v28  ;;  %v6027_v58 = vld [vmem:[#allocation74_spill] sm:$0xff] }
 0x3dc   :  { %v5123_v20 = vadd.f32 %v2071_v1, %v2070_v14  ;;  %v6028_v14 = vld [vmem:[#allocation37_spill] sm:$0xff]  ;;  %v6029_v1 = vld [vmem:[#allocation59_spill] sm:$0xff] }
 0x3de   :  { %2236 = vmatpush.bf16.msra.mxu1 %v5826_v51  ;;  %2249 = vmatpush.bf16.msra.mxu2 %v5827_v19  ;;  %v2167_v9 = vpack.c.bf16 %v5123_v20, %v5123_v20 }
 0x3df   :  { %2262 = vmatpush.bf16.msrb.mxu3 %v5828_v23  ;;  %2327 = vmatpush.bf16.msrb.mxu0 %v5829_v50 }
 0x3e0   :  { %2189 = vmatmul.bf16.vlgmr.msrb.gmra.mxu1 %v2167_v9  ;;  %2202 = vmatmul.bf16.vlgmr.msrb.gmra.mxu2 %v5101_v62 }
 0x3e1   :  { %2215 = vmatmul.bf16.vlgmr.msra.gmra.mxu3 %v2167_v9  ;;  %2228 = vmatmul.bf16.vlgmr.msra.gmra.mxu0 %v5101_v62 }
 0x3e2   :  { %2237 = vmatpush.bf16.msra.mxu1 %v4558_v32  ;;  %2250 = vmatpush.bf16.msra.mxu2 %v5830_v40 }
 0x3e3   :  { %2263 = vmatpush.bf16.msrb.mxu3 %v5831_v27  ;;  %2328 = vmatpush.bf16.msrb.mxu0 %v5832_v6 }
 0x3e6   :  { %2238 = vmatpush.bf16.msra.mxu1 %v4570_v11  ;;  %2251 = vmatpush.bf16.msra.mxu2 %v4572_v0 }
 0x3e7   :  { %2264 = vmatpush.bf16.msrb.mxu3 %v4575_v57  ;;  %2329 = vmatpush.bf16.msrb.mxu0 %v4230_v47 }
 0x3ea   :  { %2239 = vmatpush.bf16.msra.mxu1 %v4580_v4  ;;  %2252 = vmatpush.bf16.msra.mxu2 %v4582_v43 }
 0x3eb   :  { %2265 = vmatpush.bf16.msrb.mxu3 %v4585_v5  ;;  %2330 = vmatpush.bf16.msrb.mxu0 %v4233_v60 }
 0x3ee   :  { %2240 = vmatpush.bf16.msra.mxu1 %v4590_v48  ;;  %2253 = vmatpush.bf16.msra.mxu2 %v4592_v24 }
 0x3ef   :  { %2266 = vmatpush.bf16.msrb.mxu3 %v4595_v41  ;;  %2331 = vmatpush.bf16.msrb.mxu0 %v6005_v39 }
 0x3f1   :  { %2241 = vmatmul.bf16.vlgmr.msra.gmra.mxu1 %v2167_v9  ;;  %2254 = vmatmul.bf16.vlgmr.msra.gmra.mxu2 %v5101_v62  ;;  %v6015_v62 = vld [vmem:[#allocation60_spill] sm:$0xff] }
 0x3f2   :  { %2337 = vmatpush.bf16.msrb.mxu1 %v4240_v15  ;;  %2350 = vmatpush.bf16.msrb.mxu2 %v6003_v30 }
 0x3f3   :  { %2412 = vmatpush.bf16.msra.mxu3 %v6004_v56  ;;  %2425 = vmatpush.bf16.msra.mxu0 %v6007_v55 }
 0x3f4   :  { %2267 = vmatmul.bf16.vlgmr.msrb.gmra.mxu3 %v2167_v9  ;;  %v6030_v9 = vld [vmem:[#allocation40_spill] sm:$0xff] }
 0x3f6   :  { %2338 = vmatpush.bf16.msrb.mxu1 %v6006_v34  ;;  %2351 = vmatpush.bf16.msrb.mxu2 %v6008_v26 }
 0x3f7   :  { %2413 = vmatpush.bf16.msra.mxu3 %v6009_v13  ;;  %2426 = vmatpush.bf16.msra.mxu0 %v6011_v16 }
 0x3fa   :  { %2339 = vmatpush.bf16.msrb.mxu1 %v6010_v35  ;;  %2352 = vmatpush.bf16.msrb.mxu2 %v6012_v21 }
 0x3fb   :  { %2414 = vmatpush.bf16.msra.mxu3 %v6013_v45  ;;  %2427 = vmatpush.bf16.msra.mxu0 %v6015_v62 }
 0x3fe   :  { %2340 = vmatpush.bf16.msrb.mxu1 %v6014_v22  ;;  %2353 = vmatpush.bf16.msrb.mxu2 %v6016_v12  ;;  %v6062_v12 = vld [vmem:[#allocation109_spill] sm:$0xff] }
 0x3ff   :  { %2415 = vmatpush.bf16.msra.mxu3 %v6017_v52  ;;  %2428 = vmatpush.bf16.msra.mxu0 %v6019_v46 }
 0x402   :  { %2341 = vmatpush.bf16.msrb.mxu1 %v6018_v53  ;;  %2354 = vmatpush.bf16.msrb.mxu2 %v6020_v29  ;;  %v6031_v29 = vld [vmem:[#allocation78_spill] sm:$0xff] }
 0x403   :  { %2416 = vmatpush.bf16.msra.mxu3 %v6021_v25  ;;  %2429 = vmatpush.bf16.msra.mxu0 %v6023_v33  ;;  %v6032_v25 = vld [vmem:[#allocation39_spill] sm:$0xff]  ;;  %v6034_v33 = vld [vmem:[#allocation52_spill] sm:$0xff] }
 0x406   :  { %2342 = vmatpush.bf16.msrb.mxu1 %v6022_v42  ;;  %2355 = vmatpush.bf16.msrb.mxu2 %v6024_v10  ;;  %v6033_v42 = vld [vmem:[#allocation51_spill] sm:$0xff]  ;;  %v6035_v10 = vld [vmem:[#allocation64_spill] sm:$0xff] }
 0x407   :  { %2417 = vmatpush.bf16.msra.mxu3 %v6025_v44  ;;  %2430 = vmatpush.bf16.msra.mxu0 %v6027_v58  ;;  %v6036_v44 = vld [vmem:[#allocation68_spill] sm:$0xff]  ;;  %v6038_v58 = vld [vmem:[#allocation55_spill] sm:$0xff] }
 0x40a   :  { %2343 = vmatpush.bf16.msrb.mxu1 %v6026_v2  ;;  %2356 = vmatpush.bf16.msrb.mxu2 %v6028_v14  ;;  %v6037_v2 = vld [vmem:[#allocation83_spill] sm:$0xff]  ;;  %v6039_v14 = vld [vmem:[#allocation57_spill] sm:$0xff] }
 0x40b   :  { %2418 = vmatpush.bf16.msra.mxu3 %v6029_v1  ;;  %2431 = vmatpush.bf16.msra.mxu0 %v6031_v29  ;;  %v6040_v1 = vld [vmem:[#allocation72_spill] sm:$0xff]  ;;  %v6042_v29 = vld [vmem:[#allocation62_spill] sm:$0xff] }
 0x40e   :  { %2344 = vmatpush.bf16.msrb.mxu1 %v6030_v9  ;;  %2357 = vmatpush.bf16.msrb.mxu2 %v6032_v25  ;;  %v6041_v9 = vld [vmem:[#allocation61_spill] sm:$0xff] }
 0x40f   :  { %2419 = vmatpush.bf16.msra.mxu3 %v6035_v10  ;;  %2432 = vmatpush.bf16.msra.mxu0 %v6037_v2  ;;  %v6043_v25 = vld [vmem:[#allocation77_spill] sm:$0xff]  ;;  %v6048_v2 = vld [vmem:[#allocation71_spill] sm:$0xff] }
 0x410   :  { %v6046_v10 = vld [vmem:[#allocation81_spill] sm:$0xff] }
 0x412   :  { %2438 = vmatpush.bf16.msra.mxu1 %v6033_v42  ;;  %2451 = vmatpush.bf16.msra.mxu2 %v6034_v33  ;;  %v6044_v42 = vld [vmem:[#allocation66_spill] sm:$0xff]  ;;  %v6045_v33 = vld [vmem:[#allocation67_spill] sm:$0xff] }
 0x413   :  { %2464 = vmatpush.bf16.msrb.mxu3 %v6036_v44  ;;  %v6047_v44 = vld [vmem:[#allocation70_spill] sm:$0xff] }
 0x416   :  { %2439 = vmatpush.bf16.msra.mxu1 %v6038_v58  ;;  %2452 = vmatpush.bf16.msra.mxu2 %v6039_v14  ;;  %v6049_v58 = vld [vmem:[#allocation86_spill] sm:$0xff]  ;;  %v6050_v14 = vld [vmem:[#allocation75_spill] sm:$0xff] }
 0x417   :  { %2465 = vmatpush.bf16.msrb.mxu3 %v6040_v1  ;;  %v6051_v1 = vld [vmem:[#allocation76_spill] sm:$0xff] }
 0x41a   :  { %2440 = vmatpush.bf16.msra.mxu1 %v6041_v9  ;;  %2453 = vmatpush.bf16.msra.mxu2 %v6042_v29  ;;  %v6052_v9 = vld [vmem:[#allocation88_spill] sm:$0xff]  ;;  %v6053_v29 = vld [vmem:[#allocation79_spill] sm:$0xff] }
 0x41b   :  { %2466 = vmatpush.bf16.msrb.mxu3 %v6043_v25  ;;  %v6054_v25 = vld [vmem:[#allocation80_spill] sm:$0xff] }
 0x41e   :  { %2441 = vmatpush.bf16.msra.mxu1 %v6044_v42  ;;  %2454 = vmatpush.bf16.msra.mxu2 %v6045_v33  ;;  %v6055_v42 = vld [vmem:[#allocation89_spill] sm:$0xff]  ;;  %v6056_v33 = vld [vmem:[#allocation84_spill] sm:$0xff] }
 0x41f   :  { %2467 = vmatpush.bf16.msrb.mxu3 %v6046_v10  ;;  %v6057_v10 = vld [vmem:[#allocation85_spill] sm:$0xff] }
 0x422   :  { %2442 = vmatpush.bf16.msra.mxu1 %v6047_v44  ;;  %2455 = vmatpush.bf16.msra.mxu2 %v6048_v2  ;;  %v6058_v44 = vld [vmem:[#allocation90_spill] sm:$0xff]  ;;  %v6059_v2 = vld [vmem:[#allocation43_spill] sm:$0xff] }
 0x423   :  { %2468 = vmatpush.bf16.msrb.mxu3 %v6049_v58  ;;  %v6060_v58 = vld [vmem:[#allocation63_spill] sm:$0xff] }
 0x424   :  { %v360_v46 = vadd.f32 %v6060_v58, %v6059_v2  ;;  %v6063_v58 = vld [vmem:[#allocation42_spill] sm:$0xff] }
 0x426   :  { %2443 = vmatpush.bf16.msra.mxu1 %v6050_v14  ;;  %2456 = vmatpush.bf16.msra.mxu2 %v6051_v1 }
 0x427   :  { %2469 = vmatpush.bf16.msrb.mxu3 %v6052_v9  ;;  %v6061_v9 = vld [vmem:[#allocation56_spill] sm:$0xff] }
 0x42a   :  { %2444 = vmatpush.bf16.msra.mxu1 %v6053_v29  ;;  %2457 = vmatpush.bf16.msra.mxu2 %v6054_v25  ;;  %v389_v29 = vadd.f32 %v6062_v12, %v6061_v9 }
 0x42b   :  { %2470 = vmatpush.bf16.msrb.mxu3 %v6055_v42 }
 0x42e   :  { %2445 = vmatpush.bf16.msra.mxu1 %v6056_v33  ;;  %2458 = vmatpush.bf16.msra.mxu2 %v6057_v10 }
 0x42f   :  { %2471 = vmatpush.bf16.msrb.mxu3 %v6058_v44 }
 0x44d   :  { %v2089_v14 = vpop.f32.mrf.mxu1 }
 0x44e   :  { %v2119_v53 = vadd.f32 %v2089_v14, %v360_v46  ;;  %v2177_v1 = vpop.f32.mrf.mxu0 }
 0x44f   :  { %v2178_v2 = vadd.f32 %v2177_v1, %v6063_v58 }
 0x450   :  { %v3580_v52 = vmul.f32 -1.442695, %v2119_v53 }
 0x452   :  { %3860 = vpow2.f32 %v3580_v52 }
 0x453   :  { %v2102_v25 = vpop.f32.mrf.mxu2 }
 0x454   :  { %v2139_v62 = vadd.f32 %v2102_v25, %v389_v29  ;;  %v2115_v42 = vpop.f32.mrf.mxu3  ;;  %v6064_v25 = vld [vmem:[#allocation115_spill] sm:$0xff] }
 0x455   :  { %v2091_v22 = vpop.f32.mrf.mxu1 }
 0x456   :  { %v3581_v33 = vmul.f32 -1.442695, %v2139_v62  ;;  %v2179_v45 = vpop.f32.mrf.mxu0 }
 0x458   :  { %v3861_v10 = vpop.eup %3860  ;;  %3862 = vpow2.f32 %v3581_v33 }
 0x459   :  { %v2123_v44 = vadd.f32 1.0, %v3861_v10 }
 0x45b   :  { %3864 = vrcp.f32 %v2123_v44  ;;  %v2104_v21 = vpop.f32.mrf.mxu2  ;;  %vm2129_vm9 = vweird.f32 %v2123_v44 }
 0x45c   :  { %v2117_v46 = vpop.f32.mrf.mxu3  ;;  %v2135_v21 = vand.u32 2147483648, %v2123_v44 }
 0x45d   :  { %v2190_v14 = vpop.f32.mrf.mxu1  ;;  %v2133_v46 = vand.u32 2147483647, %v2123_v44 }
 0x45e   :  { %v3863_v53 = vpop.eup %3862  ;;  %v2191_v16 = vadd.f32 %v2190_v14, %v2178_v2  ;;  %v5211_v35 = vpop.f32.mrf.mxu0 }
 0x45f   :  { %v2143_v12 = vadd.f32 1.0, %v3863_v53  ;;  %vm2134_vm11 = vcmp.eq.f32.partialorder %v2133_v46, 8.507059e+37 }
 0x460   :  { %v3582_v52 = vmul.f32 -1.442695, %v2191_v16 }
 0x461   :  { %v3865_v29 = vpop.eup %3864  ;;  %3866 = vrcp.f32 %v2143_v12  ;;  %v2153_v39 = vand.u32 2147483647, %v2143_v12  ;;  %vm2149_vm13 = vweird.f32 %v2143_v12 }
 0x462   :  { %v2125_v22 = vmul.f32 %v3865_v29, %v2123_v44  ;;  %3868 = vpow2.f32 %v3582_v52  ;;  %vm2130_vm8 = vweird.f32 %v3865_v29  ;;  %v2136_v52 = vor.u32 1.1754944e-38, %v2135_v21 }
 0x463   :  { %v2203_v45 = vpop.f32.mrf.mxu2  ;;  %vm2131_vm10 = vmor %vm2129_vm9, %vm2130_vm8  ;;  %v2155_v21 = vand.u32 2147483648, %v2143_v12  ;;  %vm2154_vm15 = vcmp.eq.f32.partialorder %v2153_v39, 8.507059e+37 }
 0x464   :  { %v2126_v62 = vsub.f32 1.0, %v2125_v22  ;;  %v2204_v33 = vadd.f32 %v2203_v45, %v6064_v25  ;;  %v2216_v10 = vpop.f32.mrf.mxu3  ;;  %v5217_v22 = vld [vmem:[%s5525_s4] ss:$0 sm:$0xff] }
 0x465   :  { %v2192_v9 = vpop.f32.mrf.mxu1  ;;  %v2156_v46 = vor.u32 1.1754944e-38, %v2155_v21 }
 0x466   :  { %v2127_v1 = vmul.f32 %v3865_v29, %v2126_v62  ;;  %v2217_v58 = vadd.f32 %v2216_v10, %v2204_v33  ;;  %v2231_v2 = vpop.f32.mrf.mxu0  ;;  %v2159_v9 = vadd.f32 %v5217_v22, %v2115_v42  ;;  %v6065_v33 = vld [vmem:[#allocation87_spill] sm:$0xff]  ;;  %v6066_v10 = vld [vmem:[#allocation110_spill] sm:$0xff] }
 0x467   :  { %v3867_v14 = vpop.eup %3866  ;;  %v418_v2 = vadd.f32 %v6066_v10, %v6065_v33 }
 0x468   :  { %v3869_v13 = vpop.eup %3868  ;;  %v2145_v53 = vmul.f32 %v3867_v14, %v2143_v12  ;;  %v2128_v16 = vadd.f32 %v3865_v29, %v2127_v1  ;;  %v3583_v26 = vmul.f32 -1.442695, %v2217_v58  ;;  %vm2150_vm12 = vweird.f32 %v3867_v14 }
 0x469   :  { %v2275_v45 = vadd.f32 1.0, %v3869_v13  ;;  %vm2151_vm14 = vmor %vm2149_vm13, %vm2150_vm12 }
 0x46a   :  { %v2146_v62 = vsub.f32 1.0, %v2145_v53  ;;  %v2132_v25 = vsel %vm2131_vm10, %v3865_v29, %v2128_v16  ;;  %3870 = vpow2.f32 %v3583_v26 }
 0x46b   :  { %v2137_v1 = vsel %vm2134_vm11, %v2136_v52, %v2132_v25  ;;  %3872 = vrcp.f32 %v2275_v45  ;;  %v2205_v44 = vpop.f32.mrf.mxu2  ;;  %vm2281_vm1 = vweird.f32 %v2275_v45 }
 0x46c   :  { %v2147_v58 = vmul.f32 %v3867_v14, %v2146_v62  ;;  %v2160_v55 = vmul.f32 %v2159_v9, %v2137_v1  ;;  %v2218_v34 = vpop.f32.mrf.mxu3  ;;  %v2287_v1 = vand.u32 2147483648, %v2275_v45 }
 0x46e   :  { %v2148_v56 = vadd.f32 %v3867_v14, %v2147_v58  ;;  %v2161_v42 = vadd.f32 %v2160_v55, %v418_v2  ;;  %v2242_v13 = vpop.f32.mrf.mxu1  ;;  %v2285_v2 = vand.u32 2147483647, %v2275_v45 }
 0x470   :  { %v3871_v29 = vpop.eup %3870  ;;  %v2152_v26 = vsel %vm2151_vm14, %v3867_v14, %v2148_v56  ;;  %3874 = vtanh.f32 %v2161_v42  ;;  %vm2286_vm3 = vcmp.eq.f32.partialorder %v2285_v2, 8.507059e+37 }
 0x471   :  { %v3873_v53 = vpop.eup %3872  ;;  %v2294_v25 = vadd.f32 1.0, %v3871_v29  ;;  %v2157_v16 = vsel %vm2154_vm15, %v2156_v46, %v2152_v26  ;;  %v2230_v29 = vadd.f32 %v5211_v35, %v4710_v54  ;;  %v2288_v46 = vor.u32 1.1754944e-38, %v2287_v1 }
 0x472   :  { %v2277_v52 = vmul.f32 %v3873_v53, %v2275_v45  ;;  %v2163_v9 = vsub.f32 1.0, %v2157_v16  ;;  %vm2282_vm0 = vweird.f32 %v3873_v53  ;;  %v2165_v14 = vmul.f32 %v2157_v16, %v5095_v3 }
 0x473   :  { %3876 = vrcp.f32 %v2294_v25  ;;  %vm2283_vm2 = vmor %vm2281_vm1, %vm2282_vm0  ;;  %v2243_v16 = vadd.f32 %v2242_v13, %v2230_v29  ;;  %vm2300_vm5 = vweird.f32 %v2294_v25  ;;  %v6076_v29 = vld [vmem:[#allocation45_spill] sm:$0xff] }
 0x474   :  { %v2255_v62 = vpop.f32.mrf.mxu2  ;;  %v2278_v10 = vsub.f32 1.0, %v2277_v52 }
 0x475   :  { %v2256_v55 = vadd.f32 %v2255_v62, %v4707_v36 }
 0x476   :  { %v3875_v44 = vpop.eup %3874  ;;  %v2279_v12 = vmul.f32 %v3873_v53, %v2278_v10  ;;  %v2244_v58 = vpop.f32.mrf.mxu1 }
 0x477   :  { %v2268_v34 = vpop.f32.mrf.mxu3  ;;  %v2164_v56 = vmul.f32 %v3875_v44, %v2163_v9 }
 0x478   :  { %v2280_v39 = vadd.f32 %v3873_v53, %v2279_v12  ;;  %v2269_v52 = vadd.f32 %v2268_v34, %v2256_v55  ;;  %v2306_v12 = vand.u32 2147483648, %v2294_v25  ;;  %v2304_v34 = vand.u32 2147483647, %v2294_v25 }
 0x479   :  { %v3877_v21 = vpop.eup %3876  ;;  %v5224_v42 = vadd.f32 %v2165_v14, %v2164_v56 }
 0x47a   :  { %v2296_v26 = vmul.f32 %v3877_v21, %v2294_v25  ;;  %v2284_v62 = vsel %vm2283_vm2, %v3873_v53, %v2280_v39  ;;  %vm2301_vm4 = vweird.f32 %v3877_v21  ;;  %v2307_v1 = vor.u32 1.1754944e-38, %v2306_v12  ;;  %v6087_v12 = vld [vmem:[#allocation35_spill] sm:$0xff] }
 0x47b   :  { %v5230_v10 = vpack.c.bf16 %v5224_v42, %v5224_v42  ;;  %v2289_v9 = vsel %vm2286_vm3, %v2288_v46, %v2284_v62  ;;  %vm2302_vm6 = vmor %vm2300_vm5, %vm2301_vm4  ;;  %vm2305_vm7 = vcmp.eq.f32.partialorder %v2304_v34, 8.507059e+37  ;;  %v6077_v46 = vld [vmem:[#allocation32_spill] sm:$0xff]  ;;  %v6080_v62 = vld [vmem:[#allocation47_spill] sm:$0xff] }
 0x47c   :  { %v2297_v3 = vsub.f32 1.0, %v2296_v26  ;;  %v2310_v45 = vmul.f32 %v2289_v9, %v2269_v52  ;;  %v2257_v44 = vpop.f32.mrf.mxu2  ;;  %v6078_v26 = vld [vmem:[#allocation60_spill] sm:$0xff]  ;;  %v6079_v52 = vld [vmem:[#allocation31_spill] sm:$0xff]  ;;  %v6082_v9 = vld [vmem:[#allocation65_spill] sm:$0xff] }
 0x47d   :  { %2332 = vmatmul.bf16.vlgmr.msrb.gmra.mxu0 %v5230_v10  ;;  %2345 = vmatmul.bf16.vlgmr.msrb.gmra.mxu1 %v5230_v10  ;;  %v6086_v44 = vld [vmem:[#allocation69_spill] sm:$0xff]  ;;  %v6090_v34 = vld [vmem:[#allocation74_spill] sm:$0xff] }
 0x47e   :  { %v2298_v35 = vmul.f32 %v3877_v21, %v2297_v3  ;;  %v2311_v53 = vadd.f32 %v2310_v45, %v2243_v16  ;;  %2358 = vmatmul.bf16.vlgmr.msrb.gmra.mxu2 %v5230_v10  ;;  %2420 = vmatmul.bf16.vlgmr.msra.gmra.mxu3 %v5230_v10  ;;  %v6083_v3 = vld [vmem:[#allocation33_spill] sm:$0xff]  ;;  %v6084_v16 = vld [vmem:[#allocation48_spill] sm:$0xff] }
 0x47f   :  { %v2270_v58 = vpop.f32.mrf.mxu3  ;;  %2477 = vmatpush.bf16.msrb.mxu0 %v4516_v37  ;;  %2490 = vmatpush.bf16.msrb.mxu1 %v5817_v17  ;;  %v6085_v45 = vld [vmem:[#allocation36_spill] sm:$0xff] }
 0x480   :  { %v2299_v13 = vadd.f32 %v3877_v21, %v2298_v35  ;;  %3878 = vtanh.f32 %v2311_v53  ;;  %2503 = vmatpush.bf16.msrb.mxu2 %v5818_v7  ;;  %2568 = vmatpush.bf16.msra.mxu3 %v5819_v59  ;;  %v6088_v58 = vld [vmem:[#allocation53_spill] sm:$0xff]  ;;  %v6089_v35 = vld [vmem:[#allocation38_spill] sm:$0xff] }
 0x481   :  { %v6091_v53 = vld [vmem:[#allocation37_spill] sm:$0xff] }
 0x482   :  { %v2303_v55 = vsel %vm2302_vm6, %v3877_v21, %v2299_v13  ;;  %v6073_v21 = vld [vmem:[#allocation30_spill] sm:$0xff]  ;;  %v6092_v13 = vld [vmem:[#allocation59_spill] sm:$0xff] }
 0x483   :  { %v2308_v2 = vsel %vm2305_vm7, %v2307_v1, %v2303_v55  ;;  %2478 = vmatpush.bf16.msrb.mxu0 %v4528_v49  ;;  %2491 = vmatpush.bf16.msrb.mxu1 %v5820_v61  ;;  %v6093_v1 = vld [vmem:[#allocation40_spill] sm:$0xff]  ;;  %v6094_v55 = vld [vmem:[#allocation78_spill] sm:$0xff] }
 0x484   :  { %v2313_v56 = vsub.f32 1.0, %v2308_v2  ;;  %2504 = vmatpush.bf16.msrb.mxu2 %v5821_v38  ;;  %2569 = vmatpush.bf16.msra.mxu3 %v5822_v31  ;;  %v2315_v59 = vmul.f32 %v2308_v2, %v5123_v20  ;;  %v6072_v20 = vld [vmem:[#allocation44_spill] sm:$0xff]  ;;  %v6095_v2 = vld [vmem:[#allocation39_spill] sm:$0xff] }
 0x486   :  { %v3879_v25 = vpop.eup %3878 }
 0x487   :  { %v2314_v14 = vmul.f32 %v3879_v25, %v2313_v56  ;;  %2479 = vmatpush.bf16.msrb.mxu0 %v4538_v18  ;;  %2492 = vmatpush.bf16.msrb.mxu1 %v5823_v63  ;;  %v6096_v56 = vld [vmem:[#allocation51_spill] sm:$0xff]  ;;  %v6097_v25 = vld [vmem:[#allocation52_spill] sm:$0xff] }
 0x488   :  { %2505 = vmatpush.bf16.msrb.mxu2 %v5824_v8  ;;  %2570 = vmatpush.bf16.msra.mxu3 %v5825_v28  ;;  %v6067_v28 = vld [vmem:[#allocation41_spill] sm:$0xff] }
 0x489   :  { %v5249_v39 = vadd.f32 %v2315_v59, %v2314_v14  ;;  %v6098_v14 = vld [vmem:[#allocation64_spill] sm:$0xff] }
 0x48a   :  { %v6099_v59 = vld [vmem:[#allocation68_spill] sm:$0xff] }
 0x48b   :  { %2480 = vmatpush.bf16.msrb.mxu0 %v5826_v51  ;;  %2493 = vmatpush.bf16.msrb.mxu1 %v5827_v19  ;;  %v2411_v31 = vpack.c.bf16 %v5249_v39, %v5249_v39 }
 0x48c   :  { %2506 = vmatpush.bf16.msrb.mxu2 %v5828_v23  ;;  %2571 = vmatpush.bf16.msra.mxu3 %v5829_v50  ;;  %v6069_v50 = vld [vmem:[#allocation28_spill] sm:$0xff] }
 0x48d   :  { %2433 = vmatmul.bf16.vlgmr.msra.gmra.mxu0 %v2411_v31  ;;  %2446 = vmatmul.bf16.vlgmr.msra.gmra.mxu1 %v5230_v10 }
 0x48e   :  { %2459 = vmatmul.bf16.vlgmr.msra.gmra.mxu2 %v2411_v31  ;;  %2472 = vmatmul.bf16.vlgmr.msrb.gmra.mxu3 %v5230_v10 }
 0x48f   :  { %2481 = vmatpush.bf16.msrb.mxu0 %v4558_v32  ;;  %2494 = vmatpush.bf16.msrb.mxu1 %v5830_v40 }
 0x490   :  { %2507 = vmatpush.bf16.msrb.mxu2 %v5831_v27  ;;  %2572 = vmatpush.bf16.msra.mxu3 %v5832_v6  ;;  %v6071_v6 = vld [vmem:[#allocation27_spill] sm:$0xff] }
 0x493   :  { %2482 = vmatpush.bf16.msrb.mxu0 %v4570_v11  ;;  %2495 = vmatpush.bf16.msrb.mxu1 %v4572_v0 }
 0x494   :  { %2508 = vmatpush.bf16.msrb.mxu2 %v4575_v57  ;;  %2573 = vmatpush.bf16.msra.mxu3 %v4230_v47  ;;  %v6068_v47 = vld [vmem:[#allocation25_spill] sm:$0xff] }
 0x497   :  { %2483 = vmatpush.bf16.msrb.mxu0 %v4580_v4  ;;  %2496 = vmatpush.bf16.msrb.mxu1 %v4582_v43 }
 0x498   :  { %2509 = vmatpush.bf16.msrb.mxu2 %v4585_v5  ;;  %2574 = vmatpush.bf16.msra.mxu3 %v4233_v60  ;;  %v6070_v60 = vld [vmem:[#allocation50_spill] sm:$0xff] }
 0x49b   :  { %2484 = vmatpush.bf16.msrb.mxu0 %v4590_v48  ;;  %2497 = vmatpush.bf16.msrb.mxu1 %v4592_v24 }
 0x49c   :  { %2510 = vmatpush.bf16.msrb.mxu2 %v4595_v41  ;;  %2575 = vmatpush.bf16.msra.mxu3 %v6068_v47  ;;  %v6101_v47 = vld [vmem:[#allocation55_spill] sm:$0xff] }
 0x49e   :  { %2485 = vmatmul.bf16.vlgmr.msrb.gmra.mxu0 %v2411_v31  ;;  %2498 = vmatmul.bf16.vlgmr.msrb.gmra.mxu1 %v5230_v10  ;;  %v6081_v10 = vld [vmem:[#allocation34_spill] sm:$0xff] }
 0x49f   :  { %2581 = vmatpush.bf16.msra.mxu0 %v4240_v15  ;;  %2594 = vmatpush.bf16.msra.mxu1 %v6003_v30  ;;  %v6074_v15 = vld [vmem:[#allocation54_spill] sm:$0xff]  ;;  %v6075_v30 = vld [vmem:[#allocation29_spill] sm:$0xff] }
 0x4a0   :  { %2656 = vmatpush.bf16.msra.mxu2 %v6067_v28  ;;  %2669 = vmatpush.bf16.msrb.mxu3 %v6070_v60 }
 0x4a1   :  { %2511 = vmatmul.bf16.vlgmr.msrb.gmra.mxu2 %v2411_v31  ;;  %v6100_v31 = vld [vmem:[#allocation83_spill] sm:$0xff] }
 0x4a3   :  { %2582 = vmatpush.bf16.msra.mxu0 %v6069_v50  ;;  %2595 = vmatpush.bf16.msra.mxu1 %v6071_v6  ;;  %v6102_v50 = vld [vmem:[#allocation57_spill] sm:$0xff]  ;;  %v6103_v6 = vld [vmem:[#allocation72_spill] sm:$0xff] }
 0x4a4   :  { %2657 = vmatpush.bf16.msra.mxu2 %v6072_v20  ;;  %2670 = vmatpush.bf16.msrb.mxu3 %v6074_v15 }
 0x4a7   :  { %2583 = vmatpush.bf16.msra.mxu0 %v6073_v21  ;;  %2596 = vmatpush.bf16.msra.mxu1 %v6075_v30  ;;  %v6104_v21 = vld [vmem:[#allocation61_spill] sm:$0xff]  ;;  %v6105_v30 = vld [vmem:[#allocation62_spill] sm:$0xff] }
 0x4a8   :  { %2658 = vmatpush.bf16.msra.mxu2 %v6076_v29  ;;  %2671 = vmatpush.bf16.msrb.mxu3 %v6078_v26 }
 0x4ab   :  { %2584 = vmatpush.bf16.msra.mxu0 %v6077_v46  ;;  %2597 = vmatpush.bf16.msra.mxu1 %v6079_v52  ;;  %v6106_v46 = vld [vmem:[#allocation77_spill] sm:$0xff]  ;;  %v6107_v52 = vld [vmem:[#allocation66_spill] sm:$0xff] }
 0x4ac   :  { %2659 = vmatpush.bf16.msra.mxu2 %v6080_v62  ;;  %2672 = vmatpush.bf16.msrb.mxu3 %v6082_v9 }
 0x4af   :  { %2585 = vmatpush.bf16.msra.mxu0 %v6081_v10  ;;  %2598 = vmatpush.bf16.msra.mxu1 %v6083_v3  ;;  %v6108_v10 = vld [vmem:[#allocation67_spill] sm:$0xff]  ;;  %v6109_v3 = vld [vmem:[#allocation81_spill] sm:$0xff] }
 0x4b0   :  { %2660 = vmatpush.bf16.msra.mxu2 %v6084_v16  ;;  %2673 = vmatpush.bf16.msrb.mxu3 %v6086_v44  ;;  %v6119_v44 = vld [vmem:[#allocation84_spill] sm:$0xff] }
 0x4b3   :  { %2586 = vmatpush.bf16.msra.mxu0 %v6085_v45  ;;  %2599 = vmatpush.bf16.msra.mxu1 %v6087_v12  ;;  %v6110_v45 = vld [vmem:[#allocation70_spill] sm:$0xff]  ;;  %v6111_v12 = vld [vmem:[#allocation71_spill] sm:$0xff] }
 0x4b4   :  { %2661 = vmatpush.bf16.msra.mxu2 %v6088_v58  ;;  %2674 = vmatpush.bf16.msrb.mxu3 %v6090_v34  ;;  %v6118_v34 = vld [vmem:[#allocation89_spill] sm:$0xff] }
 0x4b7   :  { %2587 = vmatpush.bf16.msra.mxu0 %v6089_v35  ;;  %2600 = vmatpush.bf16.msra.mxu1 %v6091_v53  ;;  %v6112_v35 = vld [vmem:[#allocation86_spill] sm:$0xff]  ;;  %v6113_v53 = vld [vmem:[#allocation75_spill] sm:$0xff] }
 0x4b8   :  { %2662 = vmatpush.bf16.msra.mxu2 %v6092_v13  ;;  %2675 = vmatpush.bf16.msrb.mxu3 %v6094_v55  ;;  %v6117_v55 = vld [vmem:[#allocation80_spill] sm:$0xff] }
 0x4bb   :  { %2588 = vmatpush.bf16.msra.mxu0 %v6093_v1  ;;  %2601 = vmatpush.bf16.msra.mxu1 %v6095_v2  ;;  %v6114_v1 = vld [vmem:[#allocation76_spill] sm:$0xff] }
 0x4bc   :  { %2663 = vmatpush.bf16.msra.mxu2 %v6098_v14  ;;  %2676 = vmatpush.bf16.msrb.mxu3 %v6100_v31  ;;  %v6115_v2 = vld [vmem:[#allocation88_spill] sm:$0xff]  ;;  %v6116_v31 = vld [vmem:[#allocation79_spill] sm:$0xff] }
 0x4bf   :  { %2682 = vmatpush.bf16.msrb.mxu0 %v6096_v56  ;;  %2695 = vmatpush.bf16.msrb.mxu1 %v6097_v25 }
 0x4c0   :  { %2708 = vmatpush.bf16.msrb.mxu2 %v6099_v59 }
 0x4c3   :  { %2683 = vmatpush.bf16.msrb.mxu0 %v6101_v47  ;;  %2696 = vmatpush.bf16.msrb.mxu1 %v6102_v50 }
 0x4c4   :  { %2709 = vmatpush.bf16.msrb.mxu2 %v6103_v6 }
 0x4c7   :  { %2684 = vmatpush.bf16.msrb.mxu0 %v6104_v21  ;;  %2697 = vmatpush.bf16.msrb.mxu1 %v6105_v30 }
 0x4c8   :  { %2710 = vmatpush.bf16.msrb.mxu2 %v6106_v46 }
 0x4cb   :  { %2685 = vmatpush.bf16.msrb.mxu0 %v6107_v52  ;;  %2698 = vmatpush.bf16.msrb.mxu1 %v6108_v10 }
 0x4cc   :  { %2711 = vmatpush.bf16.msrb.mxu2 %v6109_v3  ;;  %v6120_v3 = vld [vmem:[#allocation85_spill] sm:$0xff] }
 0x4cf   :  { %2686 = vmatpush.bf16.msrb.mxu0 %v6110_v45  ;;  %2699 = vmatpush.bf16.msrb.mxu1 %v6111_v12  ;;  %v6121_v45 = vld [vmem:[#allocation90_spill] sm:$0xff]  ;;  %v6122_v12 = vld [vmem:[#allocation56_spill] sm:$0xff] }
 0x4d0   :  { %2712 = vmatpush.bf16.msrb.mxu2 %v6112_v35  ;;  %v6123_v35 = vld [vmem:[#allocation111_spill] sm:$0xff] }
 0x4d1   :  { %v392_v46 = vadd.f32 %v6123_v35, %v6122_v12  ;;  %v6125_v35 = vld [vmem:[#allocation42_spill] sm:$0xff] }
 0x4d3   :  { %2687 = vmatpush.bf16.msrb.mxu0 %v6113_v53  ;;  %2700 = vmatpush.bf16.msrb.mxu1 %v6114_v1  ;;  %v6124_v1 = vld [vmem:[#allocation73_spill] sm:$0xff] }
 0x4d4   :  { %2713 = vmatpush.bf16.msrb.mxu2 %v6115_v2 }
 0x4d7   :  { %2688 = vmatpush.bf16.msrb.mxu0 %v6116_v31  ;;  %2701 = vmatpush.bf16.msrb.mxu1 %v6117_v55 }
 0x4d8   :  { %2714 = vmatpush.bf16.msrb.mxu2 %v6118_v34 }
 0x4db   :  { %2689 = vmatpush.bf16.msrb.mxu0 %v6119_v44  ;;  %2702 = vmatpush.bf16.msrb.mxu1 %v6120_v3 }
 0x4dc   :  { %2715 = vmatpush.bf16.msrb.mxu2 %v6121_v45 }
 0x4fa   :  { %v2333_v53 = vpop.f32.mrf.mxu0  ;;  %v2346_v10 = vpop.f32.mrf.mxu1 }
 0x4fb   :  { %v2363_v9 = vadd.f32 %v2333_v53, %v6124_v1  ;;  %v2383_v2 = vadd.f32 %v2346_v10, %v392_v46 }
 0x4fd   :  { %v3584_v52 = vmul.f32 -1.442695, %v2363_v9  ;;  %v3585_v31 = vmul.f32 -1.442695, %v2383_v2 }
 0x4ff   :  { %3880 = vpow2.f32 %v3584_v52 }
 0x500   :  { %3882 = vpow2.f32 %v3585_v31 }
 0x501   :  { %v2359_v55 = vpop.f32.mrf.mxu2  ;;  %v2421_v34 = vpop.f32.mrf.mxu3 }
 0x502   :  { %v2335_v6 = vpop.f32.mrf.mxu0  ;;  %v2348_v44 = vpop.f32.mrf.mxu1  ;;  %v2422_v12 = vadd.f32 %v2421_v34, %v6125_v35 }
 0x503   :  { %v6126_v44 = vld [vmem:[#allocation115_spill] sm:$0xff] }
 0x505   :  { %v3881_v30 = vpop.eup %3880 }
 0x506   :  { %v3883_v3 = vpop.eup %3882  ;;  %v2367_v26 = vadd.f32 1.0, %v3881_v30 }
 0x507   :  { %v2387_v45 = vadd.f32 1.0, %v3883_v3 }
 0x508   :  { %3884 = vrcp.f32 %v2367_v26  ;;  %v2379_v47 = vand.u32 2147483648, %v2367_v26  ;;  %vm2373_vm9 = vweird.f32 %v2367_v26 }
 0x509   :  { %3886 = vrcp.f32 %v2387_v45  ;;  %v2361_v21 = vpop.f32.mrf.mxu2  ;;  %v2423_v59 = vpop.f32.mrf.mxu3  ;;  %vm2393_vm13 = vweird.f32 %v2387_v45 }
 0x50a   :  { %v2434_v53 = vpop.f32.mrf.mxu0  ;;  %v2447_v46 = vpop.f32.mrf.mxu1 }
 0x50b   :  { %v2435_v9 = vadd.f32 %v2434_v53, %v2422_v12  ;;  %v2448_v2 = vadd.f32 %v2447_v46, %v6126_v44  ;;  %v2377_v12 = vand.u32 2147483647, %v2367_v26 }
 0x50d   :  { %v3586_v10 = vmul.f32 -1.442695, %v2435_v9  ;;  %vm2378_vm11 = vcmp.eq.f32.partialorder %v2377_v12, 8.507059e+37 }
 0x50e   :  { %v3885_v52 = vpop.eup %3884 }
 0x50f   :  { %v3887_v31 = vpop.eup %3886  ;;  %v2369_v1 = vmul.f32 %v3885_v52, %v2367_v26  ;;  %3888 = vpow2.f32 %v3586_v10  ;;  %vm2374_vm8 = vweird.f32 %v3885_v52  ;;  %v2380_v10 = vor.u32 1.1754944e-38, %v2379_v47 }
 0x510   :  { %v2389_v6 = vmul.f32 %v3887_v31, %v2387_v45  ;;  %vm2375_vm10 = vmor %vm2373_vm9, %vm2374_vm8  ;;  %vm2394_vm12 = vweird.f32 %v3887_v31  ;;  %v2397_v26 = vand.u32 2147483647, %v2387_v45 }
 0x511   :  { %v2370_v50 = vsub.f32 1.0, %v2369_v1  ;;  %v2460_v30 = vpop.f32.mrf.mxu2  ;;  %v5337_v3 = vpop.f32.mrf.mxu3  ;;  %vm2395_vm14 = vmor %vm2393_vm13, %vm2394_vm12 }
 0x512   :  { %v2390_v15 = vsub.f32 1.0, %v2389_v6  ;;  %v2461_v34 = vadd.f32 %v2460_v30, %v2448_v2  ;;  %v2436_v21 = vpop.f32.mrf.mxu0  ;;  %v2449_v59 = vpop.f32.mrf.mxu1  ;;  %v2403_v6 = vadd.f32 %v5217_v22, %v2359_v55  ;;  %vm2398_vm15 = vcmp.eq.f32.partialorder %v2397_v26, 8.507059e+37 }
 0x513   :  { %v2371_v35 = vmul.f32 %v3885_v52, %v2370_v50  ;;  %v6127_v50 = vld [vmem:[#allocation112_spill] sm:$0xff] }
 0x514   :  { %v2391_v53 = vmul.f32 %v3887_v31, %v2390_v15  ;;  %v3587_v9 = vmul.f32 -1.442695, %v2461_v34  ;;  %v421_v30 = vadd.f32 %v6127_v50, %v6065_v33  ;;  %v2399_v15 = vand.u32 2147483648, %v2387_v45 }
 0x515   :  { %v3889_v14 = vpop.eup %3888  ;;  %v2372_v25 = vadd.f32 %v3885_v52, %v2371_v35 }
 0x516   :  { %v2519_v46 = vadd.f32 1.0, %v3889_v14  ;;  %3890 = vpow2.f32 %v3587_v9  ;;  %v2392_v44 = vadd.f32 %v3887_v31, %v2391_v53  ;;  %v2400_v55 = vor.u32 1.1754944e-38, %v2399_v15 }
 0x517   :  { %v2376_v1 = vsel %vm2375_vm10, %v3885_v52, %v2372_v25 }
 0x518   :  { %v2381_v2 = vsel %vm2378_vm11, %v2380_v10, %v2376_v1  ;;  %3892 = vrcp.f32 %v2519_v46  ;;  %v2396_v59 = vsel %vm2395_vm14, %v3887_v31, %v2392_v44  ;;  %v2531_v45 = vand.u32 2147483648, %v2519_v46 }
 0x519   :  { %v2404_v34 = vmul.f32 %v2403_v6, %v2381_v2  ;;  %v2462_v21 = vpop.f32.mrf.mxu2  ;;  %v2475_v35 = vpop.f32.mrf.mxu3  ;;  %v2401_v9 = vsel %vm2398_vm15, %v2400_v55, %v2396_v59  ;;  %vm2525_vm1 = vweird.f32 %v2519_v46  ;;  %v2474_v59 = vadd.f32 %v5337_v3, %v4710_v54 }
 0x51a   :  { %v2407_v1 = vsub.f32 1.0, %v2401_v9  ;;  %v2529_v21 = vand.u32 2147483647, %v2519_v46  ;;  %v2409_v33 = vmul.f32 %v2401_v9, %v5224_v42  ;;  %v2532_v55 = vor.u32 1.1754944e-38, %v2531_v45 }
 0x51b   :  { %v2405_v14 = vadd.f32 %v2404_v34, %v421_v30  ;;  %v2486_v47 = vpop.f32.mrf.mxu0  ;;  %v2499_v25 = vpop.f32.mrf.mxu1 }
 0x51c   :  { %v3891_v52 = vpop.eup %3890  ;;  %vm2530_vm3 = vcmp.eq.f32.partialorder %v2529_v21, 8.507059e+37 }
 0x51d   :  { %3894 = vtanh.f32 %v2405_v14  ;;  %v2538_v12 = vadd.f32 1.0, %v3891_v52  ;;  %v2500_v14 = vadd.f32 %v2499_v25, %v4707_v36 }
 0x51e   :  { %v3893_v53 = vpop.eup %3892 }
 0x51f   :  { %3896 = vrcp.f32 %v2538_v12  ;;  %v2521_v10 = vmul.f32 %v3893_v53, %v2519_v46  ;;  %vm2526_vm0 = vweird.f32 %v3893_v53  ;;  %v2487_v46 = vadd.f32 %v2486_v47, %v2474_v59  ;;  %v6140_v59 = vld [vmem:[#allocation67_spill] sm:$0xff] }
 0x520   :  { %vm2527_vm2 = vmor %vm2525_vm1, %vm2526_vm0  ;;  %v2548_v3 = vand.u32 2147483647, %v2538_v12  ;;  %vm2544_vm5 = vweird.f32 %v2538_v12 }
 0x521   :  { %v2522_v2 = vsub.f32 1.0, %v2521_v10 }
 0x522   :  { %vm2549_vm7 = vcmp.eq.f32.partialorder %v2548_v3, 8.507059e+37  ;;  %v6152_v3 = vld [vmem:[#allocation80_spill] sm:$0xff] }
 0x523   :  { %v3895_v50 = vpop.eup %3894  ;;  %v2488_v35 = vpop.f32.mrf.mxu0  ;;  %v2523_v31 = vmul.f32 %v3893_v53, %v2522_v2 }
 0x524   :  { %v2512_v6 = vpop.f32.mrf.mxu2  ;;  %v2501_v30 = vpop.f32.mrf.mxu1  ;;  %v2408_v34 = vmul.f32 %v3895_v50, %v2407_v1  ;;  %v2550_v50 = vand.u32 2147483648, %v2538_v12 }
 0x525   :  { %v3897_v44 = vpop.eup %3896  ;;  %v2524_v52 = vadd.f32 %v3893_v53, %v2523_v31  ;;  %v2513_v9 = vadd.f32 %v2512_v6, %v2500_v14  ;;  %v6138_v14 = vld [vmem:[#allocation66_spill] sm:$0xff] }
 0x526   :  { %v5343_v15 = vadd.f32 %v2409_v33, %v2408_v34  ;;  %v2540_v26 = vmul.f32 %v3897_v44, %v2538_v12  ;;  %vm2545_vm4 = vweird.f32 %v3897_v44  ;;  %v2551_v47 = vor.u32 1.1754944e-38, %v2550_v50  ;;  %v6149_v50 = vld [vmem:[#allocation86_spill] sm:$0xff] }
 0x527   :  { %v2528_v1 = vsel %vm2527_vm2, %v3893_v53, %v2524_v52  ;;  %vm2546_vm6 = vmor %vm2544_vm5, %vm2545_vm4  ;;  %v6139_v52 = vld [vmem:[#allocation65_spill] sm:$0xff] }
 0x528   :  { %v5350_v10 = vpack.c.bf16 %v5343_v15, %v5343_v15  ;;  %v2541_v42 = vsub.f32 1.0, %v2540_v26  ;;  %v2533_v33 = vsel %vm2530_vm3, %v2532_v55, %v2528_v1  ;;  %v6137_v26 = vld [vmem:[#allocation72_spill] sm:$0xff]  ;;  %v6141_v55 = vld [vmem:[#allocation77_spill] sm:$0xff] }
 0x529   :  { %v2554_v25 = vmul.f32 %v2533_v33, %v2513_v9  ;;  %v6144_v9 = vld [vmem:[#allocation71_spill] sm:$0xff]  ;;  %v6145_v1 = vld [vmem:[#allocation81_spill] sm:$0xff]  ;;  %v6147_v33 = vld [vmem:[#allocation74_spill] sm:$0xff] }
 0x52a   :  { %v2542_v2 = vmul.f32 %v3897_v44, %v2541_v42  ;;  %2576 = vmatmul.bf16.vlgmr.msra.gmra.mxu3 %v5350_v10  ;;  %2589 = vmatmul.bf16.vlgmr.msra.gmra.mxu0 %v5350_v10  ;;  %v6143_v42 = vld [vmem:[#allocation69_spill] sm:$0xff] }
 0x52b   :  { %2602 = vmatmul.bf16.vlgmr.msra.gmra.mxu1 %v5350_v10  ;;  %2664 = vmatmul.bf16.vlgmr.msra.gmra.mxu2 %v5350_v10  ;;  %v2555_v6 = vadd.f32 %v2554_v25, %v2487_v46  ;;  %v6146_v46 = vld [vmem:[#allocation75_spill] sm:$0xff] }
 0x52c   :  { %v2514_v35 = vpop.f32.mrf.mxu2  ;;  %v2543_v21 = vadd.f32 %v3897_v44, %v2542_v2  ;;  %2721 = vmatpush.bf16.msra.mxu3 %v4516_v37  ;;  %2734 = vmatpush.bf16.msra.mxu0 %v5817_v17  ;;  %v6148_v2 = vld [vmem:[#allocation76_spill] sm:$0xff]  ;;  %v6150_v25 = vld [vmem:[#allocation79_spill] sm:$0xff] }
 0x52d   :  { %2747 = vmatpush.bf16.msra.mxu1 %v5818_v7  ;;  %2807 = vmatpush.bf16.msra.mxu2 %v6067_v28  ;;  %3898 = vtanh.f32 %v2555_v6  ;;  %v6151_v35 = vld [vmem:[#allocation78_spill] sm:$0xff]  ;;  %v6154_v6 = vld [vmem:[#allocation84_spill] sm:$0xff] }
 0x52e   :  { %v2547_v53 = vsel %vm2546_vm6, %v3897_v44, %v2543_v21  ;;  %v6134_v44 = vld [vmem:[#allocation61_spill] sm:$0xff]  ;;  %v6153_v21 = vld [vmem:[#allocation88_spill] sm:$0xff] }
 0x52f   :  { %v2552_v45 = vsel %vm2549_vm7, %v2551_v47, %v2547_v53  ;;  %v6155_v47 = vld [vmem:[#allocation83_spill] sm:$0xff]  ;;  %v6156_v53 = vld [vmem:[#allocation85_spill] sm:$0xff] }
 0x530   :  { %2722 = vmatpush.bf16.msra.mxu3 %v4528_v49  ;;  %2735 = vmatpush.bf16.msra.mxu0 %v5820_v61  ;;  %v2557_v12 = vsub.f32 1.0, %v2552_v45  ;;  %v2559_v34 = vmul.f32 %v2552_v45, %v5249_v39  ;;  %v6128_v39 = vld [vmem:[#allocation52_spill] sm:$0xff]  ;;  %v6157_v45 = vld [vmem:[#allocation89_spill] sm:$0xff] }
 0x531   :  { %2748 = vmatpush.bf16.msra.mxu1 %v5821_v38  ;;  %2808 = vmatpush.bf16.msra.mxu2 %v6072_v20 }
 0x533   :  { %v3899_v30 = vpop.eup %3898 }
 0x534   :  { %2723 = vmatpush.bf16.msra.mxu3 %v4538_v18  ;;  %2736 = vmatpush.bf16.msra.mxu0 %v5823_v63  ;;  %v2558_v28 = vmul.f32 %v3899_v30, %v2557_v12  ;;  %v6158_v12 = vld [vmem:[#allocation90_spill] sm:$0xff] }
 0x535   :  { %2749 = vmatpush.bf16.msra.mxu1 %v5824_v8  ;;  %2809 = vmatpush.bf16.msra.mxu2 %v6076_v29  ;;  %v6129_v29 = vld [vmem:[#allocation64_spill] sm:$0xff] }
 0x536   :  { %v5369_v31 = vadd.f32 %v2559_v34, %v2558_v28 }
 0x538   :  { %2724 = vmatpush.bf16.msra.mxu3 %v5826_v51  ;;  %2737 = vmatpush.bf16.msra.mxu0 %v5827_v19  ;;  %v2655_v20 = vpack.c.bf16 %v5369_v31, %v5369_v31 }
 0x539   :  { %2750 = vmatpush.bf16.msra.mxu1 %v5828_v23  ;;  %2810 = vmatpush.bf16.msra.mxu2 %v6080_v62  ;;  %v6130_v62 = vld [vmem:[#allocation55_spill] sm:$0xff] }
 0x53a   :  { %2690 = vmatmul.bf16.vlgmr.msrb.gmra.mxu0 %v5350_v10  ;;  %2677 = vmatmul.bf16.vlgmr.msrb.gmra.mxu3 %v2655_v20 }
 0x53b   :  { %2703 = vmatmul.bf16.vlgmr.msrb.gmra.mxu1 %v2655_v20  ;;  %2716 = vmatmul.bf16.vlgmr.msrb.gmra.mxu2 %v5350_v10 }
 0x53c   :  { %2725 = vmatpush.bf16.msra.mxu3 %v4558_v32  ;;  %2738 = vmatpush.bf16.msra.mxu0 %v5830_v40 }
 0x53d   :  { %2751 = vmatpush.bf16.msra.mxu1 %v5831_v27  ;;  %2811 = vmatpush.bf16.msra.mxu2 %v6084_v16  ;;  %v6131_v16 = vld [vmem:[#allocation54_spill] sm:$0xff] }
 0x540   :  { %2726 = vmatpush.bf16.msra.mxu3 %v4570_v11  ;;  %2739 = vmatpush.bf16.msra.mxu0 %v4572_v0 }
 0x541   :  { %2752 = vmatpush.bf16.msra.mxu1 %v4575_v57  ;;  %2812 = vmatpush.bf16.msra.mxu2 %v6088_v58  ;;  %v6132_v58 = vld [vmem:[#allocation57_spill] sm:$0xff] }
 0x544   :  { %2727 = vmatpush.bf16.msra.mxu3 %v4580_v4  ;;  %2740 = vmatpush.bf16.msra.mxu0 %v4582_v43 }
 0x545   :  { %2753 = vmatpush.bf16.msra.mxu1 %v4585_v5  ;;  %2813 = vmatpush.bf16.msra.mxu2 %v6092_v13  ;;  %v6133_v13 = vld [vmem:[#allocation68_spill] sm:$0xff] }
 0x548   :  { %2728 = vmatpush.bf16.msra.mxu3 %v4590_v48  ;;  %2741 = vmatpush.bf16.msra.mxu0 %v4592_v24 }
 0x549   :  { %2754 = vmatpush.bf16.msra.mxu1 %v4595_v41  ;;  %2814 = vmatpush.bf16.msra.mxu2 %v6129_v29  ;;  %v6164_v29 = vld [vmem:[#allocation42_spill] sm:$0xff] }
 0x54b   :  { %2729 = vmatmul.bf16.vlgmr.msra.gmra.mxu3 %v2655_v20  ;;  %2742 = vmatmul.bf16.vlgmr.msra.gmra.mxu0 %v5350_v10  ;;  %v6142_v10 = vld [vmem:[#allocation70_spill] sm:$0xff] }
 0x54c   :  { %2833 = vmatpush.bf16.msrb.mxu0 %v6096_v56  ;;  %2820 = vmatpush.bf16.msrb.mxu3 %v6070_v60  ;;  %v6135_v56 = vld [vmem:[#allocation60_spill] sm:$0xff]  ;;  %v6136_v60 = vld [vmem:[#allocation62_spill] sm:$0xff] }
 0x54d   :  { %2846 = vmatpush.bf16.msrb.mxu1 %v6128_v39  ;;  %2859 = vmatpush.bf16.msrb.mxu2 %v6133_v13 }
 0x54e   :  { %2755 = vmatmul.bf16.vlgmr.msra.gmra.mxu1 %v2655_v20 }
 0x550   :  { %2834 = vmatpush.bf16.msrb.mxu0 %v6130_v62  ;;  %2821 = vmatpush.bf16.msrb.mxu3 %v6131_v16 }
 0x551   :  { %2847 = vmatpush.bf16.msrb.mxu1 %v6132_v58  ;;  %2860 = vmatpush.bf16.msrb.mxu2 %v6137_v26 }
 0x554   :  { %2835 = vmatpush.bf16.msrb.mxu0 %v6134_v44  ;;  %2822 = vmatpush.bf16.msrb.mxu3 %v6135_v56 }
 0x555   :  { %2848 = vmatpush.bf16.msrb.mxu1 %v6136_v60  ;;  %2861 = vmatpush.bf16.msrb.mxu2 %v6141_v55 }
 0x558   :  { %2836 = vmatpush.bf16.msrb.mxu0 %v6138_v14  ;;  %2823 = vmatpush.bf16.msrb.mxu3 %v6139_v52 }
 0x559   :  { %2849 = vmatpush.bf16.msrb.mxu1 %v6140_v59  ;;  %2862 = vmatpush.bf16.msrb.mxu2 %v6145_v1 }
 0x55c   :  { %2837 = vmatpush.bf16.msrb.mxu0 %v6142_v10  ;;  %2824 = vmatpush.bf16.msrb.mxu3 %v6143_v42 }
 0x55d   :  { %2850 = vmatpush.bf16.msrb.mxu1 %v6144_v9  ;;  %2863 = vmatpush.bf16.msrb.mxu2 %v6149_v50 }
 0x560   :  { %2838 = vmatpush.bf16.msrb.mxu0 %v6146_v46  ;;  %2825 = vmatpush.bf16.msrb.mxu3 %v6147_v33 }
 0x561   :  { %2851 = vmatpush.bf16.msrb.mxu1 %v6148_v2  ;;  %2864 = vmatpush.bf16.msrb.mxu2 %v6153_v21 }
 0x564   :  { %2839 = vmatpush.bf16.msrb.mxu0 %v6150_v25  ;;  %2826 = vmatpush.bf16.msrb.mxu3 %v6151_v35 }
 0x565   :  { %2852 = vmatpush.bf16.msrb.mxu1 %v6152_v3  ;;  %2865 = vmatpush.bf16.msrb.mxu2 %v6157_v45 }
 0x568   :  { %2840 = vmatpush.bf16.msrb.mxu0 %v6154_v6  ;;  %2827 = vmatpush.bf16.msrb.mxu3 %v6155_v47 }
 0x569   :  { %2853 = vmatpush.bf16.msrb.mxu1 %v6156_v53  ;;  %2866 = vmatpush.bf16.msrb.mxu2 %v6158_v12 }
 0x56c   :  { %2885 = vmatpush.bf16.msra.mxu0 %v5817_v17  ;;  %2872 = vmatpush.bf16.msra.mxu3 %v4516_v37  ;;  %v6159_v37 = vld [vmem:[#allocation56_spill] sm:$0xff] }
 0x56d   :  { %2898 = vmatpush.bf16.msra.mxu1 %v5818_v7  ;;  %v6162_v7 = vld [vmem:[#allocation82_spill] sm:$0xff] }
 0x570   :  { %2886 = vmatpush.bf16.msra.mxu0 %v5820_v61  ;;  %2873 = vmatpush.bf16.msra.mxu3 %v4528_v49  ;;  %v6160_v49 = vld [vmem:[#allocation113_spill] sm:$0xff] }
 0x571   :  { %2899 = vmatpush.bf16.msra.mxu1 %v5821_v38 }
 0x574   :  { %2887 = vmatpush.bf16.msra.mxu0 %v5823_v63  ;;  %2874 = vmatpush.bf16.msra.mxu3 %v4538_v18  ;;  %v394_v18 = vadd.f32 %v6160_v49, %v6159_v37  ;;  %v6165_v49 = vld [vmem:[#allocation87_spill] sm:$0xff] }
 0x575   :  { %2900 = vmatpush.bf16.msra.mxu1 %v5824_v8 }
 0x578   :  { %2888 = vmatpush.bf16.msra.mxu0 %v5827_v19  ;;  %2875 = vmatpush.bf16.msra.mxu3 %v5826_v51 }
 0x579   :  { %2901 = vmatpush.bf16.msra.mxu1 %v5828_v23 }
 0x57c   :  { %2889 = vmatpush.bf16.msra.mxu0 %v5830_v40  ;;  %2876 = vmatpush.bf16.msra.mxu3 %v4558_v32  ;;  %v6163_v40 = vld [vmem:[#allocation115_spill] sm:$0xff] }
 0x57d   :  { %2902 = vmatpush.bf16.msra.mxu1 %v5831_v27 }
 0x580   :  { %2890 = vmatpush.bf16.msra.mxu0 %v4572_v0  ;;  %2877 = vmatpush.bf16.msra.mxu3 %v4570_v11 }
 0x581   :  { %2903 = vmatpush.bf16.msra.mxu1 %v4575_v57  ;;  %v6161_v57 = vld [vmem:[#allocation43_spill] sm:$0xff] }
 0x584   :  { %2891 = vmatpush.bf16.msra.mxu0 %v4582_v43  ;;  %2878 = vmatpush.bf16.msra.mxu3 %v4580_v4  ;;  %v365_v43 = vadd.f32 %v6162_v7, %v6161_v57 }
 0x585   :  { %2904 = vmatpush.bf16.msra.mxu1 %v4585_v5 }
 0x588   :  { %2892 = vmatpush.bf16.msra.mxu0 %v4592_v24  ;;  %2879 = vmatpush.bf16.msra.mxu3 %v4590_v48 }
 0x589   :  { %2905 = vmatpush.bf16.msra.mxu1 %v4595_v41 }
 0x5a7   :  { %v2590_v32 = vpop.f32.mrf.mxu0 }
 0x5a8   :  { %v2627_v0 = vadd.f32 %v2590_v32, %v394_v18  ;;  %v2603_v11 = vpop.f32.mrf.mxu1  ;;  %v6166_v18 = vld [vmem:[#allocation114_spill] sm:$0xff] }
 0x5a9   :  { %v2647_v47 = vadd.f32 %v5217_v22, %v2603_v11  ;;  %v423_v32 = vadd.f32 %v6166_v18, %v6165_v49 }
 0x5aa   :  { %v3589_v17 = vmul.f32 -1.442695, %v2627_v0 }
 0x5ac   :  { %3900 = vpow2.f32 %v3589_v17 }
 0x5ad   :  { %v2577_v4 = vpop.f32.mrf.mxu3 }
 0x5ae   :  { %v2607_v61 = vadd.f32 %v2577_v4, %v365_v43  ;;  %v2665_v5 = vpop.f32.mrf.mxu2 }
 0x5af   :  { %v2592_v38 = vpop.f32.mrf.mxu0  ;;  %v2666_v62 = vadd.f32 %v2665_v5, %v6164_v29 }
 0x5b0   :  { %v3588_v24 = vmul.f32 -1.442695, %v2607_v61  ;;  %v2605_v63 = vpop.f32.mrf.mxu1 }
 0x5b2   :  { %v3901_v48 = vpop.eup %3900  ;;  %3902 = vpow2.f32 %v3588_v24 }
 0x5b3   :  { %v5456_v41 = vadd.f32 1.0, %v3901_v48 }
 0x5b5   :  { %v2579_v8 = vpop.f32.mrf.mxu3  ;;  %3904 = vrcp.f32 %v5456_v41  ;;  %v2643_v0 = vand.u32 2147483648, %v5456_v41  ;;  %vm2637_vm13 = vweird.f32 %v5456_v41  ;;  %v2641_v7 = vand.u32 2147483647, %v5456_v41 }
 0x5b6   :  { %v2667_v51 = vpop.f32.mrf.mxu2 }
 0x5b7   :  { %v2691_v19 = vpop.f32.mrf.mxu0  ;;  %v2644_v4 = vor.u32 1.1754944e-38, %v2643_v0  ;;  %vm2642_vm15 = vcmp.eq.f32.partialorder %v2641_v7, 8.507059e+37  ;;  %v3749_v0 = vld [vmem:[#allocation12 + $0x38] sm:$0xff] }
 0x5b8   :  { %v3903_v23 = vpop.eup %3902  ;;  %v2692_v27 = vadd.f32 %v2691_v19, %v6163_v40  ;;  %v2704_v30 = vpop.f32.mrf.mxu1 }
 0x5b9   :  { %v2611_v28 = vadd.f32 1.0, %v3903_v23 }
 0x5ba   :  { %v2705_v34 = vadd.f32 %v2704_v30, %v2692_v27 }
 0x5bb   :  { %3906 = vrcp.f32 %v2611_v28  ;;  %v3905_v20 = vpop.eup %3904  ;;  %v2623_v42 = vand.u32 2147483648, %v2611_v28  ;;  %v2621_v46 = vand.u32 2147483647, %v2611_v28  ;;  %vm2617_vm9 = vweird.f32 %v2611_v28 }
 0x5bc   :  { %v3591_v39 = vmul.f32 -1.442695, %v2705_v34  ;;  %v2633_v58 = vmul.f32 %v3905_v20, %v5456_v41  ;;  %vm2638_vm12 = vweird.f32 %v3905_v20 }
 0x5bd   :  { %v2678_v16 = vpop.f32.mrf.mxu3  ;;  %v2624_v3 = vor.u32 1.1754944e-38, %v2623_v42  ;;  %vm2622_vm11 = vcmp.eq.f32.partialorder %v2621_v46, 8.507059e+37  ;;  %vm2639_vm14 = vmor %vm2637_vm13, %vm2638_vm12 }
 0x5be   :  { %3908 = vpow2.f32 %v3591_v39  ;;  %v2679_v13 = vadd.f32 %v2678_v16, %v2666_v62  ;;  %v5462_v44 = vpop.f32.mrf.mxu2  ;;  %v2634_v59 = vsub.f32 1.0, %v2633_v58 }
 0x5bf   :  { %v2693_v56 = vpop.f32.mrf.mxu0 }
 0x5c0   :  { %v2706_v60 = vpop.f32.mrf.mxu1  ;;  %v3590_v14 = vmul.f32 -1.442695, %v2679_v13  ;;  %v2635_v2 = vmul.f32 %v3905_v20, %v2634_v59  ;;  %v2718_v13 = vadd.f32 %v5462_v44, %v4710_v54 }
 0x5c1   :  { %v3907_v26 = vpop.eup %3906 }
 0x5c2   :  { %v2613_v52 = vmul.f32 %v3907_v26, %v2611_v28  ;;  %3910 = vpow2.f32 %v3590_v14  ;;  %vm2618_vm8 = vweird.f32 %v3907_v26  ;;  %v2636_v12 = vadd.f32 %v3905_v20, %v2635_v2 }
 0x5c3   :  { %vm2619_vm10 = vmor %vm2617_vm9, %vm2618_vm8 }
 0x5c4   :  { %v3909_v55 = vpop.eup %3908  ;;  %v2614_v10 = vsub.f32 1.0, %v2613_v52  ;;  %v2640_v43 = vsel %vm2639_vm14, %v3905_v20, %v2636_v12 }
 0x5c5   :  { %v5464_v9 = vadd.f32 1.0, %v3909_v55  ;;  %v2680_v33 = vpop.f32.mrf.mxu3  ;;  %v2645_v63 = vsel %vm2642_vm15, %v2644_v4, %v2640_v43  ;;  %v3748_v43 = vld [vmem:[#allocation12 + $0x30] sm:$0xff] }
 0x5c6   :  { %v2615_v1 = vmul.f32 %v3907_v26, %v2614_v10  ;;  %v2719_v50 = vpop.f32.mrf.mxu2  ;;  %v2651_v19 = vsub.f32 1.0, %v2645_v63  ;;  %v2653_v28 = vmul.f32 %v2645_v63, %v5343_v15 }
 0x5c7   :  { %3912 = vrcp.f32 %v5464_v9  ;;  %v2794_v59 = vand.u32 2147483648, %v5464_v9  ;;  %vm2788_vm5 = vweird.f32 %v5464_v9  ;;  %v2792_v42 = vand.u32 2147483647, %v5464_v9 }
 0x5c8   :  { %v2616_v25 = vadd.f32 %v3907_v26, %v2615_v1  ;;  %v3911_v35 = vpop.eup %3910  ;;  %v2743_v21 = vpop.f32.mrf.mxu0 }
 0x5c9   :  { %v2763_v45 = vadd.f32 1.0, %v3911_v35  ;;  %v2744_v41 = vadd.f32 %v2743_v21, %v4707_v36  ;;  %v2795_v46 = vor.u32 1.1754944e-38, %v2794_v59  ;;  %vm2793_vm7 = vcmp.eq.f32.partialorder %v2792_v42, 8.507059e+37 }
 0x5ca   :  { %v2620_v53 = vsel %vm2619_vm10, %v3907_v26, %v2616_v25 }
 0x5cb   :  { %v2756_v6 = vpop.f32.mrf.mxu1  ;;  %v2625_v37 = vsel %vm2622_vm11, %v2624_v3, %v2620_v53  ;;  %3914 = vrcp.f32 %v2763_v45  ;;  %v2775_v27 = vand.u32 2147483648, %v2763_v45  ;;  %v2773_v20 = vand.u32 2147483647, %v2763_v45 }
 0x5cc   :  { %v2648_v17 = vmul.f32 %v2647_v47, %v2625_v37  ;;  %vm2769_vm1 = vweird.f32 %v2763_v45  ;;  %v2757_v60 = vadd.f32 %v2756_v6, %v2744_v41 }
 0x5cd   :  { %v3913_v57 = vpop.eup %3912  ;;  %v2776_v56 = vor.u32 1.1754944e-38, %v2775_v27  ;;  %vm2774_vm3 = vcmp.eq.f32.partialorder %v2773_v20, 8.507059e+37  ;;  %v3744_v27 = vld [vmem:[#allocation12 + $0x10] sm:$0xff] }
 0x5ce   :  { %v2649_v22 = vadd.f32 %v2648_v17, %v423_v32  ;;  %v2730_v11 = vpop.f32.mrf.mxu3  ;;  %v2784_v61 = vmul.f32 %v3913_v57, %v5464_v9  ;;  %vm2789_vm4 = vweird.f32 %v3913_v57 }
 0x5cf   :  { %v2731_v10 = vadd.f32 %v2730_v11, %v2718_v13  ;;  %vm2790_vm6 = vmor %vm2788_vm5, %vm2789_vm4 }
 0x5d0   :  { %3916 = vtanh.f32 %v2649_v22  ;;  %v2745_v5 = vpop.f32.mrf.mxu0  ;;  %v2785_v8 = vsub.f32 1.0, %v2784_v61 }
 0x5d1   :  { %v3915_v24 = vpop.eup %3914  ;;  %v3747_v5 = vld [vmem:[#allocation12 + $0x28] sm:$0xff] }
 0x5d2   :  { %v2765_v48 = vmul.f32 %v3915_v24, %v2763_v45  ;;  %vm2770_vm0 = vweird.f32 %v3915_v24  ;;  %v2786_v62 = vmul.f32 %v3913_v57, %v2785_v8  ;;  %v3746_v8 = vld [vmem:[#allocation12 + $0x20] sm:$0xff] }
 0x5d3   :  { %v2758_v38 = vpop.f32.mrf.mxu1  ;;  %vm2771_vm2 = vmor %vm2769_vm1, %vm2770_vm0 }
 0x5d4   :  { %v2766_v51 = vsub.f32 1.0, %v2765_v48  ;;  %v2787_v15 = vadd.f32 %v3913_v57, %v2786_v62 }
 0x5d6   :  { %v3917_v23 = vpop.eup %3916  ;;  %v2732_v30 = vpop.f32.mrf.mxu3  ;;  %v2767_v34 = vmul.f32 %v3915_v24, %v2766_v51  ;;  %v2791_v1 = vsel %vm2790_vm6, %v3913_v57, %v2787_v15  ;;  %v3742_v15 = vld [vmem:[#allocation12] sm:$0xff] }
 0x5d7   :  { %v2652_v39 = vmul.f32 %v3917_v23, %v2651_v19  ;;  %v2796_v33 = vsel %vm2793_vm7, %v2795_v46, %v2791_v1  ;;  %v3745_v23 = vld [vmem:[#allocation12 + $0x18] sm:$0xff] }
 0x5d8   :  { %v2768_v16 = vadd.f32 %v3915_v24, %v2767_v34  ;;  %v2801_v2 = vsub.f32 1.0, %v2796_v33  ;;  %v2803_v35 = vmul.f32 %v2796_v33, %v5369_v31 }
 0x5d9   :  { %v2654_v58 = vadd.f32 %v2653_v28, %v2652_v39 }
 0x5da   :  { %v2772_v26 = vsel %vm2771_vm2, %v3915_v24, %v2768_v16  ;;  %v3743_v16 = vld [vmem:[#allocation12 + $0x8] sm:$0xff] }
 0x5db   :  { %v2805_v14 = vpack.c.bf16 %v2654_v58, %v2654_v58  ;;  %v2777_v52 = vsel %vm2774_vm3, %v2776_v56, %v2772_v26 }
 0x5dc   :  { %v2798_v55 = vmul.f32 %v2777_v52, %v2757_v60 }
 0x5dd   :  { %2815 = vmatmul.bf16.vlgmr.msra.gmra.mxu2 %v2805_v14  ;;  %2841 = vmatmul.bf16.vlgmr.msrb.gmra.mxu0 %v2805_v14 }
 0x5de   :  { %v2799_v44 = vadd.f32 %v2798_v55, %v2731_v10  ;;  %3057 = vmatpush.bf16.msra.mxu2 %v3749_v0 }
 0x5e0   :  { %3918 = vtanh.f32 %v2799_v44 }
 0x5e2   :  { %3058 = vmatpush.bf16.msra.mxu2 %v3748_v43 }
 0x5e6   :  { %v3919_v50 = vpop.eup %3918  ;;  %3059 = vmatpush.bf16.msra.mxu2 %v3747_v5 }
 0x5e7   :  { %v2802_v25 = vmul.f32 %v3919_v50, %v2801_v2 }
 0x5e9   :  { %v5482_v3 = vadd.f32 %v2803_v35, %v2802_v25 }
 0x5ea   :  { %3060 = vmatpush.bf16.msra.mxu2 %v3746_v8 }
 0x5eb   :  { %v2806_v21 = vpack.c.bf16 %v5482_v3, %v5482_v3 }
 0x5ed   :  { %2867 = vmatmul.bf16.vlgmr.msrb.gmra.mxu2 %v2805_v14  ;;  %2893 = vmatmul.bf16.vlgmr.msra.gmra.mxu0 %v2805_v14 }
 0x5ee   :  { %2828 = vmatmul.bf16.vlgmr.msrb.gmra.mxu3 %v2806_v21  ;;  %2854 = vmatmul.bf16.vlgmr.msrb.gmra.mxu1 %v2806_v21 }
 0x5ef   :  { %3061 = vmatpush.bf16.msra.mxu2 %v3745_v23 }
 0x5f3   :  { %3062 = vmatpush.bf16.msra.mxu2 %v3744_v27 }
 0x5f7   :  { %3063 = vmatpush.bf16.msra.mxu2 %v3743_v16 }
 0x5fb   :  { %3064 = vmatpush.bf16.msra.mxu2 %v3742_v15 }
 0x5fe   :  { %2880 = vmatmul.bf16.vlgmr.msra.gmra.mxu3 %v2806_v21  ;;  %2906 = vmatmul.bf16.vlgmr.msra.gmra.mxu1 %v2806_v21 }
 0x65a   :  { %v2842_v9 = vpop.f32.mrf.mxu0 }
 0x65b   :  { %v2843_v45 = vadd.f32 %v2842_v9, %v6163_v40  ;;  %v2961_v40 = vld [vmem:[%s5531_s10] sm:$0x1] }
 0x65c   :  { %v5493_v24 = vadd.f32 1e-05, %v2961_v40 }
 0x65e   :  { %vm2969_vm15 = vweird.f32 %v5493_v24 }
 0x660   :  { %v2816_v6 = vpop.f32.mrf.mxu2 }
 0x661   :  { %v2817_v18 = vadd.f32 %v2816_v6, %v6164_v29 }
 0x662   :  { %v2844_v47 = vpop.f32.mrf.mxu0 }
 0x668   :  { %v2818_v53 = vpop.f32.mrf.mxu2 }
 0x66a   :  { %v2894_v12 = vpop.f32.mrf.mxu0 }
 0x66b   :  { %v2855_v37 = vpop.f32.mrf.mxu1  ;;  %v2895_v55 = vadd.f32 %v2894_v12, %v4707_v36 }
 0x66c   :  { %v2856_v31 = vadd.f32 %v2855_v37, %v2843_v45 }
 0x66e   :  { %v3593_v49 = vmul.f32 -1.442695, %v2856_v31 }
 0x670   :  { %3920 = vpow2.f32 %v3593_v49  ;;  %v2868_v32 = vpop.f32.mrf.mxu2 }
 0x671   :  { %v2829_v17 = vpop.f32.mrf.mxu3  ;;  %v2869_v42 = vadd.f32 %v2868_v32, %v4710_v54  ;;  %v3766_v32 = vld [vmem:[%s5530_s9] ss:$0 sm:$0xff]  ;;  %s4126_s9 = smov [#allocation14]  }
 0x672   :  { %v2830_v57 = vadd.f32 %v2829_v17, %v2817_v18  ;;  %v2896_v7 = vpop.f32.mrf.mxu0  ;;  %s3076_s18 = sshll.u32 %s4126_s9, 4  ;;  %s3077_s18 = int_to_ptr.vmem [resolvable:$true] %s3076_s18 }
 0x673   :  { %v2857_v22 = vpop.f32.mrf.mxu1  ;;  %v3767_v7 = vld [vmem:[%s5528_s7] ss:$0 sm:$0xff]  ;;  %s3078_s7 = sshll.u32 %s5534_s13, 4  ;;  %s3079_s7 = int_to_ptr.hbm [resolvable:$true] %s3078_s7 }
 0x674   :  { %v3592_v11 = vmul.f32 -1.442695, %v2830_v57 }
 0x676   :  { %v3921_v4 = vpop.eup %3920  ;;  %3922 = vpow2.f32 %v3592_v11  ;;  %v3768_v11 = vld [vmem:[%s5529_s8] ss:$0 sm:$0xff] }
 0x677   :  { %v5491_v61 = vadd.f32 1.0, %v3921_v4 }
 0x678   :  { %v2870_v29 = vpop.f32.mrf.mxu2 }
 0x679   :  { %v2831_v38 = vpop.f32.mrf.mxu3  ;;  %3924 = vrcp.f32 %v5491_v61  ;;  %v2945_v25 = vand.u32 2147483648, %v5491_v61  ;;  %vm2939_vm13 = vweird.f32 %v5491_v61  ;;  %v2943_v36 = vand.u32 2147483647, %v5491_v61 }
 0x67a   :  { %3926 = vrsqrt.f32 %v5493_v24 }
 0x67b   :  { %v2907_v63 = vpop.f32.mrf.mxu1  ;;  %v2946_v47 = vor.u32 1.1754944e-38, %v2945_v25  ;;  %vm2944_vm1 = vcmp.eq.f32.partialorder %v2943_v36, 8.507059e+37 }
 0x67c   :  { %v3923_v48 = vpop.eup %3922  ;;  %v2908_v1 = vadd.f32 %v2907_v63, %v2895_v55 }
 0x67d   :  { %v2914_v51 = vadd.f32 1.0, %v3923_v48 }
 0x67f   :  { %3928 = vrcp.f32 %v2914_v51  ;;  %v3925_v19 = vpop.eup %3924  ;;  %v2926_v56 = vand.u32 2147483648, %v2914_v51  ;;  %v2924_v14 = vand.u32 2147483647, %v2914_v51  ;;  %vm2920_vm9 = vweird.f32 %v2914_v51 }
 0x680   :  { %v3927_v30 = vpop.eup %3926  ;;  %v2935_v28 = vmul.f32 %v3925_v19, %v5491_v61  ;;  %vm2940_vm12 = vweird.f32 %v3925_v19  ;;  %v3769_v61 = vld [vmem:[%s5533_s12] ss:$0 sm:$0xff] }
 0x681   :  { %v2881_v41 = vpop.f32.mrf.mxu3  ;;  %v2964_v62 = vmul.f32 %v3927_v30, %v5493_v24  ;;  %v2927_v44 = vor.u32 1.1754944e-38, %v2926_v56  ;;  %vm2925_vm11 = vcmp.eq.f32.partialorder %v2924_v14, 8.507059e+37  ;;  %vm2941_vm14 = vmor %vm2939_vm13, %vm2940_vm12  ;;  %vm2970_vm0 = vweird.f32 %v3927_v30 }
 0x682   :  { %v2936_v58 = vsub.f32 1.0, %v2935_v28  ;;  %v2882_v21 = vadd.f32 %v2881_v41, %v2869_v42  ;;  %vm2971_vm2 = vmor %vm2969_vm15, %vm2970_vm0 }
 0x683   :  { %v2909_v34 = vpop.f32.mrf.mxu1  ;;  %v2965_v52 = vmul.f32 %v3927_v30, %v2964_v62 }
 0x684   :  { %v2937_v59 = vmul.f32 %v3925_v19, %v2936_v58 }
 0x685   :  { %v3929_v20 = vpop.eup %3928  ;;  %v2966_v33 = vmul.f32 0.5, %v2965_v52 }
 0x686   :  { %v2916_v39 = vmul.f32 %v3929_v20, %v2914_v51  ;;  %vm2921_vm8 = vweird.f32 %v3929_v20  ;;  %v2938_v50 = vadd.f32 %v3925_v19, %v2937_v59 }
 0x687   :  { %vm2922_vm10 = vmor %vm2920_vm9, %vm2921_vm8  ;;  %v2967_v9 = vsub.f32 1.5, %v2966_v33 }
 0x688   :  { %v2917_v13 = vsub.f32 1.0, %v2916_v39  ;;  %v2942_v6 = vsel %vm2941_vm14, %v3925_v19, %v2938_v50 }
 0x689   :  { %v2883_v60 = vpop.f32.mrf.mxu3  ;;  %v2947_v53 = vsel %vm2944_vm1, %v2946_v47, %v2942_v6  ;;  %v2968_v45 = vmul.f32 %v3927_v30, %v2967_v9 }
 0x68a   :  { %v2918_v26 = vmul.f32 %v3929_v20, %v2917_v13  ;;  %v2952_v12 = vsub.f32 1.0, %v2947_v53  ;;  %v2954_v18 = vmul.f32 %v2947_v53, %v5482_v3 }
 0x68b   :  { %v2972_v31 = vsel %vm2971_vm2, %v3927_v30, %v2968_v45 }
 0x68c   :  { %v2919_v10 = vadd.f32 %v3929_v20, %v2918_v26  ;;  %v2974_v17 = vperm.slane %v2972_v31, 0 }
 0x68e   :  { %v2923_v46 = vsel %vm2922_vm10, %v3929_v20, %v2919_v10 }
 0x68f   :  { %v2928_v2 = vsel %vm2925_vm11, %v2927_v44, %v2923_v46 }
 0x690   :  { %v2949_v35 = vmul.f32 %v2928_v2, %v2908_v1 }
 0x692   :  { %v2950_v54 = vadd.f32 %v2949_v35, %v2882_v21 }
 0x694   :  { %3930 = vtanh.f32 %v2950_v54 }
 0x69a   :  { %v3931_v37 = vpop.eup %3930 }
 0x69b   :  { %v2953_v49 = vmul.f32 %v3931_v37, %v2952_v12 }
 0x69d   :  { %v2955_v0 = vadd.f32 %v2954_v18, %v2953_v49 }
 0x69f   :  { %v2960_v57 = vsub.f32 %v2955_v0, %v3766_v32 }
 0x6a1   :  { %v2976_v22 = vmul.f32 %v2974_v17, %v2960_v57 }
 0x6a3   :  { %v2981_v43 = vmul.f32 %v3767_v7, %v2976_v22 }
 0x6a5   :  { %v2986_v4 = vadd.f32 %v3768_v11, %v2981_v43 }
 0x6a7   :  { %v2987_v40 = vmax.f32 %v2986_v4, 0.0 }
 0x6a9   :  { %v2988_v3 = vpack.c.bf16 %v2987_v40, %v2987_v40 }
 0x6ab   :  { %3065 = vmatmul.bf16.vlgmr.msra.gmra.mxu2 %v2988_v3 }
 0x72e   :  { %v3066_v29 = vpop.f32.mrf.mxu2 }
 0x72f   :  { %v3067_v5 = vadd.f32 %v3769_v61, %v3066_v29 }
 0x731   :  { %3070 = vst [vmem:[#allocation14] sm:$0xff] %v3067_v5 }
 0x732   :  { %3081 = dma.vmem_to_hbm [thread:$0]  %s3077_s18, 128, %s3079_s7, [#allocation5]  }
 0x736   :  { %v3068_v38 = vpop.f32.mrf.mxu2 }
 0x737   :  { %4110 = dma.done.wait [#allocation5], 128  }
 0x738   :  { %4111 = vsyncadd [#allocation5], 4294967168 }
 0x739   :  { %3086 = vsyncpa [#allocation4], 1 }
 0x73a   :  { %3087 = vsyncpa [#allocation7], 1 }
 0x73b   :  { %3088 = vsyncpa [#allocation10], 1 }
 0x73c   :  { %3089 = vsyncpa [#allocation13], 1 }
 0x73d   :  { %3090 = vsyncpa [#allocation5], 1 }

</bundles_post_ra>
